<compile_context>
chip_gen: v7x
topology: tpu7x:2x2x1
jax: 0.10.0
libtpu: 0.0.40
codegen_flags: <defaults>
</compile_context>

<pallas_src>
import functools
from math import ceil

import numpy as np
import jax
import jax.numpy as jnp
from jax import lax
from jax.experimental import pallas as pl
from jax.experimental.pallas import tpu as pltpu

_SELU_ALPHA = 1.6732632423543772
_SELU_SCALE = 1.0507009873554805
_EPS = 1e-15

_VMEM = pltpu.MemorySpace.VMEM
_VMEM_LIMIT = 32 * 1024 * 1024  # safe on v5e/v6e (128 MiB) and v7x (64 MiB physical)


def _round_up(v, m):
    return ((v + m - 1) // m) * m


# ----------------------------------------------------------------------------
# Kernel 1: GCN conv (x @ W fused into the tiled A_norm aggregation) + ReLU
# ----------------------------------------------------------------------------
def _gcn_kernel(adj_ref, x_ref, w_ref, b_ref, o_ref, acc_ref):
    # out = relu( A_norm @ (x @ W) + b ), tiled over (row blocks i, K blocks k).
    # x@W is recomputed per (i,k) block instead of a separate pallas_call that
    # writes xw to HBM and re-reads it (negligible extra MXU push, hidden under DMA).
    @pl.when(pl.program_id(1) == 0)
    def _():
        acc_ref[...] = jnp.zeros_like(acc_ref)

    xw = jnp.dot(x_ref[...].astype(jnp.bfloat16), w_ref[...].astype(jnp.bfloat16),
                 preferred_element_type=jnp.float32).astype(jnp.bfloat16)
    acc_ref[...] += jnp.dot(adj_ref[...], xw, preferred_element_type=jnp.float32)

    @pl.when(pl.program_id(1) == pl.num_programs(1) - 1)
    def _():
        o_ref[...] = jnp.maximum(acc_ref[...] + b_ref[...], 0.0)


def prepare_gcn_adjacency(adj_norm, *, max_tile=1024):
    # One-time pad + bf16 cast of the (cached) normalized adjacency, done OUTSIDE
    # the jitted per-forward path so the N^2 copy is not paid every call.
    n = adj_norm.shape[0]
    t = min(max_tile, _round_up(n, 8))
    n_pad = _round_up(n, t)
    adj_p = jnp.pad(adj_norm, ((0, n_pad - n), (0, n_pad - n))).astype(jnp.bfloat16)
    return adj_p, t


def gcn_conv_relu(adj_pad16, x, w, b, *, tile):
    # adj_pad16: [n_pad, n_pad] bf16 (pre-padded / pre-cast). x is padded here
    # (tiny N x F copy; x is fresh data every forward).
    n_pad = adj_pad16.shape[0]
    n, f_in = x.shape
    hid = w.shape[1]
    x_p = jnp.pad(x, ((0, n_pad - n), (0, 0)))
    nb = n_pad // tile
    return pl.pallas_call(
        _gcn_kernel,
        grid=(nb, nb),
        out_shape=jax.ShapeDtypeStruct((n_pad, hid), jnp.float32),
        in_specs=[pl.BlockSpec((tile, tile), lambda i, k: (i, k)),
                  pl.BlockSpec((tile, f_in), lambda i, k: (k, 0)),
                  pl.BlockSpec((f_in, hid), lambda i, k: (0, 0)),
                  pl.BlockSpec((1, hid), lambda i, k: (0, 0))],
        out_specs=pl.BlockSpec((tile, hid), lambda i, k: (i, 0)),
        scratch_shapes=[pltpu.VMEM((tile, hid), jnp.float32)],
        compiler_params=pltpu.CompilerParams(
            dimension_semantics=("parallel", "arbitrary"),  # megacore on row blocks
            vmem_limit_bytes=_VMEM_LIMIT),
    )(adj_pad16, x_p, w, b)


# ----------------------------------------------------------------------------
# Kernel 2: fused dense pipeline (pool1 -> conv2 -> pool2 -> conv3 -> head + losses)
# ----------------------------------------------------------------------------
def _selu(x):
    return _SELU_SCALE * jnp.where(
        x > 0.0, x, _SELU_ALPHA * (jnp.exp(jnp.minimum(x, 0.0)) - 1.0))


def _assign_rows(x2d, w1, b1, w2, b2):
    # DMoN assignment MLP (Linear -> Linear, no activation in between) + softmax.
    x16 = x2d.astype(jnp.bfloat16)
    h = jnp.dot(x16, w1.astype(jnp.bfloat16), preferred_element_type=jnp.float32) + b1
    logits = jnp.dot(h.astype(jnp.bfloat16), w2.astype(jnp.bfloat16),
                     preferred_element_type=jnp.float32) + b2
    lmax = jnp.max(logits, axis=-1, keepdims=True)
    e = jnp.exp(logits - lmax)
    return e / jnp.sum(e, axis=-1, keepdims=True)


def _dmon_graph(x, adj16, s, eye):
    # Single-graph DMoN: pooled features, normalized coarse adjacency, and the sum
    # of spectral + ortho + cluster losses.  All node-axis contractions use bf16
    # operands with f32 accumulation; the N^2 block is never materialized in f32.
    n = adj16.shape[0]
    c = eye.shape[0]
    i_fro = float(c) ** 0.5
    cdims = (((0,), (0,)), ((), ()))          # contract axis 0 <-> axis 0 (no .T)

    s16 = s.astype(jnp.bfloat16)
    x16 = x.astype(jnp.bfloat16)

    # Pooled features: selu(S^T X).
    pooled = lax.dot_general(s16, x16, cdims, preferred_element_type=jnp.float32)
    pooled = _selu(pooled)                                                   # [C,H]

    # Coarsened adjacency: S^T A S.
    adj_s = jnp.dot(adj16, s16, preferred_element_type=jnp.float32)          # [N,C]
    out_adj = lax.dot_general(s16, adj_s.astype(jnp.bfloat16), cdims,
                              preferred_element_type=jnp.float32)            # [C,C]

    # Degrees via bf16 MXU row-sum (exact for 0/1 adjacency), f32 accumulation.
    degrees = jnp.dot(adj16, jnp.ones((n, 1), jnp.bfloat16),
                      preferred_element_type=jnp.float32)                    # [N,1]
    two_m = jnp.maximum(jnp.sum(degrees, axis=0, keepdims=True), _EPS)       # [1,1]
    inv_2m = 1.0 / two_m                                  # exact (feeds the loss)

    # Spectral (modularity) loss: -Tr(S^T A S - (S^T d)(d^T S)/2m) / 2m.
    ca = jnp.sum(s * degrees, axis=0, keepdims=True)                         # [1,C]
    tr_norm = jnp.sum(ca * ca, axis=-1, keepdims=True)                       # [1,1]
    tr_out = jnp.sum(jnp.sum(out_adj * eye, axis=-1, keepdims=True),
                     axis=0, keepdims=True)                                  # [1,1]
    spectral = -(tr_out - tr_norm * inv_2m) * inv_2m

    # Orthogonality loss.
    ss = lax.dot_general(s16, s16, cdims, preferred_element_type=jnp.float32)
    ss_fro = jnp.sqrt(jnp.sum(jnp.sum(ss * ss, axis=-1, keepdims=True),
                              axis=0, keepdims=True))
    diff = ss / jnp.maximum(ss_fro, _EPS) - eye * (1.0 / i_fro)   # exact scalar divide
    orth = jnp.sqrt(jnp.sum(jnp.sum(diff * diff, axis=-1, keepdims=True),
                            axis=0, keepdims=True))

    # Cluster-size loss (sum over s == number of real nodes; softmax rows sum to 1).
    csize = jnp.sum(s, axis=0, keepdims=True)                                # [1,C]
    cnorm = jnp.sqrt(jnp.sum(csize * csize, axis=-1, keepdims=True))
    msum = jnp.maximum(jnp.sum(csize, axis=-1, keepdims=True), _EPS)
    cluster = cnorm / msum * i_fro - 1.0                          # exact scalar divide

    # Zero diagonal + symmetric normalization (out_adj symmetric -> row sums equal
    # column sums; elementwise normalization keeps the fast approx reciprocal).
    out_adj = out_adj * (1.0 - eye)
    d_col = jnp.sqrt(jnp.sum(out_adj, axis=-1, keepdims=True)) + _EPS        # [C,1]
    d_row = jnp.sqrt(jnp.sum(out_adj, axis=0, keepdims=True)) + _EPS         # [1,C]
    out_adj = out_adj * pl.reciprocal(d_row, approx=True) \
                      * pl.reciprocal(d_col, approx=True)

    return pooled, out_adj, spectral + orth + cluster


def _graph_conv(x, adj16, wrel, brel, wroot, relu):
    # DenseGraphConv (aggr='add'): lin_rel(adj @ x) + lin_root(x), single graph.
    # TODO(synk): lin_rel/lin_root could merge into one (K,2H)@(2H,H) dot via a
    # lane-axis concat; kept as two dots to avoid a sub-128-lane concatenate relayout.
    x16 = x.astype(jnp.bfloat16)
    agg = jnp.dot(adj16, x16, preferred_element_type=jnp.float32)
    out = (jnp.dot(agg.astype(jnp.bfloat16), wrel.astype(jnp.bfloat16),
                   preferred_element_type=jnp.float32)
           + jnp.dot(x16, wroot.astype(jnp.bfloat16),
                     preferred_element_type=jnp.float32) + brel)
    if relu:
        out = jnp.maximum(out, 0.0)
    return out


def _fused_dense_kernel(xd_ref, adj_ref, mask_ref, eye1_ref, eye2_ref,
                        p1w1_ref, p1b1_ref, p1w2_ref, p1b2_ref,
                        c2wrel_ref, c2brel_ref, c2wroot_ref,
                        p2w1_ref, p2b1_ref, p2w2_ref, p2b2_ref,
                        c3wrel_ref, c3brel_ref, c3wroot_ref,
                        l1w_ref, l1b_ref, l2w_ref, l2b_ref,
                        s1_ref, logp_ref, aux_ref):
    # Whole post-dense-batching pipeline fused into ONE grid-less call: every
    # intermediate stays on-chip; only s1, log-probs and the summed loss go to HBM.
    bsz, n, hid = xd_ref.shape
    c1 = p1w2_ref.shape[1]

    xd = xd_ref[...]                          # [B,N,H] f32 (already masked)
    adj16 = adj_ref[...]                      # [B,N,N] bf16
    mask = mask_ref[...]                      # [B,N,1] f32
    eye1 = eye1_ref[...]
    eye2 = eye2_ref[...]

    # Hoist weight loads (+ bf16 cast for matmul operands) out of the batch loop.
    p1w1 = p1w1_ref[...].astype(jnp.bfloat16); p1b1 = p1b1_ref[...]
    p1w2 = p1w2_ref[...].astype(jnp.bfloat16); p1b2 = p1b2_ref[...]
    c2wrel = c2wrel_ref[...].astype(jnp.bfloat16); c2brel = c2brel_ref[...]
    c2wroot = c2wroot_ref[...].astype(jnp.bfloat16)
    p2w1 = p2w1_ref[...].astype(jnp.bfloat16); p2b1 = p2b1_ref[...]
    p2w2 = p2w2_ref[...].astype(jnp.bfloat16); p2b2 = p2b2_ref[...]
    c3wrel = c3wrel_ref[...].astype(jnp.bfloat16); c3brel = c3brel_ref[...]
    c3wroot = c3wroot_ref[...].astype(jnp.bfloat16)
    l1w = l1w_ref[...].astype(jnp.bfloat16); l1b = l1b_ref[...]
    l2w = l2w_ref[...].astype(jnp.bfloat16); l2b = l2b_ref[...]

    # pool1 assignment MLP batched over ALL B*N rows (one MXU pass, not per graph).
    s1_flat = _assign_rows(xd.reshape(bsz * n, hid), p1w1, p1b1, p1w2, p1b2)
    s1 = s1_flat.reshape(bsz, n, c1) * mask
    s1_ref[...] = s1

    loss_sum = jnp.zeros((1, 1), jnp.float32)
    for b in range(bsz):                      # static unroll (B is small)
        # ---- pool1: per-graph S^T A S / pooled features / losses ----
        x1, a1, l1 = _dmon_graph(xd[b], adj16[b], s1[b], eye1)   # [C1,H], [C1,C1]
        a1_16 = a1.astype(jnp.bfloat16)
        # ---- conv2 (+ReLU) ----
        x1 = _graph_conv(x1, a1_16, c2wrel, c2brel, c2wroot, relu=True)
        # ---- pool2 (no mask) ----
        s2 = _assign_rows(x1, p2w1, p2b1, p2w2, p2b2)            # [C1,C2]
        x2, a2, l2 = _dmon_graph(x1, a1_16, s2, eye2)            # [C2,H], [C2,C2]
        # ---- conv3 (no ReLU) ----
        x2 = _graph_conv(x2, a2.astype(jnp.bfloat16), c3wrel, c3brel, c3wroot,
                         relu=False)
        # ---- head: mean over clusters, lin1+ReLU, lin2, log_softmax ----
        xm = jnp.mean(x2, axis=0, keepdims=True)                 # [1,H]
        h = jnp.maximum(
            jnp.dot(xm.astype(jnp.bfloat16), l1w,
                    preferred_element_type=jnp.float32) + l1b, 0.0)
        logits = jnp.dot(h.astype(jnp.bfloat16), l2w,
                         preferred_element_type=jnp.float32) + l2b
        shifted = logits - jnp.max(logits, axis=-1, keepdims=True)
        logp = shifted - jnp.log(jnp.sum(jnp.exp(shifted), axis=-1, keepdims=True))
        logp_ref[pl.ds(b, 1), :] = logp
        loss_sum = loss_sum + l1 + l2

    aux_ref[...] = loss_sum * (1.0 / bsz)     # batch-mean of the six DMoN losses


def fused_dense_forward(xd, adj_d16, mask, p):
    bsz, n, _ = xd.shape
    c1 = p['p1_w2'].shape[1]
    c2 = p['p2_w2'].shape[1]
    out_ch = p['lin2_w'].shape[1]
    eye1 = jnp.eye(c1, dtype=jnp.float32)
    eye2 = jnp.eye(c2, dtype=jnp.float32)
    inputs = (xd, adj_d16, mask, eye1, eye2,
              p['p1_w1'], p['p1_b1'], p['p1_w2'], p['p1_b2'],
              p['conv2_wrel'], p['conv2_brel'], p['conv2_wroot'],
              p['p2_w1'], p['p2_b1'], p['p2_w2'], p['p2_b2'],
              p['conv3_wrel'], p['conv3_brel'], p['conv3_wroot'],
              p['lin1_w'], p['lin1_b'], p['lin2_w'], p['lin2_b'])
    s1, logp, aux = pl.pallas_call(
        _fused_dense_kernel,
        out_shape=(jax.ShapeDtypeStruct((bsz, n, c1), jnp.float32),
                   jax.ShapeDtypeStruct((bsz, out_ch), jnp.float32),
                   jax.ShapeDtypeStruct((1, 1), jnp.float32)),
        in_specs=[pl.BlockSpec(memory_space=_VMEM)] * len(inputs),
        out_specs=(pl.BlockSpec(memory_space=_VMEM),) * 3,
        compiler_params=pltpu.CompilerParams(vmem_limit_bytes=_VMEM_LIMIT),
    )(*inputs)
    return s1, logp, aux


# ----------------------------------------------------------------------------
# Model glue
# ----------------------------------------------------------------------------
def init_params(key, in_channels, hidden, out_channels, k1, k2):
    def lin(k, fi, fo):
        kw, kb = jax.random.split(k)
        w = jax.random.normal(kw, (fi, fo), jnp.float32) / jnp.sqrt(jnp.float32(fi))
        b = jax.random.normal(kb, (1, fo), jnp.float32) * 0.01
        return w, b
    keys = jax.random.split(key, 11)
    p = {}
    p['conv1_w'], p['conv1_b'] = lin(keys[0], in_channels, hidden)
    p['p1_w1'], p['p1_b1'] = lin(keys[1], hidden, hidden)
    p['p1_w2'], p['p1_b2'] = lin(keys[2], hidden, k1)
    p['conv2_wrel'], p['conv2_brel'] = lin(keys[3], hidden, hidden)
    p['conv2_wroot'], _ = lin(keys[4], hidden, hidden)
    p['p2_w1'], p['p2_b1'] = lin(keys[5], hidden, hidden)
    p['p2_w2'], p['p2_b2'] = lin(keys[6], hidden, k2)
    p['conv3_wrel'], p['conv3_brel'] = lin(keys[7], hidden, hidden)
    p['conv3_wroot'], _ = lin(keys[8], hidden, hidden)
    p['lin1_w'], p['lin1_b'] = lin(keys[9], hidden, hidden)
    p['lin2_w'], p['lin2_b'] = lin(keys[10], hidden, out_channels)
    return p


def dense_batch_gather(h_pad, adj_unw16, sizes, nmax):
    # to_dense_batch / to_dense_adj as ONE vectorized gather (no per-graph scatter).
    # The dense-batched adjacency is produced directly in bf16 so the B*N^2 block
    # never hits HBM in f32.
    # TODO(synk): could push this gather into the fused kernel via
    # PrefetchScalarGridSpec + pl.Element row gather so it never hits HBM at all.
    bsz = len(sizes)
    offsets = np.cumsum([0] + list(sizes[:-1]))
    g_np = np.zeros((bsz, nmax), np.int32)
    valid_np = np.zeros((bsz, nmax), np.float32)
    for bi, (off, sz) in enumerate(zip(offsets, sizes)):
        g_np[bi, :sz] = off + np.arange(sz)
        valid_np[bi, :sz] = 1.0
    g = jnp.asarray(g_np)
    valid = jnp.asarray(valid_np)
    valid16 = valid.astype(jnp.bfloat16)
    xd = h_pad[g] * valid[..., None]
    mask = valid[..., None]
    adj_d = adj_unw16[g[:, :, None], g[:, None, :]] \
        * valid16[:, :, None] * valid16[:, None, :]
    return xd, adj_d, mask


@functools.partial(jax.jit, static_argnames=("sizes", "nmax", "tile"))
def net_forward(p, x, adj_norm_pad16, adj_unw16, *, sizes, nmax, tile):
    # conv1 (GCN, normalized, cached adjacency, +ReLU) -- Pallas, x@W fused, tiled.
    h = gcn_conv_relu(adj_norm_pad16, x, p['conv1_w'], p['conv1_b'], tile=tile)
    # to_dense_batch / to_dense_adj -- vectorized gather glue (bf16 adjacency).
    xd, adj_d, mask = dense_batch_gather(h, adj_unw16, sizes, nmax)
    # pool1 -> conv2 -> pool2 -> conv3 -> head + all DMoN losses: ONE fused call.
    s1, logp, aux = fused_dense_forward(xd, adj_d, mask, p)
    # TODO(synk): the reference uses a custom DMoNPooling returning 7 values; `clu`
    # is exposed as the hard cluster assignment of pool1 (argmax of the masked soft
    # assignment); padded rows map to cluster 0.
    clu = jnp.argmax(s1, axis=-1)
    return logp, aux[0, 0], clu


# ----------------------------------------------------------------------------
if __name__ == "__main__":
    in_channels, hidden, out_channels = 8, 32, 6
    avg_num_nodes = 24
    k1 = ceil(0.5 * avg_num_nodes)   # 12
    k2 = ceil(0.5 * k1)              # 6
    sizes = (12, 10)
    nmax = max(sizes)
    n_total = sum(sizes)

    key = jax.random.PRNGKey(0)
    k_x, k_g0, k_g1, k_w, k_p = jax.random.split(key, 5)

    x = jax.random.normal(k_x, (n_total, in_channels), jnp.float32)

    # Random symmetric 0/1 graphs (no self loops); a ring guarantees connectivity.
    adj_blocks = []
    for kg, n in zip([k_g0, k_g1], sizes):
        u = jax.random.uniform(kg, (n, n))
        a = ((u + u.T) > 1.0).astype(jnp.float32)
        ring = jnp.eye(n, k=1) + jnp.eye(n, k=-1)
        ring = ring.at[0, n - 1].set(1.0).at[n - 1, 0].set(1.0)
        adj_blocks.append(jnp.clip(a + ring, 0.0, 1.0) * (1.0 - jnp.eye(n)))

    # Block-diagonal unweighted (for to_dense_adj) and weighted (for GCN) adjacency.
    A_unw = jnp.zeros((n_total, n_total), jnp.float32)
    A_w = jnp.zeros((n_total, n_total), jnp.float32)
    off = 0
    for kg, n, a in zip(jax.random.split(k_w, len(sizes)), sizes, adj_blocks):
        w = 0.5 + jax.random.uniform(kg, (n, n))
        A_unw = A_unw.at[off:off + n, off:off + n].set(a)
        A_w = A_w.at[off:off + n, off:off + n].set(a * 0.5 * (w + w.T))
        off += n

    # GCN symmetric normalization with self loops (glue; the matmul runs in-kernel).
    A_hat = A_w + jnp.eye(n_total, dtype=jnp.float32)
    dinv = 1.0 / jnp.sqrt(jnp.sum(A_hat, axis=1))
    adj_norm = dinv[:, None] * A_hat * dinv[None, :]

    # One-time preprocessing OUTSIDE the jitted forward (cached GCN adjacency):
    adj_norm_pad16, tile = prepare_gcn_adjacency(adj_norm)
    adj_unw16 = A_unw.astype(jnp.bfloat16)

    params = init_params(k_p, in_channels, hidden, out_channels, k1, k2)

    logp, aux, clu = net_forward(params, x, adj_norm_pad16, adj_unw16,
                                 sizes=sizes, nmax=nmax, tile=tile)
    jax.block_until_ready((logp, aux, clu))
    assert logp.shape == (len(sizes), out_channels)
    assert clu.shape == (len(sizes), nmax)
    assert bool(jnp.all(jnp.isfinite(logp))) and bool(jnp.isfinite(aux))
    print("KERNEL_OK")
</pallas_src>

<mosaic_0001>
module attributes {stable_mosaic.version = 11 : i64} {
  func.func @_fused_dense_kernel(%arg0: memref<2x12x32xf32, #tpu.memory_space<vmem>>, %arg1: memref<2x12x12xbf16, #tpu.memory_space<vmem>>, %arg2: memref<2x12x1xf32, #tpu.memory_space<vmem>>, %arg3: memref<12x12xf32, #tpu.memory_space<vmem>>, %arg4: memref<6x6xf32, #tpu.memory_space<vmem>>, %arg5: memref<32x32xf32, #tpu.memory_space<vmem>>, %arg6: memref<1x32xf32, #tpu.memory_space<vmem>>, %arg7: memref<32x12xf32, #tpu.memory_space<vmem>>, %arg8: memref<1x12xf32, #tpu.memory_space<vmem>>, %arg9: memref<32x32xf32, #tpu.memory_space<vmem>>, %arg10: memref<1x32xf32, #tpu.memory_space<vmem>>, %arg11: memref<32x32xf32, #tpu.memory_space<vmem>>, %arg12: memref<32x32xf32, #tpu.memory_space<vmem>>, %arg13: memref<1x32xf32, #tpu.memory_space<vmem>>, %arg14: memref<32x6xf32, #tpu.memory_space<vmem>>, %arg15: memref<1x6xf32, #tpu.memory_space<vmem>>, %arg16: memref<32x32xf32, #tpu.memory_space<vmem>>, %arg17: memref<1x32xf32, #tpu.memory_space<vmem>>, %arg18: memref<32x32xf32, #tpu.memory_space<vmem>>, %arg19: memref<32x32xf32, #tpu.memory_space<vmem>>, %arg20: memref<1x32xf32, #tpu.memory_space<vmem>>, %arg21: memref<32x6xf32, #tpu.memory_space<vmem>>, %arg22: memref<1x6xf32, #tpu.memory_space<vmem>>, %arg23: memref<2x12x12xf32, #tpu.memory_space<vmem>>, %arg24: memref<2x6xf32, #tpu.memory_space<vmem>>, %arg25: memref<1x1xf32, #tpu.memory_space<vmem>>) attributes {dimension_semantics = [], scalar_prefetch = 0 : i64, scratch_operands = 0 : i64, tpu.core_type = #tpu.core_type<tc>} {
    %c0 = arith.constant 0 : index
    %c0_0 = arith.constant 0 : index
    %c0_1 = arith.constant 0 : index
    %0 = vector.load %arg0[%c0, %c0_0, %c0_1] : memref<2x12x32xf32, #tpu.memory_space<vmem>>, vector<2x12x32xf32>
    %c0_2 = arith.constant 0 : index
    %c0_3 = arith.constant 0 : index
    %c0_4 = arith.constant 0 : index
    %1 = vector.load %arg1[%c0_2, %c0_3, %c0_4] : memref<2x12x12xbf16, #tpu.memory_space<vmem>>, vector<2x12x12xbf16>
    %c0_5 = arith.constant 0 : index
    %c0_6 = arith.constant 0 : index
    %c0_7 = arith.constant 0 : index
    %2 = vector.load %arg2[%c0_5, %c0_6, %c0_7] : memref<2x12x1xf32, #tpu.memory_space<vmem>>, vector<2x12x1xf32>
    %c0_8 = arith.constant 0 : index
    %c0_9 = arith.constant 0 : index
    %3 = vector.load %arg3[%c0_8, %c0_9] : memref<12x12xf32, #tpu.memory_space<vmem>>, vector<12x12xf32>
    %c0_10 = arith.constant 0 : index
    %c0_11 = arith.constant 0 : index
    %4 = vector.load %arg4[%c0_10, %c0_11] : memref<6x6xf32, #tpu.memory_space<vmem>>, vector<6x6xf32>
    %c0_12 = arith.constant 0 : index
    %c0_13 = arith.constant 0 : index
    %5 = vector.load %arg5[%c0_12, %c0_13] : memref<32x32xf32, #tpu.memory_space<vmem>>, vector<32x32xf32>
    %6 = arith.truncf %5 : vector<32x32xf32> to vector<32x32xbf16>
    %c0_14 = arith.constant 0 : index
    %c0_15 = arith.constant 0 : index
    %7 = vector.load %arg6[%c0_14, %c0_15] : memref<1x32xf32, #tpu.memory_space<vmem>>, vector<1x32xf32>
    %c0_16 = arith.constant 0 : index
    %c0_17 = arith.constant 0 : index
    %8 = vector.load %arg7[%c0_16, %c0_17] : memref<32x12xf32, #tpu.memory_space<vmem>>, vector<32x12xf32>
    %9 = arith.truncf %8 : vector<32x12xf32> to vector<32x12xbf16>
    %c0_18 = arith.constant 0 : index
    %c0_19 = arith.constant 0 : index
    %10 = vector.load %arg8[%c0_18, %c0_19] : memref<1x12xf32, #tpu.memory_space<vmem>>, vector<1x12xf32>
    %c0_20 = arith.constant 0 : index
    %c0_21 = arith.constant 0 : index
    %11 = vector.load %arg9[%c0_20, %c0_21] : memref<32x32xf32, #tpu.memory_space<vmem>>, vector<32x32xf32>
    %12 = arith.truncf %11 : vector<32x32xf32> to vector<32x32xbf16>
    %c0_22 = arith.constant 0 : index
    %c0_23 = arith.constant 0 : index
    %13 = vector.load %arg10[%c0_22, %c0_23] : memref<1x32xf32, #tpu.memory_space<vmem>>, vector<1x32xf32>
    %c0_24 = arith.constant 0 : index
    %c0_25 = arith.constant 0 : index
    %14 = vector.load %arg11[%c0_24, %c0_25] : memref<32x32xf32, #tpu.memory_space<vmem>>, vector<32x32xf32>
    %15 = arith.truncf %14 : vector<32x32xf32> to vector<32x32xbf16>
    %c0_26 = arith.constant 0 : index
    %c0_27 = arith.constant 0 : index
    %16 = vector.load %arg12[%c0_26, %c0_27] : memref<32x32xf32, #tpu.memory_space<vmem>>, vector<32x32xf32>
    %17 = arith.truncf %16 : vector<32x32xf32> to vector<32x32xbf16>
    %c0_28 = arith.constant 0 : index
    %c0_29 = arith.constant 0 : index
    %18 = vector.load %arg13[%c0_28, %c0_29] : memref<1x32xf32, #tpu.memory_space<vmem>>, vector<1x32xf32>
    %c0_30 = arith.constant 0 : index
    %c0_31 = arith.constant 0 : index
    %19 = vector.load %arg14[%c0_30, %c0_31] : memref<32x6xf32, #tpu.memory_space<vmem>>, vector<32x6xf32>
    %20 = arith.truncf %19 : vector<32x6xf32> to vector<32x6xbf16>
    %c0_32 = arith.constant 0 : index
    %c0_33 = arith.constant 0 : index
    %21 = vector.load %arg15[%c0_32, %c0_33] : memref<1x6xf32, #tpu.memory_space<vmem>>, vector<1x6xf32>
    %c0_34 = arith.constant 0 : index
    %c0_35 = arith.constant 0 : index
    %22 = vector.load %arg16[%c0_34, %c0_35] : memref<32x32xf32, #tpu.memory_space<vmem>>, vector<32x32xf32>
    %23 = arith.truncf %22 : vector<32x32xf32> to vector<32x32xbf16>
    %c0_36 = arith.constant 0 : index
    %c0_37 = arith.constant 0 : index
    %24 = vector.load %arg17[%c0_36, %c0_37] : memref<1x32xf32, #tpu.memory_space<vmem>>, vector<1x32xf32>
    %c0_38 = arith.constant 0 : index
    %c0_39 = arith.constant 0 : index
    %25 = vector.load %arg18[%c0_38, %c0_39] : memref<32x32xf32, #tpu.memory_space<vmem>>, vector<32x32xf32>
    %26 = arith.truncf %25 : vector<32x32xf32> to vector<32x32xbf16>
    %c0_40 = arith.constant 0 : index
    %c0_41 = arith.constant 0 : index
    %27 = vector.load %arg19[%c0_40, %c0_41] : memref<32x32xf32, #tpu.memory_space<vmem>>, vector<32x32xf32>
    %28 = arith.truncf %27 : vector<32x32xf32> to vector<32x32xbf16>
    %c0_42 = arith.constant 0 : index
    %c0_43 = arith.constant 0 : index
    %29 = vector.load %arg20[%c0_42, %c0_43] : memref<1x32xf32, #tpu.memory_space<vmem>>, vector<1x32xf32>
    %c0_44 = arith.constant 0 : index
    %c0_45 = arith.constant 0 : index
    %30 = vector.load %arg21[%c0_44, %c0_45] : memref<32x6xf32, #tpu.memory_space<vmem>>, vector<32x6xf32>
    %31 = arith.truncf %30 : vector<32x6xf32> to vector<32x6xbf16>
    %c0_46 = arith.constant 0 : index
    %c0_47 = arith.constant 0 : index
    %32 = vector.load %arg22[%c0_46, %c0_47] : memref<1x6xf32, #tpu.memory_space<vmem>>, vector<1x6xf32>
    %33 = vector.shape_cast %0 : vector<2x12x32xf32> to vector<24x32xf32>
    %34 = arith.truncf %33 : vector<24x32xf32> to vector<24x32xbf16>
    %cst = arith.constant dense<0.000000e+00> : vector<24x32xf32>
    %35 = tpu.matmul %34, %6, %cst {dimension_numbers = #tpu.dot_dimension_numbers<[1], [0], [0], [1], [0, 0, 1, 1], [], []>} : vector<24x32xbf16>, vector<32x32xbf16>, vector<24x32xf32> -> vector<24x32xf32>
    %36 = vector.broadcast %7 : vector<1x32xf32> to vector<24x32xf32>
    %37 = arith.addf %35, %36 : vector<24x32xf32>
    %38 = arith.truncf %37 : vector<24x32xf32> to vector<24x32xbf16>
    %cst_48 = arith.constant dense<0.000000e+00> : vector<24x12xf32>
    %39 = tpu.matmul %38, %9, %cst_48 {dimension_numbers = #tpu.dot_dimension_numbers<[1], [0], [0], [1], [0, 0, 1, 1], [], []>} : vector<24x32xbf16>, vector<32x12xbf16>, vector<24x12xf32> -> vector<24x12xf32>
    %40 = vector.broadcast %10 : vector<1x12xf32> to vector<24x12xf32>
    %41 = arith.addf %39, %40 : vector<24x12xf32>
    %cst_49 = arith.constant dense<0xFF800000> : vector<24xf32>
    %42 = vector.multi_reduction <maximumf>, %41, %cst_49 [1] : vector<24x12xf32> to vector<24xf32>
    %43 = vector.shape_cast %42 : vector<24xf32> to vector<24x1xf32>
    %44 = vector.broadcast %43 : vector<24x1xf32> to vector<24x12xf32>
    %45 = arith.subf %41, %44 : vector<24x12xf32>
    %46 = math.exp %45 : vector<24x12xf32>
    %cst_50 = arith.constant dense<0.000000e+00> : vector<24xf32>
    %47 = vector.multi_reduction <add>, %46, %cst_50 [1] : vector<24x12xf32> to vector<24xf32>
    %48 = vector.shape_cast %47 : vector<24xf32> to vector<24x1xf32>
    %49 = vector.broadcast %48 : vector<24x1xf32> to vector<24x12xf32>
    %50 = arith.divf %46, %49 : vector<24x12xf32>
    %51 = vector.shape_cast %50 : vector<24x12xf32> to vector<2x12x12xf32>
    %52 = vector.broadcast %2 : vector<2x12x1xf32> to vector<2x12x12xf32>
    %53 = arith.mulf %51, %52 : vector<2x12x12xf32>
    %c0_51 = arith.constant 0 : index
    %c0_52 = arith.constant 0 : index
    %c0_53 = arith.constant 0 : index
    %54 = vector.load %arg23[%c0_51, %c0_52, %c0_53] : memref<2x12x12xf32, #tpu.memory_space<vmem>>, vector<2x12x12xf32>
    tpu.vector_store %arg23[%c0_51, %c0_52, %c0_53], %53 {strides = array<i32>} : memref<2x12x12xf32, #tpu.memory_space<vmem>>, vector<2x12x12xf32>,
    %cst_54 = arith.constant 0.000000e+00 : f32
    %55 = vector.broadcast %cst_54 : f32 to vector<1x1xf32>
    %56 = vector.extract_strided_slice %0 {offsets = [0, 0, 0], sizes = [1, 12, 32], strides = [1, 1, 1]} : vector<2x12x32xf32> to vector<1x12x32xf32>
    %57 = vector.shape_cast %56 : vector<1x12x32xf32> to vector<12x32xf32>
    %58 = vector.extract_strided_slice %1 {offsets = [0, 0, 0], sizes = [1, 12, 12], strides = [1, 1, 1]} : vector<2x12x12xbf16> to vector<1x12x12xbf16>
    %59 = vector.shape_cast %58 : vector<1x12x12xbf16> to vector<12x12xbf16>
    %60 = vector.extract_strided_slice %53 {offsets = [0, 0, 0], sizes = [1, 12, 12], strides = [1, 1, 1]} : vector<2x12x12xf32> to vector<1x12x12xf32>
    %61 = vector.shape_cast %60 : vector<1x12x12xf32> to vector<12x12xf32>
    %62 = arith.truncf %61 : vector<12x12xf32> to vector<12x12xbf16>
    %63 = arith.truncf %57 : vector<12x32xf32> to vector<12x32xbf16>
    %cst_55 = arith.constant dense<0.000000e+00> : vector<12x32xf32>
    %64 = tpu.matmul %62, %63, %cst_55 {dimension_numbers = #tpu.dot_dimension_numbers<[0], [0], [1], [1], [0, 1, 1, 1], [], []>} : vector<12x12xbf16>, vector<12x32xbf16>, vector<12x32xf32> -> vector<12x32xf32>
    %cst_56 = arith.constant 0.000000e+00 : f32
    %65 = vector.broadcast %cst_56 : f32 to vector<12x32xf32>
    %66 = arith.cmpf ogt, %64, %65 : vector<12x32xf32>
    %cst_57 = arith.constant 0.000000e+00 : f32
    %67 = vector.broadcast %cst_57 : f32 to vector<12x32xf32>
    %68 = arith.minimumf %64, %67 : vector<12x32xf32>
    %69 = math.exp %68 : vector<12x32xf32>
    %cst_58 = arith.constant 1.000000e+00 : f32
    %70 = vector.broadcast %cst_58 : f32 to vector<12x32xf32>
    %71 = arith.subf %69, %70 : vector<12x32xf32>
    %cst_59 = arith.constant 1.67326319 : f32
    %72 = vector.broadcast %cst_59 : f32 to vector<12x32xf32>
    %73 = arith.mulf %72, %71 : vector<12x32xf32>
    %74 = arith.select %66, %64, %73 : vector<12x32xi1>, vector<12x32xf32>
    %cst_60 = arith.constant 1.05070102 : f32
    %75 = vector.broadcast %cst_60 : f32 to vector<12x32xf32>
    %76 = arith.mulf %75, %74 : vector<12x32xf32>
    %cst_61 = arith.constant dense<0.000000e+00> : vector<12x12xf32>
    %77 = tpu.matmul %59, %62, %cst_61 {dimension_numbers = #tpu.dot_dimension_numbers<[1], [0], [0], [1], [0, 0, 1, 1], [], []>} : vector<12x12xbf16>, vector<12x12xbf16>, vector<12x12xf32> -> vector<12x12xf32>
    %78 = arith.truncf %77 : vector<12x12xf32> to vector<12x12xbf16>
    %cst_62 = arith.constant dense<0.000000e+00> : vector<12x12xf32>
    %79 = tpu.matmul %62, %78, %cst_62 {dimension_numbers = #tpu.dot_dimension_numbers<[0], [0], [1], [1], [0, 1, 1, 1], [], []>} : vector<12x12xbf16>, vector<12x12xbf16>, vector<12x12xf32> -> vector<12x12xf32>
    %cst_63 = arith.constant 1.000000e+00 : bf16
    %80 = vector.broadcast %cst_63 : bf16 to vector<12x1xbf16>
    %cst_64 = arith.constant dense<0.000000e+00> : vector<12x1xf32>
    %81 = tpu.matmul %59, %80, %cst_64 {dimension_numbers = #tpu.dot_dimension_numbers<[1], [0], [0], [1], [0, 0, 1, 1], [], []>} : vector<12x12xbf16>, vector<12x1xbf16>, vector<12x1xf32> -> vector<12x1xf32>
    %cst_65 = arith.constant dense<0.000000e+00> : vector<1xf32>
    %82 = vector.multi_reduction <add>, %81, %cst_65 [0] : vector<12x1xf32> to vector<1xf32>
    %83 = vector.shape_cast %82 : vector<1xf32> to vector<1x1xf32>
    %cst_66 = arith.constant 1.000000e-15 : f32
    %84 = vector.broadcast %cst_66 : f32 to vector<1x1xf32>
    %85 = arith.maximumf %83, %84 : vector<1x1xf32>
    %cst_67 = arith.constant 1.000000e+00 : f32
    %86 = vector.broadcast %cst_67 : f32 to vector<1x1xf32>
    %87 = arith.divf %86, %85 : vector<1x1xf32>
    %88 = vector.broadcast %81 : vector<12x1xf32> to vector<12x12xf32>
    %89 = arith.mulf %61, %88 : vector<12x12xf32>
    %cst_68 = arith.constant dense<0.000000e+00> : vector<12xf32>
    %90 = vector.multi_reduction <add>, %89, %cst_68 [0] : vector<12x12xf32> to vector<12xf32>
    %91 = vector.shape_cast %90 : vector<12xf32> to vector<1x12xf32>
    %92 = arith.mulf %91, %91 : vector<1x12xf32>
    %cst_69 = arith.constant dense<0.000000e+00> : vector<1xf32>
    %93 = vector.multi_reduction <add>, %92, %cst_69 [1] : vector<1x12xf32> to vector<1xf32>
    %94 = vector.shape_cast %93 : vector<1xf32> to vector<1x1xf32>
    %95 = arith.mulf %79, %3 : vector<12x12xf32>
    %cst_70 = arith.constant dense<0.000000e+00> : vector<12xf32>
    %96 = vector.multi_reduction <add>, %95, %cst_70 [1] : vector<12x12xf32> to vector<12xf32>
    %97 = vector.shape_cast %96 : vector<12xf32> to vector<12x1xf32>
    %cst_71 = arith.constant dense<0.000000e+00> : vector<1xf32>
    %98 = vector.multi_reduction <add>, %97, %cst_71 [0] : vector<12x1xf32> to vector<1xf32>
    %99 = vector.shape_cast %98 : vector<1xf32> to vector<1x1xf32>
    %100 = arith.mulf %94, %87 : vector<1x1xf32>
    %101 = arith.subf %99, %100 : vector<1x1xf32>
    %cst_72 = arith.constant 0.000000e+00 : f32
    %102 = vector.broadcast %cst_72 : f32 to vector<1x1xf32>
    %103 = arith.subf %102, %101 : vector<1x1xf32>
    %104 = arith.mulf %103, %87 : vector<1x1xf32>
    %cst_73 = arith.constant dense<0.000000e+00> : vector<12x12xf32>
    %105 = tpu.matmul %62, %62, %cst_73 {dimension_numbers = #tpu.dot_dimension_numbers<[0], [0], [1], [1], [0, 1, 1, 1], [], []>} : vector<12x12xbf16>, vector<12x12xbf16>, vector<12x12xf32> -> vector<12x12xf32>
    %106 = arith.mulf %105, %105 : vector<12x12xf32>
    %cst_74 = arith.constant dense<0.000000e+00> : vector<12xf32>
    %107 = vector.multi_reduction <add>, %106, %cst_74 [1] : vector<12x12xf32> to vector<12xf32>
    %108 = vector.shape_cast %107 : vector<12xf32> to vector<12x1xf32>
    %cst_75 = arith.constant dense<0.000000e+00> : vector<1xf32>
    %109 = vector.multi_reduction <add>, %108, %cst_75 [0] : vector<12x1xf32> to vector<1xf32>
    %110 = vector.shape_cast %109 : vector<1xf32> to vector<1x1xf32>
    %111 = math.sqrt %110 : vector<1x1xf32>
    %cst_76 = arith.constant 1.000000e-15 : f32
    %112 = vector.broadcast %cst_76 : f32 to vector<1x1xf32>
    %113 = arith.maximumf %111, %112 : vector<1x1xf32>
    %114 = vector.broadcast %113 : vector<1x1xf32> to vector<12x12xf32>
    %115 = arith.divf %105, %114 : vector<12x12xf32>
    %cst_77 = arith.constant 0.288675129 : f32
    %116 = vector.broadcast %cst_77 : f32 to vector<12x12xf32>
    %117 = arith.mulf %3, %116 : vector<12x12xf32>
    %118 = arith.subf %115, %117 : vector<12x12xf32>
    %119 = arith.mulf %118, %118 : vector<12x12xf32>
    %cst_78 = arith.constant dense<0.000000e+00> : vector<12xf32>
    %120 = vector.multi_reduction <add>, %119, %cst_78 [1] : vector<12x12xf32> to vector<12xf32>
    %121 = vector.shape_cast %120 : vector<12xf32> to vector<12x1xf32>
    %cst_79 = arith.constant dense<0.000000e+00> : vector<1xf32>
    %122 = vector.multi_reduction <add>, %121, %cst_79 [0] : vector<12x1xf32> to vector<1xf32>
    %123 = vector.shape_cast %122 : vector<1xf32> to vector<1x1xf32>
    %124 = math.sqrt %123 : vector<1x1xf32>
    %cst_80 = arith.constant dense<0.000000e+00> : vector<12xf32>
    %125 = vector.multi_reduction <add>, %61, %cst_80 [0] : vector<12x12xf32> to vector<12xf32>
    %126 = vector.shape_cast %125 : vector<12xf32> to vector<1x12xf32>
    %127 = arith.mulf %126, %126 : vector<1x12xf32>
    %cst_81 = arith.constant dense<0.000000e+00> : vector<1xf32>
    %128 = vector.multi_reduction <add>, %127, %cst_81 [1] : vector<1x12xf32> to vector<1xf32>
    %129 = vector.shape_cast %128 : vector<1xf32> to vector<1x1xf32>
    %130 = math.sqrt %129 : vector<1x1xf32>
    %cst_82 = arith.constant dense<0.000000e+00> : vector<1xf32>
    %131 = vector.multi_reduction <add>, %126, %cst_82 [1] : vector<1x12xf32> to vector<1xf32>
    %132 = vector.shape_cast %131 : vector<1xf32> to vector<1x1xf32>
    %cst_83 = arith.constant 1.000000e-15 : f32
    %133 = vector.broadcast %cst_83 : f32 to vector<1x1xf32>
    %134 = arith.maximumf %132, %133 : vector<1x1xf32>
    %135 = arith.divf %130, %134 : vector<1x1xf32>
    %cst_84 = arith.constant 3.46410155 : f32
    %136 = vector.broadcast %cst_84 : f32 to vector<1x1xf32>
    %137 = arith.mulf %135, %136 : vector<1x1xf32>
    %cst_85 = arith.constant 1.000000e+00 : f32
    %138 = vector.broadcast %cst_85 : f32 to vector<1x1xf32>
    %139 = arith.subf %137, %138 : vector<1x1xf32>
    %cst_86 = arith.constant 1.000000e+00 : f32
    %140 = vector.broadcast %cst_86 : f32 to vector<12x12xf32>
    %141 = arith.subf %140, %3 : vector<12x12xf32>
    %142 = arith.mulf %79, %141 : vector<12x12xf32>
    %cst_87 = arith.constant dense<0.000000e+00> : vector<12xf32>
    %143 = vector.multi_reduction <add>, %142, %cst_87 [1] : vector<12x12xf32> to vector<12xf32>
    %144 = vector.shape_cast %143 : vector<12xf32> to vector<12x1xf32>
    %145 = math.sqrt %144 : vector<12x1xf32>
    %cst_88 = arith.constant 1.000000e-15 : f32
    %146 = vector.broadcast %cst_88 : f32 to vector<12x1xf32>
    %147 = arith.addf %145, %146 : vector<12x1xf32>
    %cst_89 = arith.constant dense<0.000000e+00> : vector<12xf32>
    %148 = vector.multi_reduction <add>, %142, %cst_89 [0] : vector<12x12xf32> to vector<12xf32>
    %149 = vector.shape_cast %148 : vector<12xf32> to vector<1x12xf32>
    %150 = math.sqrt %149 : vector<1x12xf32>
    %cst_90 = arith.constant 1.000000e-15 : f32
    %151 = vector.broadcast %cst_90 : f32 to vector<1x12xf32>
    %152 = arith.addf %150, %151 : vector<1x12xf32>
    %153 = tpu.reciprocal %152 {approx = true} : vector<1x12xf32> -> vector<1x12xf32>
    %154 = vector.broadcast %153 : vector<1x12xf32> to vector<12x12xf32>
    %155 = arith.mulf %142, %154 : vector<12x12xf32>
    %156 = tpu.reciprocal %147 {approx = true} : vector<12x1xf32> -> vector<12x1xf32>
    %157 = vector.broadcast %156 : vector<12x1xf32> to vector<12x12xf32>
    %158 = arith.mulf %155, %157 : vector<12x12xf32>
    %159 = arith.addf %104, %124 : vector<1x1xf32>
    %160 = arith.addf %159, %139 : vector<1x1xf32>
    %161 = arith.truncf %158 : vector<12x12xf32> to vector<12x12xbf16>
    %162 = arith.truncf %76 : vector<12x32xf32> to vector<12x32xbf16>
    %cst_91 = arith.constant dense<0.000000e+00> : vector<12x32xf32>
    %163 = tpu.matmul %161, %162, %cst_91 {dimension_numbers = #tpu.dot_dimension_numbers<[1], [0], [0], [1], [0, 0, 1, 1], [], []>} : vector<12x12xbf16>, vector<12x32xbf16>, vector<12x32xf32> -> vector<12x32xf32>
    %164 = arith.truncf %163 : vector<12x32xf32> to vector<12x32xbf16>
    %cst_92 = arith.constant dense<0.000000e+00> : vector<12x32xf32>
    %165 = tpu.matmul %164, %12, %cst_92 {dimension_numbers = #tpu.dot_dimension_numbers<[1], [0], [0], [1], [0, 0, 1, 1], [], []>} : vector<12x32xbf16>, vector<32x32xbf16>, vector<12x32xf32> -> vector<12x32xf32>
    %cst_93 = arith.constant dense<0.000000e+00> : vector<12x32xf32>
    %166 = tpu.matmul %162, %15, %cst_93 {dimension_numbers = #tpu.dot_dimension_numbers<[1], [0], [0], [1], [0, 0, 1, 1], [], []>} : vector<12x32xbf16>, vector<32x32xbf16>, vector<12x32xf32> -> vector<12x32xf32>
    %167 = arith.addf %165, %166 : vector<12x32xf32>
    %168 = vector.broadcast %13 : vector<1x32xf32> to vector<12x32xf32>
    %169 = arith.addf %167, %168 : vector<12x32xf32>
    %cst_94 = arith.constant 0.000000e+00 : f32
    %170 = vector.broadcast %cst_94 : f32 to vector<12x32xf32>
    %171 = arith.maximumf %169, %170 : vector<12x32xf32>
    %172 = arith.truncf %171 : vector<12x32xf32> to vector<12x32xbf16>
    %cst_95 = arith.constant dense<0.000000e+00> : vector<12x32xf32>
    %173 = tpu.matmul %172, %17, %cst_95 {dimension_numbers = #tpu.dot_dimension_numbers<[1], [0], [0], [1], [0, 0, 1, 1], [], []>} : vector<12x32xbf16>, vector<32x32xbf16>, vector<12x32xf32> -> vector<12x32xf32>
    %174 = vector.broadcast %18 : vector<1x32xf32> to vector<12x32xf32>
    %175 = arith.addf %173, %174 : vector<12x32xf32>
    %176 = arith.truncf %175 : vector<12x32xf32> to vector<12x32xbf16>
    %cst_96 = arith.constant dense<0.000000e+00> : vector<12x6xf32>
    %177 = tpu.matmul %176, %20, %cst_96 {dimension_numbers = #tpu.dot_dimension_numbers<[1], [0], [0], [1], [0, 0, 1, 1], [], []>} : vector<12x32xbf16>, vector<32x6xbf16>, vector<12x6xf32> -> vector<12x6xf32>
    %178 = vector.broadcast %21 : vector<1x6xf32> to vector<12x6xf32>
    %179 = arith.addf %177, %178 : vector<12x6xf32>
    %cst_97 = arith.constant dense<0xFF800000> : vector<12xf32>
    %180 = vector.multi_reduction <maximumf>, %179, %cst_97 [1] : vector<12x6xf32> to vector<12xf32>
    %181 = vector.shape_cast %180 : vector<12xf32> to vector<12x1xf32>
    %182 = vector.broadcast %181 : vector<12x1xf32> to vector<12x6xf32>
    %183 = arith.subf %179, %182 : vector<12x6xf32>
    %184 = math.exp %183 : vector<12x6xf32>
    %cst_98 = arith.constant dense<0.000000e+00> : vector<12xf32>
    %185 = vector.multi_reduction <add>, %184, %cst_98 [1] : vector<12x6xf32> to vector<12xf32>
    %186 = vector.shape_cast %185 : vector<12xf32> to vector<12x1xf32>
    %187 = vector.broadcast %186 : vector<12x1xf32> to vector<12x6xf32>
    %188 = arith.divf %184, %187 : vector<12x6xf32>
    %189 = arith.truncf %188 : vector<12x6xf32> to vector<12x6xbf16>
    %190 = arith.truncf %171 : vector<12x32xf32> to vector<12x32xbf16>
    %cst_99 = arith.constant dense<0.000000e+00> : vector<6x32xf32>
    %191 = tpu.matmul %189, %190, %cst_99 {dimension_numbers = #tpu.dot_dimension_numbers<[0], [0], [1], [1], [0, 1, 1, 1], [], []>} : vector<12x6xbf16>, vector<12x32xbf16>, vector<6x32xf32> -> vector<6x32xf32>
    %cst_100 = arith.constant 0.000000e+00 : f32
    %192 = vector.broadcast %cst_100 : f32 to vector<6x32xf32>
    %193 = arith.cmpf ogt, %191, %192 : vector<6x32xf32>
    %cst_101 = arith.constant 0.000000e+00 : f32
    %194 = vector.broadcast %cst_101 : f32 to vector<6x32xf32>
    %195 = arith.minimumf %191, %194 : vector<6x32xf32>
    %196 = math.exp %195 : vector<6x32xf32>
    %cst_102 = arith.constant 1.000000e+00 : f32
    %197 = vector.broadcast %cst_102 : f32 to vector<6x32xf32>
    %198 = arith.subf %196, %197 : vector<6x32xf32>
    %cst_103 = arith.constant 1.67326319 : f32
    %199 = vector.broadcast %cst_103 : f32 to vector<6x32xf32>
    %200 = arith.mulf %199, %198 : vector<6x32xf32>
    %201 = arith.select %193, %191, %200 : vector<6x32xi1>, vector<6x32xf32>
    %cst_104 = arith.constant 1.05070102 : f32
    %202 = vector.broadcast %cst_104 : f32 to vector<6x32xf32>
    %203 = arith.mulf %202, %201 : vector<6x32xf32>
    %cst_105 = arith.constant dense<0.000000e+00> : vector<12x6xf32>
    %204 = tpu.matmul %161, %189, %cst_105 {dimension_numbers = #tpu.dot_dimension_numbers<[1], [0], [0], [1], [0, 0, 1, 1], [], []>} : vector<12x12xbf16>, vector<12x6xbf16>, vector<12x6xf32> -> vector<12x6xf32>
    %205 = arith.truncf %204 : vector<12x6xf32> to vector<12x6xbf16>
    %cst_106 = arith.constant dense<0.000000e+00> : vector<6x6xf32>
    %206 = tpu.matmul %189, %205, %cst_106 {dimension_numbers = #tpu.dot_dimension_numbers<[0], [0], [1], [1], [0, 1, 1, 1], [], []>} : vector<12x6xbf16>, vector<12x6xbf16>, vector<6x6xf32> -> vector<6x6xf32>
    %cst_107 = arith.constant 1.000000e+00 : bf16
    %207 = vector.broadcast %cst_107 : bf16 to vector<12x1xbf16>
    %cst_108 = arith.constant dense<0.000000e+00> : vector<12x1xf32>
    %208 = tpu.matmul %161, %207, %cst_108 {dimension_numbers = #tpu.dot_dimension_numbers<[1], [0], [0], [1], [0, 0, 1, 1], [], []>} : vector<12x12xbf16>, vector<12x1xbf16>, vector<12x1xf32> -> vector<12x1xf32>
    %cst_109 = arith.constant dense<0.000000e+00> : vector<1xf32>
    %209 = vector.multi_reduction <add>, %208, %cst_109 [0] : vector<12x1xf32> to vector<1xf32>
    %210 = vector.shape_cast %209 : vector<1xf32> to vector<1x1xf32>
    %cst_110 = arith.constant 1.000000e-15 : f32
    %211 = vector.broadcast %cst_110 : f32 to vector<1x1xf32>
    %212 = arith.maximumf %210, %211 : vector<1x1xf32>
    %cst_111 = arith.constant 1.000000e+00 : f32
    %213 = vector.broadcast %cst_111 : f32 to vector<1x1xf32>
    %214 = arith.divf %213, %212 : vector<1x1xf32>
    %215 = vector.broadcast %208 : vector<12x1xf32> to vector<12x6xf32>
    %216 = arith.mulf %188, %215 : vector<12x6xf32>
    %cst_112 = arith.constant dense<0.000000e+00> : vector<6xf32>
    %217 = vector.multi_reduction <add>, %216, %cst_112 [0] : vector<12x6xf32> to vector<6xf32>
    %218 = vector.shape_cast %217 : vector<6xf32> to vector<1x6xf32>
    %219 = arith.mulf %218, %218 : vector<1x6xf32>
    %cst_113 = arith.constant dense<0.000000e+00> : vector<1xf32>
    %220 = vector.multi_reduction <add>, %219, %cst_113 [1] : vector<1x6xf32> to vector<1xf32>
    %221 = vector.shape_cast %220 : vector<1xf32> to vector<1x1xf32>
    %222 = arith.mulf %206, %4 : vector<6x6xf32>
    %cst_114 = arith.constant dense<0.000000e+00> : vector<6xf32>
    %223 = vector.multi_reduction <add>, %222, %cst_114 [1] : vector<6x6xf32> to vector<6xf32>
    %224 = vector.shape_cast %223 : vector<6xf32> to vector<6x1xf32>
    %cst_115 = arith.constant dense<0.000000e+00> : vector<1xf32>
    %225 = vector.multi_reduction <add>, %224, %cst_115 [0] : vector<6x1xf32> to vector<1xf32>
    %226 = vector.shape_cast %225 : vector<1xf32> to vector<1x1xf32>
    %227 = arith.mulf %221, %214 : vector<1x1xf32>
    %228 = arith.subf %226, %227 : vector<1x1xf32>
    %cst_116 = arith.constant 0.000000e+00 : f32
    %229 = vector.broadcast %cst_116 : f32 to vector<1x1xf32>
    %230 = arith.subf %229, %228 : vector<1x1xf32>
    %231 = arith.mulf %230, %214 : vector<1x1xf32>
    %cst_117 = arith.constant dense<0.000000e+00> : vector<6x6xf32>
    %232 = tpu.matmul %189, %189, %cst_117 {dimension_numbers = #tpu.dot_dimension_numbers<[0], [0], [1], [1], [0, 1, 1, 1], [], []>} : vector<12x6xbf16>, vector<12x6xbf16>, vector<6x6xf32> -> vector<6x6xf32>
    %233 = arith.mulf %232, %232 : vector<6x6xf32>
    %cst_118 = arith.constant dense<0.000000e+00> : vector<6xf32>
    %234 = vector.multi_reduction <add>, %233, %cst_118 [1] : vector<6x6xf32> to vector<6xf32>
    %235 = vector.shape_cast %234 : vector<6xf32> to vector<6x1xf32>
    %cst_119 = arith.constant dense<0.000000e+00> : vector<1xf32>
    %236 = vector.multi_reduction <add>, %235, %cst_119 [0] : vector<6x1xf32> to vector<1xf32>
    %237 = vector.shape_cast %236 : vector<1xf32> to vector<1x1xf32>
    %238 = math.sqrt %237 : vector<1x1xf32>
    %cst_120 = arith.constant 1.000000e-15 : f32
    %239 = vector.broadcast %cst_120 : f32 to vector<1x1xf32>
    %240 = arith.maximumf %238, %239 : vector<1x1xf32>
    %241 = vector.broadcast %240 : vector<1x1xf32> to vector<6x6xf32>
    %242 = arith.divf %232, %241 : vector<6x6xf32>
    %cst_121 = arith.constant 0.408248305 : f32
    %243 = vector.broadcast %cst_121 : f32 to vector<6x6xf32>
    %244 = arith.mulf %4, %243 : vector<6x6xf32>
    %245 = arith.subf %242, %244 : vector<6x6xf32>
    %246 = arith.mulf %245, %245 : vector<6x6xf32>
    %cst_122 = arith.constant dense<0.000000e+00> : vector<6xf32>
    %247 = vector.multi_reduction <add>, %246, %cst_122 [1] : vector<6x6xf32> to vector<6xf32>
    %248 = vector.shape_cast %247 : vector<6xf32> to vector<6x1xf32>
    %cst_123 = arith.constant dense<0.000000e+00> : vector<1xf32>
    %249 = vector.multi_reduction <add>, %248, %cst_123 [0] : vector<6x1xf32> to vector<1xf32>
    %250 = vector.shape_cast %249 : vector<1xf32> to vector<1x1xf32>
    %251 = math.sqrt %250 : vector<1x1xf32>
    %cst_124 = arith.constant dense<0.000000e+00> : vector<6xf32>
    %252 = vector.multi_reduction <add>, %188, %cst_124 [0] : vector<12x6xf32> to vector<6xf32>
    %253 = vector.shape_cast %252 : vector<6xf32> to vector<1x6xf32>
    %254 = arith.mulf %253, %253 : vector<1x6xf32>
    %cst_125 = arith.constant dense<0.000000e+00> : vector<1xf32>
    %255 = vector.multi_reduction <add>, %254, %cst_125 [1] : vector<1x6xf32> to vector<1xf32>
    %256 = vector.shape_cast %255 : vector<1xf32> to vector<1x1xf32>
    %257 = math.sqrt %256 : vector<1x1xf32>
    %cst_126 = arith.constant dense<0.000000e+00> : vector<1xf32>
    %258 = vector.multi_reduction <add>, %253, %cst_126 [1] : vector<1x6xf32> to vector<1xf32>
    %259 = vector.shape_cast %258 : vector<1xf32> to vector<1x1xf32>
    %cst_127 = arith.constant 1.000000e-15 : f32
    %260 = vector.broadcast %cst_127 : f32 to vector<1x1xf32>
    %261 = arith.maximumf %259, %260 : vector<1x1xf32>
    %262 = arith.divf %257, %261 : vector<1x1xf32>
    %cst_128 = arith.constant 2.44948983 : f32
    %263 = vector.broadcast %cst_128 : f32 to vector<1x1xf32>
    %264 = arith.mulf %262, %263 : vector<1x1xf32>
    %cst_129 = arith.constant 1.000000e+00 : f32
    %265 = vector.broadcast %cst_129 : f32 to vector<1x1xf32>
    %266 = arith.subf %264, %265 : vector<1x1xf32>
    %cst_130 = arith.constant 1.000000e+00 : f32
    %267 = vector.broadcast %cst_130 : f32 to vector<6x6xf32>
    %268 = arith.subf %267, %4 : vector<6x6xf32>
    %269 = arith.mulf %206, %268 : vector<6x6xf32>
    %cst_131 = arith.constant dense<0.000000e+00> : vector<6xf32>
    %270 = vector.multi_reduction <add>, %269, %cst_131 [1] : vector<6x6xf32> to vector<6xf32>
    %271 = vector.shape_cast %270 : vector<6xf32> to vector<6x1xf32>
    %272 = math.sqrt %271 : vector<6x1xf32>
    %cst_132 = arith.constant 1.000000e-15 : f32
    %273 = vector.broadcast %cst_132 : f32 to vector<6x1xf32>
    %274 = arith.addf %272, %273 : vector<6x1xf32>
    %cst_133 = arith.constant dense<0.000000e+00> : vector<6xf32>
    %275 = vector.multi_reduction <add>, %269, %cst_133 [0] : vector<6x6xf32> to vector<6xf32>
    %276 = vector.shape_cast %275 : vector<6xf32> to vector<1x6xf32>
    %277 = math.sqrt %276 : vector<1x6xf32>
    %cst_134 = arith.constant 1.000000e-15 : f32
    %278 = vector.broadcast %cst_134 : f32 to vector<1x6xf32>
    %279 = arith.addf %277, %278 : vector<1x6xf32>
    %280 = tpu.reciprocal %279 {approx = true} : vector<1x6xf32> -> vector<1x6xf32>
    %281 = vector.broadcast %280 : vector<1x6xf32> to vector<6x6xf32>
    %282 = arith.mulf %269, %281 : vector<6x6xf32>
    %283 = tpu.reciprocal %274 {approx = true} : vector<6x1xf32> -> vector<6x1xf32>
    %284 = vector.broadcast %283 : vector<6x1xf32> to vector<6x6xf32>
    %285 = arith.mulf %282, %284 : vector<6x6xf32>
    %286 = arith.addf %231, %251 : vector<1x1xf32>
    %287 = arith.addf %286, %266 : vector<1x1xf32>
    %288 = arith.truncf %285 : vector<6x6xf32> to vector<6x6xbf16>
    %289 = arith.truncf %203 : vector<6x32xf32> to vector<6x32xbf16>
    %cst_135 = arith.constant dense<0.000000e+00> : vector<6x32xf32>
    %290 = tpu.matmul %288, %289, %cst_135 {dimension_numbers = #tpu.dot_dimension_numbers<[1], [0], [0], [1], [0, 0, 1, 1], [], []>} : vector<6x6xbf16>, vector<6x32xbf16>, vector<6x32xf32> -> vector<6x32xf32>
    %291 = arith.truncf %290 : vector<6x32xf32> to vector<6x32xbf16>
    %cst_136 = arith.constant dense<0.000000e+00> : vector<6x32xf32>
    %292 = tpu.matmul %291, %23, %cst_136 {dimension_numbers = #tpu.dot_dimension_numbers<[1], [0], [0], [1], [0, 0, 1, 1], [], []>} : vector<6x32xbf16>, vector<32x32xbf16>, vector<6x32xf32> -> vector<6x32xf32>
    %cst_137 = arith.constant dense<0.000000e+00> : vector<6x32xf32>
    %293 = tpu.matmul %289, %26, %cst_137 {dimension_numbers = #tpu.dot_dimension_numbers<[1], [0], [0], [1], [0, 0, 1, 1], [], []>} : vector<6x32xbf16>, vector<32x32xbf16>, vector<6x32xf32> -> vector<6x32xf32>
    %294 = arith.addf %292, %293 : vector<6x32xf32>
    %295 = vector.broadcast %24 : vector<1x32xf32> to vector<6x32xf32>
    %296 = arith.addf %294, %295 : vector<6x32xf32>
    %cst_138 = arith.constant dense<0.000000e+00> : vector<32xf32>
    %297 = vector.multi_reduction <add>, %296, %cst_138 [0] : vector<6x32xf32> to vector<32xf32>
    %298 = vector.shape_cast %297 : vector<32xf32> to vector<1x32xf32>
    %cst_139 = arith.constant 6.000000e+00 : f32
    %299 = vector.broadcast %cst_139 : f32 to vector<1x32xf32>
    %300 = arith.divf %298, %299 : vector<1x32xf32>
    %301 = arith.truncf %300 : vector<1x32xf32> to vector<1x32xbf16>
    %cst_140 = arith.constant dense<0.000000e+00> : vector<1x32xf32>
    %302 = tpu.matmul %301, %28, %cst_140 {dimension_numbers = #tpu.dot_dimension_numbers<[1], [0], [0], [1], [0, 0, 1, 1], [], []>} : vector<1x32xbf16>, vector<32x32xbf16>, vector<1x32xf32> -> vector<1x32xf32>
    %303 = arith.addf %302, %29 : vector<1x32xf32>
    %cst_141 = arith.constant 0.000000e+00 : f32
    %304 = vector.broadcast %cst_141 : f32 to vector<1x32xf32>
    %305 = arith.maximumf %303, %304 : vector<1x32xf32>
    %306 = arith.truncf %305 : vector<1x32xf32> to vector<1x32xbf16>
    %cst_142 = arith.constant dense<0.000000e+00> : vector<1x6xf32>
    %307 = tpu.matmul %306, %31, %cst_142 {dimension_numbers = #tpu.dot_dimension_numbers<[1], [0], [0], [1], [0, 0, 1, 1], [], []>} : vector<1x32xbf16>, vector<32x6xbf16>, vector<1x6xf32> -> vector<1x6xf32>
    %308 = arith.addf %307, %32 : vector<1x6xf32>
    %cst_143 = arith.constant dense<0xFF800000> : vector<1xf32>
    %309 = vector.multi_reduction <maximumf>, %308, %cst_143 [1] : vector<1x6xf32> to vector<1xf32>
    %310 = vector.shape_cast %309 : vector<1xf32> to vector<1x1xf32>
    %311 = vector.broadcast %310 : vector<1x1xf32> to vector<1x6xf32>
    %312 = arith.subf %308, %311 : vector<1x6xf32>
    %313 = math.exp %312 : vector<1x6xf32>
    %cst_144 = arith.constant dense<0.000000e+00> : vector<1xf32>
    %314 = vector.multi_reduction <add>, %313, %cst_144 [1] : vector<1x6xf32> to vector<1xf32>
    %315 = vector.shape_cast %314 : vector<1xf32> to vector<1x1xf32>
    %316 = math.log %315 : vector<1x1xf32>
    %317 = vector.broadcast %316 : vector<1x1xf32> to vector<1x6xf32>
    %318 = arith.subf %312, %317 : vector<1x6xf32>
    %c0_145 = arith.constant 0 : index
    %c0_146 = arith.constant 0 : index
    %319 = vector.load %arg24[%c0_145, %c0_146] : memref<2x6xf32, #tpu.memory_space<vmem>>, vector<1x6xf32>
    tpu.vector_store %arg24[%c0_145, %c0_146], %318 {strides = array<i32>} : memref<2x6xf32, #tpu.memory_space<vmem>>, vector<1x6xf32>,
    %320 = arith.addf %55, %160 : vector<1x1xf32>
    %321 = arith.addf %320, %287 : vector<1x1xf32>
    %322 = vector.extract_strided_slice %0 {offsets = [1, 0, 0], sizes = [1, 12, 32], strides = [1, 1, 1]} : vector<2x12x32xf32> to vector<1x12x32xf32>
    %323 = vector.shape_cast %322 : vector<1x12x32xf32> to vector<12x32xf32>
    %324 = vector.extract_strided_slice %1 {offsets = [1, 0, 0], sizes = [1, 12, 12], strides = [1, 1, 1]} : vector<2x12x12xbf16> to vector<1x12x12xbf16>
    %325 = vector.shape_cast %324 : vector<1x12x12xbf16> to vector<12x12xbf16>
    %326 = vector.extract_strided_slice %53 {offsets = [1, 0, 0], sizes = [1, 12, 12], strides = [1, 1, 1]} : vector<2x12x12xf32> to vector<1x12x12xf32>
    %327 = vector.shape_cast %326 : vector<1x12x12xf32> to vector<12x12xf32>
    %328 = arith.truncf %327 : vector<12x12xf32> to vector<12x12xbf16>
    %329 = arith.truncf %323 : vector<12x32xf32> to vector<12x32xbf16>
    %cst_147 = arith.constant dense<0.000000e+00> : vector<12x32xf32>
    %330 = tpu.matmul %328, %329, %cst_147 {dimension_numbers = #tpu.dot_dimension_numbers<[0], [0], [1], [1], [0, 1, 1, 1], [], []>} : vector<12x12xbf16>, vector<12x32xbf16>, vector<12x32xf32> -> vector<12x32xf32>
    %cst_148 = arith.constant 0.000000e+00 : f32
    %331 = vector.broadcast %cst_148 : f32 to vector<12x32xf32>
    %332 = arith.cmpf ogt, %330, %331 : vector<12x32xf32>
    %cst_149 = arith.constant 0.000000e+00 : f32
    %333 = vector.broadcast %cst_149 : f32 to vector<12x32xf32>
    %334 = arith.minimumf %330, %333 : vector<12x32xf32>
    %335 = math.exp %334 : vector<12x32xf32>
    %cst_150 = arith.constant 1.000000e+00 : f32
    %336 = vector.broadcast %cst_150 : f32 to vector<12x32xf32>
    %337 = arith.subf %335, %336 : vector<12x32xf32>
    %cst_151 = arith.constant 1.67326319 : f32
    %338 = vector.broadcast %cst_151 : f32 to vector<12x32xf32>
    %339 = arith.mulf %338, %337 : vector<12x32xf32>
    %340 = arith.select %332, %330, %339 : vector<12x32xi1>, vector<12x32xf32>
    %cst_152 = arith.constant 1.05070102 : f32
    %341 = vector.broadcast %cst_152 : f32 to vector<12x32xf32>
    %342 = arith.mulf %341, %340 : vector<12x32xf32>
    %cst_153 = arith.constant dense<0.000000e+00> : vector<12x12xf32>
    %343 = tpu.matmul %325, %328, %cst_153 {dimension_numbers = #tpu.dot_dimension_numbers<[1], [0], [0], [1], [0, 0, 1, 1], [], []>} : vector<12x12xbf16>, vector<12x12xbf16>, vector<12x12xf32> -> vector<12x12xf32>
    %344 = arith.truncf %343 : vector<12x12xf32> to vector<12x12xbf16>
    %cst_154 = arith.constant dense<0.000000e+00> : vector<12x12xf32>
    %345 = tpu.matmul %328, %344, %cst_154 {dimension_numbers = #tpu.dot_dimension_numbers<[0], [0], [1], [1], [0, 1, 1, 1], [], []>} : vector<12x12xbf16>, vector<12x12xbf16>, vector<12x12xf32> -> vector<12x12xf32>
    %cst_155 = arith.constant 1.000000e+00 : bf16
    %346 = vector.broadcast %cst_155 : bf16 to vector<12x1xbf16>
    %cst_156 = arith.constant dense<0.000000e+00> : vector<12x1xf32>
    %347 = tpu.matmul %325, %346, %cst_156 {dimension_numbers = #tpu.dot_dimension_numbers<[1], [0], [0], [1], [0, 0, 1, 1], [], []>} : vector<12x12xbf16>, vector<12x1xbf16>, vector<12x1xf32> -> vector<12x1xf32>
    %cst_157 = arith.constant dense<0.000000e+00> : vector<1xf32>
    %348 = vector.multi_reduction <add>, %347, %cst_157 [0] : vector<12x1xf32> to vector<1xf32>
    %349 = vector.shape_cast %348 : vector<1xf32> to vector<1x1xf32>
    %cst_158 = arith.constant 1.000000e-15 : f32
    %350 = vector.broadcast %cst_158 : f32 to vector<1x1xf32>
    %351 = arith.maximumf %349, %350 : vector<1x1xf32>
    %cst_159 = arith.constant 1.000000e+00 : f32
    %352 = vector.broadcast %cst_159 : f32 to vector<1x1xf32>
    %353 = arith.divf %352, %351 : vector<1x1xf32>
    %354 = vector.broadcast %347 : vector<12x1xf32> to vector<12x12xf32>
    %355 = arith.mulf %327, %354 : vector<12x12xf32>
    %cst_160 = arith.constant dense<0.000000e+00> : vector<12xf32>
    %356 = vector.multi_reduction <add>, %355, %cst_160 [0] : vector<12x12xf32> to vector<12xf32>
    %357 = vector.shape_cast %356 : vector<12xf32> to vector<1x12xf32>
    %358 = arith.mulf %357, %357 : vector<1x12xf32>
    %cst_161 = arith.constant dense<0.000000e+00> : vector<1xf32>
    %359 = vector.multi_reduction <add>, %358, %cst_161 [1] : vector<1x12xf32> to vector<1xf32>
    %360 = vector.shape_cast %359 : vector<1xf32> to vector<1x1xf32>
    %361 = arith.mulf %345, %3 : vector<12x12xf32>
    %cst_162 = arith.constant dense<0.000000e+00> : vector<12xf32>
    %362 = vector.multi_reduction <add>, %361, %cst_162 [1] : vector<12x12xf32> to vector<12xf32>
    %363 = vector.shape_cast %362 : vector<12xf32> to vector<12x1xf32>
    %cst_163 = arith.constant dense<0.000000e+00> : vector<1xf32>
    %364 = vector.multi_reduction <add>, %363, %cst_163 [0] : vector<12x1xf32> to vector<1xf32>
    %365 = vector.shape_cast %364 : vector<1xf32> to vector<1x1xf32>
    %366 = arith.mulf %360, %353 : vector<1x1xf32>
    %367 = arith.subf %365, %366 : vector<1x1xf32>
    %cst_164 = arith.constant 0.000000e+00 : f32
    %368 = vector.broadcast %cst_164 : f32 to vector<1x1xf32>
    %369 = arith.subf %368, %367 : vector<1x1xf32>
    %370 = arith.mulf %369, %353 : vector<1x1xf32>
    %cst_165 = arith.constant dense<0.000000e+00> : vector<12x12xf32>
    %371 = tpu.matmul %328, %328, %cst_165 {dimension_numbers = #tpu.dot_dimension_numbers<[0], [0], [1], [1], [0, 1, 1, 1], [], []>} : vector<12x12xbf16>, vector<12x12xbf16>, vector<12x12xf32> -> vector<12x12xf32>
    %372 = arith.mulf %371, %371 : vector<12x12xf32>
    %cst_166 = arith.constant dense<0.000000e+00> : vector<12xf32>
    %373 = vector.multi_reduction <add>, %372, %cst_166 [1] : vector<12x12xf32> to vector<12xf32>
    %374 = vector.shape_cast %373 : vector<12xf32> to vector<12x1xf32>
    %cst_167 = arith.constant dense<0.000000e+00> : vector<1xf32>
    %375 = vector.multi_reduction <add>, %374, %cst_167 [0] : vector<12x1xf32> to vector<1xf32>
    %376 = vector.shape_cast %375 : vector<1xf32> to vector<1x1xf32>
    %377 = math.sqrt %376 : vector<1x1xf32>
    %cst_168 = arith.constant 1.000000e-15 : f32
    %378 = vector.broadcast %cst_168 : f32 to vector<1x1xf32>
    %379 = arith.maximumf %377, %378 : vector<1x1xf32>
    %380 = vector.broadcast %379 : vector<1x1xf32> to vector<12x12xf32>
    %381 = arith.divf %371, %380 : vector<12x12xf32>
    %cst_169 = arith.constant 0.288675129 : f32
    %382 = vector.broadcast %cst_169 : f32 to vector<12x12xf32>
    %383 = arith.mulf %3, %382 : vector<12x12xf32>
    %384 = arith.subf %381, %383 : vector<12x12xf32>
    %385 = arith.mulf %384, %384 : vector<12x12xf32>
    %cst_170 = arith.constant dense<0.000000e+00> : vector<12xf32>
    %386 = vector.multi_reduction <add>, %385, %cst_170 [1] : vector<12x12xf32> to vector<12xf32>
    %387 = vector.shape_cast %386 : vector<12xf32> to vector<12x1xf32>
    %cst_171 = arith.constant dense<0.000000e+00> : vector<1xf32>
    %388 = vector.multi_reduction <add>, %387, %cst_171 [0] : vector<12x1xf32> to vector<1xf32>
    %389 = vector.shape_cast %388 : vector<1xf32> to vector<1x1xf32>
    %390 = math.sqrt %389 : vector<1x1xf32>
    %cst_172 = arith.constant dense<0.000000e+00> : vector<12xf32>
    %391 = vector.multi_reduction <add>, %327, %cst_172 [0] : vector<12x12xf32> to vector<12xf32>
    %392 = vector.shape_cast %391 : vector<12xf32> to vector<1x12xf32>
    %393 = arith.mulf %392, %392 : vector<1x12xf32>
    %cst_173 = arith.constant dense<0.000000e+00> : vector<1xf32>
    %394 = vector.multi_reduction <add>, %393, %cst_173 [1] : vector<1x12xf32> to vector<1xf32>
    %395 = vector.shape_cast %394 : vector<1xf32> to vector<1x1xf32>
    %396 = math.sqrt %395 : vector<1x1xf32>
    %cst_174 = arith.constant dense<0.000000e+00> : vector<1xf32>
    %397 = vector.multi_reduction <add>, %392, %cst_174 [1] : vector<1x12xf32> to vector<1xf32>
    %398 = vector.shape_cast %397 : vector<1xf32> to vector<1x1xf32>
    %cst_175 = arith.constant 1.000000e-15 : f32
    %399 = vector.broadcast %cst_175 : f32 to vector<1x1xf32>
    %400 = arith.maximumf %398, %399 : vector<1x1xf32>
    %401 = arith.divf %396, %400 : vector<1x1xf32>
    %cst_176 = arith.constant 3.46410155 : f32
    %402 = vector.broadcast %cst_176 : f32 to vector<1x1xf32>
    %403 = arith.mulf %401, %402 : vector<1x1xf32>
    %cst_177 = arith.constant 1.000000e+00 : f32
    %404 = vector.broadcast %cst_177 : f32 to vector<1x1xf32>
    %405 = arith.subf %403, %404 : vector<1x1xf32>
    %cst_178 = arith.constant 1.000000e+00 : f32
    %406 = vector.broadcast %cst_178 : f32 to vector<12x12xf32>
    %407 = arith.subf %406, %3 : vector<12x12xf32>
    %408 = arith.mulf %345, %407 : vector<12x12xf32>
    %cst_179 = arith.constant dense<0.000000e+00> : vector<12xf32>
    %409 = vector.multi_reduction <add>, %408, %cst_179 [1] : vector<12x12xf32> to vector<12xf32>
    %410 = vector.shape_cast %409 : vector<12xf32> to vector<12x1xf32>
    %411 = math.sqrt %410 : vector<12x1xf32>
    %cst_180 = arith.constant 1.000000e-15 : f32
    %412 = vector.broadcast %cst_180 : f32 to vector<12x1xf32>
    %413 = arith.addf %411, %412 : vector<12x1xf32>
    %cst_181 = arith.constant dense<0.000000e+00> : vector<12xf32>
    %414 = vector.multi_reduction <add>, %408, %cst_181 [0] : vector<12x12xf32> to vector<12xf32>
    %415 = vector.shape_cast %414 : vector<12xf32> to vector<1x12xf32>
    %416 = math.sqrt %415 : vector<1x12xf32>
    %cst_182 = arith.constant 1.000000e-15 : f32
    %417 = vector.broadcast %cst_182 : f32 to vector<1x12xf32>
    %418 = arith.addf %416, %417 : vector<1x12xf32>
    %419 = tpu.reciprocal %418 {approx = true} : vector<1x12xf32> -> vector<1x12xf32>
    %420 = vector.broadcast %419 : vector<1x12xf32> to vector<12x12xf32>
    %421 = arith.mulf %408, %420 : vector<12x12xf32>
    %422 = tpu.reciprocal %413 {approx = true} : vector<12x1xf32> -> vector<12x1xf32>
    %423 = vector.broadcast %422 : vector<12x1xf32> to vector<12x12xf32>
    %424 = arith.mulf %421, %423 : vector<12x12xf32>
    %425 = arith.addf %370, %390 : vector<1x1xf32>
    %426 = arith.addf %425, %405 : vector<1x1xf32>
    %427 = arith.truncf %424 : vector<12x12xf32> to vector<12x12xbf16>
    %428 = arith.truncf %342 : vector<12x32xf32> to vector<12x32xbf16>
    %cst_183 = arith.constant dense<0.000000e+00> : vector<12x32xf32>
    %429 = tpu.matmul %427, %428, %cst_183 {dimension_numbers = #tpu.dot_dimension_numbers<[1], [0], [0], [1], [0, 0, 1, 1], [], []>} : vector<12x12xbf16>, vector<12x32xbf16>, vector<12x32xf32> -> vector<12x32xf32>
    %430 = arith.truncf %429 : vector<12x32xf32> to vector<12x32xbf16>
    %cst_184 = arith.constant dense<0.000000e+00> : vector<12x32xf32>
    %431 = tpu.matmul %430, %12, %cst_184 {dimension_numbers = #tpu.dot_dimension_numbers<[1], [0], [0], [1], [0, 0, 1, 1], [], []>} : vector<12x32xbf16>, vector<32x32xbf16>, vector<12x32xf32> -> vector<12x32xf32>
    %cst_185 = arith.constant dense<0.000000e+00> : vector<12x32xf32>
    %432 = tpu.matmul %428, %15, %cst_185 {dimension_numbers = #tpu.dot_dimension_numbers<[1], [0], [0], [1], [0, 0, 1, 1], [], []>} : vector<12x32xbf16>, vector<32x32xbf16>, vector<12x32xf32> -> vector<12x32xf32>
    %433 = arith.addf %431, %432 : vector<12x32xf32>
    %434 = vector.broadcast %13 : vector<1x32xf32> to vector<12x32xf32>
    %435 = arith.addf %433, %434 : vector<12x32xf32>
    %cst_186 = arith.constant 0.000000e+00 : f32
    %436 = vector.broadcast %cst_186 : f32 to vector<12x32xf32>
    %437 = arith.maximumf %435, %436 : vector<12x32xf32>
    %438 = arith.truncf %437 : vector<12x32xf32> to vector<12x32xbf16>
    %cst_187 = arith.constant dense<0.000000e+00> : vector<12x32xf32>
    %439 = tpu.matmul %438, %17, %cst_187 {dimension_numbers = #tpu.dot_dimension_numbers<[1], [0], [0], [1], [0, 0, 1, 1], [], []>} : vector<12x32xbf16>, vector<32x32xbf16>, vector<12x32xf32> -> vector<12x32xf32>
    %440 = vector.broadcast %18 : vector<1x32xf32> to vector<12x32xf32>
    %441 = arith.addf %439, %440 : vector<12x32xf32>
    %442 = arith.truncf %441 : vector<12x32xf32> to vector<12x32xbf16>
    %cst_188 = arith.constant dense<0.000000e+00> : vector<12x6xf32>
    %443 = tpu.matmul %442, %20, %cst_188 {dimension_numbers = #tpu.dot_dimension_numbers<[1], [0], [0], [1], [0, 0, 1, 1], [], []>} : vector<12x32xbf16>, vector<32x6xbf16>, vector<12x6xf32> -> vector<12x6xf32>
    %444 = vector.broadcast %21 : vector<1x6xf32> to vector<12x6xf32>
    %445 = arith.addf %443, %444 : vector<12x6xf32>
    %cst_189 = arith.constant dense<0xFF800000> : vector<12xf32>
    %446 = vector.multi_reduction <maximumf>, %445, %cst_189 [1] : vector<12x6xf32> to vector<12xf32>
    %447 = vector.shape_cast %446 : vector<12xf32> to vector<12x1xf32>
    %448 = vector.broadcast %447 : vector<12x1xf32> to vector<12x6xf32>
    %449 = arith.subf %445, %448 : vector<12x6xf32>
    %450 = math.exp %449 : vector<12x6xf32>
    %cst_190 = arith.constant dense<0.000000e+00> : vector<12xf32>
    %451 = vector.multi_reduction <add>, %450, %cst_190 [1] : vector<12x6xf32> to vector<12xf32>
    %452 = vector.shape_cast %451 : vector<12xf32> to vector<12x1xf32>
    %453 = vector.broadcast %452 : vector<12x1xf32> to vector<12x6xf32>
    %454 = arith.divf %450, %453 : vector<12x6xf32>
    %455 = arith.truncf %454 : vector<12x6xf32> to vector<12x6xbf16>
    %456 = arith.truncf %437 : vector<12x32xf32> to vector<12x32xbf16>
    %cst_191 = arith.constant dense<0.000000e+00> : vector<6x32xf32>
    %457 = tpu.matmul %455, %456, %cst_191 {dimension_numbers = #tpu.dot_dimension_numbers<[0], [0], [1], [1], [0, 1, 1, 1], [], []>} : vector<12x6xbf16>, vector<12x32xbf16>, vector<6x32xf32> -> vector<6x32xf32>
    %cst_192 = arith.constant 0.000000e+00 : f32
    %458 = vector.broadcast %cst_192 : f32 to vector<6x32xf32>
    %459 = arith.cmpf ogt, %457, %458 : vector<6x32xf32>
    %cst_193 = arith.constant 0.000000e+00 : f32
    %460 = vector.broadcast %cst_193 : f32 to vector<6x32xf32>
    %461 = arith.minimumf %457, %460 : vector<6x32xf32>
    %462 = math.exp %461 : vector<6x32xf32>
    %cst_194 = arith.constant 1.000000e+00 : f32
    %463 = vector.broadcast %cst_194 : f32 to vector<6x32xf32>
    %464 = arith.subf %462, %463 : vector<6x32xf32>
    %cst_195 = arith.constant 1.67326319 : f32
    %465 = vector.broadcast %cst_195 : f32 to vector<6x32xf32>
    %466 = arith.mulf %465, %464 : vector<6x32xf32>
    %467 = arith.select %459, %457, %466 : vector<6x32xi1>, vector<6x32xf32>
    %cst_196 = arith.constant 1.05070102 : f32
    %468 = vector.broadcast %cst_196 : f32 to vector<6x32xf32>
    %469 = arith.mulf %468, %467 : vector<6x32xf32>
    %cst_197 = arith.constant dense<0.000000e+00> : vector<12x6xf32>
    %470 = tpu.matmul %427, %455, %cst_197 {dimension_numbers = #tpu.dot_dimension_numbers<[1], [0], [0], [1], [0, 0, 1, 1], [], []>} : vector<12x12xbf16>, vector<12x6xbf16>, vector<12x6xf32> -> vector<12x6xf32>
    %471 = arith.truncf %470 : vector<12x6xf32> to vector<12x6xbf16>
    %cst_198 = arith.constant dense<0.000000e+00> : vector<6x6xf32>
    %472 = tpu.matmul %455, %471, %cst_198 {dimension_numbers = #tpu.dot_dimension_numbers<[0], [0], [1], [1], [0, 1, 1, 1], [], []>} : vector<12x6xbf16>, vector<12x6xbf16>, vector<6x6xf32> -> vector<6x6xf32>
    %cst_199 = arith.constant 1.000000e+00 : bf16
    %473 = vector.broadcast %cst_199 : bf16 to vector<12x1xbf16>
    %cst_200 = arith.constant dense<0.000000e+00> : vector<12x1xf32>
    %474 = tpu.matmul %427, %473, %cst_200 {dimension_numbers = #tpu.dot_dimension_numbers<[1], [0], [0], [1], [0, 0, 1, 1], [], []>} : vector<12x12xbf16>, vector<12x1xbf16>, vector<12x1xf32> -> vector<12x1xf32>
    %cst_201 = arith.constant dense<0.000000e+00> : vector<1xf32>
    %475 = vector.multi_reduction <add>, %474, %cst_201 [0] : vector<12x1xf32> to vector<1xf32>
    %476 = vector.shape_cast %475 : vector<1xf32> to vector<1x1xf32>
    %cst_202 = arith.constant 1.000000e-15 : f32
    %477 = vector.broadcast %cst_202 : f32 to vector<1x1xf32>
    %478 = arith.maximumf %476, %477 : vector<1x1xf32>
    %cst_203 = arith.constant 1.000000e+00 : f32
    %479 = vector.broadcast %cst_203 : f32 to vector<1x1xf32>
    %480 = arith.divf %479, %478 : vector<1x1xf32>
    %481 = vector.broadcast %474 : vector<12x1xf32> to vector<12x6xf32>
    %482 = arith.mulf %454, %481 : vector<12x6xf32>
    %cst_204 = arith.constant dense<0.000000e+00> : vector<6xf32>
    %483 = vector.multi_reduction <add>, %482, %cst_204 [0] : vector<12x6xf32> to vector<6xf32>
    %484 = vector.shape_cast %483 : vector<6xf32> to vector<1x6xf32>
    %485 = arith.mulf %484, %484 : vector<1x6xf32>
    %cst_205 = arith.constant dense<0.000000e+00> : vector<1xf32>
    %486 = vector.multi_reduction <add>, %485, %cst_205 [1] : vector<1x6xf32> to vector<1xf32>
    %487 = vector.shape_cast %486 : vector<1xf32> to vector<1x1xf32>
    %488 = arith.mulf %472, %4 : vector<6x6xf32>
    %cst_206 = arith.constant dense<0.000000e+00> : vector<6xf32>
    %489 = vector.multi_reduction <add>, %488, %cst_206 [1] : vector<6x6xf32> to vector<6xf32>
    %490 = vector.shape_cast %489 : vector<6xf32> to vector<6x1xf32>
    %cst_207 = arith.constant dense<0.000000e+00> : vector<1xf32>
    %491 = vector.multi_reduction <add>, %490, %cst_207 [0] : vector<6x1xf32> to vector<1xf32>
    %492 = vector.shape_cast %491 : vector<1xf32> to vector<1x1xf32>
    %493 = arith.mulf %487, %480 : vector<1x1xf32>
    %494 = arith.subf %492, %493 : vector<1x1xf32>
    %cst_208 = arith.constant 0.000000e+00 : f32
    %495 = vector.broadcast %cst_208 : f32 to vector<1x1xf32>
    %496 = arith.subf %495, %494 : vector<1x1xf32>
    %497 = arith.mulf %496, %480 : vector<1x1xf32>
    %cst_209 = arith.constant dense<0.000000e+00> : vector<6x6xf32>
    %498 = tpu.matmul %455, %455, %cst_209 {dimension_numbers = #tpu.dot_dimension_numbers<[0], [0], [1], [1], [0, 1, 1, 1], [], []>} : vector<12x6xbf16>, vector<12x6xbf16>, vector<6x6xf32> -> vector<6x6xf32>
    %499 = arith.mulf %498, %498 : vector<6x6xf32>
    %cst_210 = arith.constant dense<0.000000e+00> : vector<6xf32>
    %500 = vector.multi_reduction <add>, %499, %cst_210 [1] : vector<6x6xf32> to vector<6xf32>
    %501 = vector.shape_cast %500 : vector<6xf32> to vector<6x1xf32>
    %cst_211 = arith.constant dense<0.000000e+00> : vector<1xf32>
    %502 = vector.multi_reduction <add>, %501, %cst_211 [0] : vector<6x1xf32> to vector<1xf32>
    %503 = vector.shape_cast %502 : vector<1xf32> to vector<1x1xf32>
    %504 = math.sqrt %503 : vector<1x1xf32>
    %cst_212 = arith.constant 1.000000e-15 : f32
    %505 = vector.broadcast %cst_212 : f32 to vector<1x1xf32>
    %506 = arith.maximumf %504, %505 : vector<1x1xf32>
    %507 = vector.broadcast %506 : vector<1x1xf32> to vector<6x6xf32>
    %508 = arith.divf %498, %507 : vector<6x6xf32>
    %cst_213 = arith.constant 0.408248305 : f32
    %509 = vector.broadcast %cst_213 : f32 to vector<6x6xf32>
    %510 = arith.mulf %4, %509 : vector<6x6xf32>
    %511 = arith.subf %508, %510 : vector<6x6xf32>
    %512 = arith.mulf %511, %511 : vector<6x6xf32>
    %cst_214 = arith.constant dense<0.000000e+00> : vector<6xf32>
    %513 = vector.multi_reduction <add>, %512, %cst_214 [1] : vector<6x6xf32> to vector<6xf32>
    %514 = vector.shape_cast %513 : vector<6xf32> to vector<6x1xf32>
    %cst_215 = arith.constant dense<0.000000e+00> : vector<1xf32>
    %515 = vector.multi_reduction <add>, %514, %cst_215 [0] : vector<6x1xf32> to vector<1xf32>
    %516 = vector.shape_cast %515 : vector<1xf32> to vector<1x1xf32>
    %517 = math.sqrt %516 : vector<1x1xf32>
    %cst_216 = arith.constant dense<0.000000e+00> : vector<6xf32>
    %518 = vector.multi_reduction <add>, %454, %cst_216 [0] : vector<12x6xf32> to vector<6xf32>
    %519 = vector.shape_cast %518 : vector<6xf32> to vector<1x6xf32>
    %520 = arith.mulf %519, %519 : vector<1x6xf32>
    %cst_217 = arith.constant dense<0.000000e+00> : vector<1xf32>
    %521 = vector.multi_reduction <add>, %520, %cst_217 [1] : vector<1x6xf32> to vector<1xf32>
    %522 = vector.shape_cast %521 : vector<1xf32> to vector<1x1xf32>
    %523 = math.sqrt %522 : vector<1x1xf32>
    %cst_218 = arith.constant dense<0.000000e+00> : vector<1xf32>
    %524 = vector.multi_reduction <add>, %519, %cst_218 [1] : vector<1x6xf32> to vector<1xf32>
    %525 = vector.shape_cast %524 : vector<1xf32> to vector<1x1xf32>
    %cst_219 = arith.constant 1.000000e-15 : f32
    %526 = vector.broadcast %cst_219 : f32 to vector<1x1xf32>
    %527 = arith.maximumf %525, %526 : vector<1x1xf32>
    %528 = arith.divf %523, %527 : vector<1x1xf32>
    %cst_220 = arith.constant 2.44948983 : f32
    %529 = vector.broadcast %cst_220 : f32 to vector<1x1xf32>
    %530 = arith.mulf %528, %529 : vector<1x1xf32>
    %cst_221 = arith.constant 1.000000e+00 : f32
    %531 = vector.broadcast %cst_221 : f32 to vector<1x1xf32>
    %532 = arith.subf %530, %531 : vector<1x1xf32>
    %cst_222 = arith.constant 1.000000e+00 : f32
    %533 = vector.broadcast %cst_222 : f32 to vector<6x6xf32>
    %534 = arith.subf %533, %4 : vector<6x6xf32>
    %535 = arith.mulf %472, %534 : vector<6x6xf32>
    %cst_223 = arith.constant dense<0.000000e+00> : vector<6xf32>
    %536 = vector.multi_reduction <add>, %535, %cst_223 [1] : vector<6x6xf32> to vector<6xf32>
    %537 = vector.shape_cast %536 : vector<6xf32> to vector<6x1xf32>
    %538 = math.sqrt %537 : vector<6x1xf32>
    %cst_224 = arith.constant 1.000000e-15 : f32
    %539 = vector.broadcast %cst_224 : f32 to vector<6x1xf32>
    %540 = arith.addf %538, %539 : vector<6x1xf32>
    %cst_225 = arith.constant dense<0.000000e+00> : vector<6xf32>
    %541 = vector.multi_reduction <add>, %535, %cst_225 [0] : vector<6x6xf32> to vector<6xf32>
    %542 = vector.shape_cast %541 : vector<6xf32> to vector<1x6xf32>
    %543 = math.sqrt %542 : vector<1x6xf32>
    %cst_226 = arith.constant 1.000000e-15 : f32
    %544 = vector.broadcast %cst_226 : f32 to vector<1x6xf32>
    %545 = arith.addf %543, %544 : vector<1x6xf32>
    %546 = tpu.reciprocal %545 {approx = true} : vector<1x6xf32> -> vector<1x6xf32>
    %547 = vector.broadcast %546 : vector<1x6xf32> to vector<6x6xf32>
    %548 = arith.mulf %535, %547 : vector<6x6xf32>
    %549 = tpu.reciprocal %540 {approx = true} : vector<6x1xf32> -> vector<6x1xf32>
    %550 = vector.broadcast %549 : vector<6x1xf32> to vector<6x6xf32>
    %551 = arith.mulf %548, %550 : vector<6x6xf32>
    %552 = arith.addf %497, %517 : vector<1x1xf32>
    %553 = arith.addf %552, %532 : vector<1x1xf32>
    %554 = arith.truncf %551 : vector<6x6xf32> to vector<6x6xbf16>
    %555 = arith.truncf %469 : vector<6x32xf32> to vector<6x32xbf16>
    %cst_227 = arith.constant dense<0.000000e+00> : vector<6x32xf32>
    %556 = tpu.matmul %554, %555, %cst_227 {dimension_numbers = #tpu.dot_dimension_numbers<[1], [0], [0], [1], [0, 0, 1, 1], [], []>} : vector<6x6xbf16>, vector<6x32xbf16>, vector<6x32xf32> -> vector<6x32xf32>
    %557 = arith.truncf %556 : vector<6x32xf32> to vector<6x32xbf16>
    %cst_228 = arith.constant dense<0.000000e+00> : vector<6x32xf32>
    %558 = tpu.matmul %557, %23, %cst_228 {dimension_numbers = #tpu.dot_dimension_numbers<[1], [0], [0], [1], [0, 0, 1, 1], [], []>} : vector<6x32xbf16>, vector<32x32xbf16>, vector<6x32xf32> -> vector<6x32xf32>
    %cst_229 = arith.constant dense<0.000000e+00> : vector<6x32xf32>
    %559 = tpu.matmul %555, %26, %cst_229 {dimension_numbers = #tpu.dot_dimension_numbers<[1], [0], [0], [1], [0, 0, 1, 1], [], []>} : vector<6x32xbf16>, vector<32x32xbf16>, vector<6x32xf32> -> vector<6x32xf32>
    %560 = arith.addf %558, %559 : vector<6x32xf32>
    %561 = vector.broadcast %24 : vector<1x32xf32> to vector<6x32xf32>
    %562 = arith.addf %560, %561 : vector<6x32xf32>
    %cst_230 = arith.constant dense<0.000000e+00> : vector<32xf32>
    %563 = vector.multi_reduction <add>, %562, %cst_230 [0] : vector<6x32xf32> to vector<32xf32>
    %564 = vector.shape_cast %563 : vector<32xf32> to vector<1x32xf32>
    %cst_231 = arith.constant 6.000000e+00 : f32
    %565 = vector.broadcast %cst_231 : f32 to vector<1x32xf32>
    %566 = arith.divf %564, %565 : vector<1x32xf32>
    %567 = arith.truncf %566 : vector<1x32xf32> to vector<1x32xbf16>
    %cst_232 = arith.constant dense<0.000000e+00> : vector<1x32xf32>
    %568 = tpu.matmul %567, %28, %cst_232 {dimension_numbers = #tpu.dot_dimension_numbers<[1], [0], [0], [1], [0, 0, 1, 1], [], []>} : vector<1x32xbf16>, vector<32x32xbf16>, vector<1x32xf32> -> vector<1x32xf32>
    %569 = arith.addf %568, %29 : vector<1x32xf32>
    %cst_233 = arith.constant 0.000000e+00 : f32
    %570 = vector.broadcast %cst_233 : f32 to vector<1x32xf32>
    %571 = arith.maximumf %569, %570 : vector<1x32xf32>
    %572 = arith.truncf %571 : vector<1x32xf32> to vector<1x32xbf16>
    %cst_234 = arith.constant dense<0.000000e+00> : vector<1x6xf32>
    %573 = tpu.matmul %572, %31, %cst_234 {dimension_numbers = #tpu.dot_dimension_numbers<[1], [0], [0], [1], [0, 0, 1, 1], [], []>} : vector<1x32xbf16>, vector<32x6xbf16>, vector<1x6xf32> -> vector<1x6xf32>
    %574 = arith.addf %573, %32 : vector<1x6xf32>
    %cst_235 = arith.constant dense<0xFF800000> : vector<1xf32>
    %575 = vector.multi_reduction <maximumf>, %574, %cst_235 [1] : vector<1x6xf32> to vector<1xf32>
    %576 = vector.shape_cast %575 : vector<1xf32> to vector<1x1xf32>
    %577 = vector.broadcast %576 : vector<1x1xf32> to vector<1x6xf32>
    %578 = arith.subf %574, %577 : vector<1x6xf32>
    %579 = math.exp %578 : vector<1x6xf32>
    %cst_236 = arith.constant dense<0.000000e+00> : vector<1xf32>
    %580 = vector.multi_reduction <add>, %579, %cst_236 [1] : vector<1x6xf32> to vector<1xf32>
    %581 = vector.shape_cast %580 : vector<1xf32> to vector<1x1xf32>
    %582 = math.log %581 : vector<1x1xf32>
    %583 = vector.broadcast %582 : vector<1x1xf32> to vector<1x6xf32>
    %584 = arith.subf %578, %583 : vector<1x6xf32>
    %c1 = arith.constant 1 : index
    %c0_237 = arith.constant 0 : index
    %585 = vector.load %arg24[%c1, %c0_237] : memref<2x6xf32, #tpu.memory_space<vmem>>, vector<1x6xf32>
    tpu.vector_store %arg24[%c1, %c0_237], %584 {strides = array<i32>} : memref<2x6xf32, #tpu.memory_space<vmem>>, vector<1x6xf32>,
    %586 = arith.addf %321, %426 : vector<1x1xf32>
    %587 = arith.addf %586, %553 : vector<1x1xf32>
    %cst_238 = arith.constant 5.000000e-01 : f32
    %588 = vector.broadcast %cst_238 : f32 to vector<1x1xf32>
    %589 = arith.mulf %587, %588 : vector<1x1xf32>
    %c0_239 = arith.constant 0 : index
    %c0_240 = arith.constant 0 : index
    %590 = vector.load %arg25[%c0_239, %c0_240] : memref<1x1xf32, #tpu.memory_space<vmem>>, vector<1x1xf32>
    tpu.vector_store %arg25[%c0_239, %c0_240], %589 {strides = array<i32>} : memref<1x1xf32, #tpu.memory_space<vmem>>, vector<1x1xf32>,
    return
  }
}

module attributes {stable_mosaic.version = 11 : i64} {
  func.func @_gcn_kernel(%arg0: i32, %arg1: i32, %arg2: memref<24x24xbf16, #tpu.memory_space<vmem>>, %arg3: memref<24x8xf32, #tpu.memory_space<vmem>>, %arg4: memref<8x32xf32, #tpu.memory_space<vmem>>, %arg5: memref<1x32xf32, #tpu.memory_space<vmem>>, %arg6: memref<24x32xf32, #tpu.memory_space<vmem>>, %arg7: memref<24x32xf32, #tpu.memory_space<vmem>>) attributes {dimension_semantics = [#tpu.dimension_semantics<parallel>, #tpu.dimension_semantics<arbitrary>], iteration_bounds = array<i64: 1, 1>, scalar_prefetch = 0 : i64, scratch_operands = 1 : i64, tpu.core_type = #tpu.core_type<tc>, window_params = [{transform_indices = @transform_0, window_bounds = array<i64: 24, 24>}, {transform_indices = @transform_1, window_bounds = array<i64: 24, 8>}, {pipeline_mode = #tpu.pipeline_mode<synchronous>, transform_indices = @transform_2, window_bounds = array<i64: 8, 32>}, {pipeline_mode = #tpu.pipeline_mode<synchronous>, transform_indices = @transform_3, window_bounds = array<i64: 1, 32>}, {transform_indices = @transform_4, window_bounds = array<i64: 24, 32>}]} {
    %c0_i32 = arith.constant 0 : i32
    %0 = arith.cmpi eq, %arg1, %c0_i32 : i32
    %1 = arith.extui %0 : i1 to i32
    %c0_i32_0 = arith.constant 0 : i32
    %2 = arith.cmpi ne, %1, %c0_i32_0 : i32
    scf.if %2 {
      %cst_13 = arith.constant 0.000000e+00 : f32
      %17 = vector.broadcast %cst_13 : f32 to vector<24x32xf32>
      %c0_14 = arith.constant 0 : index
      %c0_15 = arith.constant 0 : index
      %18 = vector.load %arg7[%c0_14, %c0_15] : memref<24x32xf32, #tpu.memory_space<vmem>>, vector<24x32xf32>
      tpu.vector_store %arg7[%c0_14, %c0_15], %17 {strides = array<i32>} : memref<24x32xf32, #tpu.memory_space<vmem>>, vector<24x32xf32>,
    } else {
    }
    %c0 = arith.constant 0 : index
    %c0_1 = arith.constant 0 : index
    %3 = vector.load %arg3[%c0, %c0_1] : memref<24x8xf32, #tpu.memory_space<vmem>>, vector<24x8xf32>
    %4 = arith.truncf %3 : vector<24x8xf32> to vector<24x8xbf16>
    %c0_2 = arith.constant 0 : index
    %c0_3 = arith.constant 0 : index
    %5 = vector.load %arg4[%c0_2, %c0_3] : memref<8x32xf32, #tpu.memory_space<vmem>>, vector<8x32xf32>
    %6 = arith.truncf %5 : vector<8x32xf32> to vector<8x32xbf16>
    %cst = arith.constant dense<0.000000e+00> : vector<24x32xf32>
    %7 = tpu.matmul %4, %6, %cst {dimension_numbers = #tpu.dot_dimension_numbers<[1], [0], [0], [1], [0, 0, 1, 1], [], []>} : vector<24x8xbf16>, vector<8x32xbf16>, vector<24x32xf32> -> vector<24x32xf32>
    %8 = arith.truncf %7 : vector<24x32xf32> to vector<24x32xbf16>
    %c0_4 = arith.constant 0 : index
    %c0_5 = arith.constant 0 : index
    %9 = vector.load %arg7[%c0_4, %c0_5] : memref<24x32xf32, #tpu.memory_space<vmem>>, vector<24x32xf32>
    %c0_6 = arith.constant 0 : index
    %c0_7 = arith.constant 0 : index
    %10 = vector.load %arg2[%c0_6, %c0_7] : memref<24x24xbf16, #tpu.memory_space<vmem>>, vector<24x24xbf16>
    %cst_8 = arith.constant dense<0.000000e+00> : vector<24x32xf32>
    %11 = tpu.matmul %10, %8, %cst_8 {dimension_numbers = #tpu.dot_dimension_numbers<[1], [0], [0], [1], [0, 0, 1, 1], [], []>} : vector<24x24xbf16>, vector<24x32xbf16>, vector<24x32xf32> -> vector<24x32xf32>
    %12 = arith.addf %9, %11 : vector<24x32xf32>
    %c0_9 = arith.constant 0 : index
    %c0_10 = arith.constant 0 : index
    %13 = vector.load %arg7[%c0_9, %c0_10] : memref<24x32xf32, #tpu.memory_space<vmem>>, vector<24x32xf32>
    tpu.vector_store %arg7[%c0_9, %c0_10], %12 {strides = array<i32>} : memref<24x32xf32, #tpu.memory_space<vmem>>, vector<24x32xf32>,
    %c0_i32_11 = arith.constant 0 : i32
    %14 = arith.cmpi eq, %arg1, %c0_i32_11 : i32
    %15 = arith.extui %14 : i1 to i32
    %c0_i32_12 = arith.constant 0 : i32
    %16 = arith.cmpi ne, %15, %c0_i32_12 : i32
    scf.if %16 {
      %c0_13 = arith.constant 0 : index
      %c0_14 = arith.constant 0 : index
      %17 = vector.load %arg7[%c0_13, %c0_14] : memref<24x32xf32, #tpu.memory_space<vmem>>, vector<24x32xf32>
      %c0_15 = arith.constant 0 : index
      %c0_16 = arith.constant 0 : index
      %18 = vector.load %arg5[%c0_15, %c0_16] : memref<1x32xf32, #tpu.memory_space<vmem>>, vector<1x32xf32>
      %19 = vector.broadcast %18 : vector<1x32xf32> to vector<24x32xf32>
      %20 = arith.addf %17, %19 : vector<24x32xf32>
      %cst_17 = arith.constant 0.000000e+00 : f32
      %21 = vector.broadcast %cst_17 : f32 to vector<24x32xf32>
      %22 = arith.maximumf %20, %21 : vector<24x32xf32>
      %c0_18 = arith.constant 0 : index
      %c0_19 = arith.constant 0 : index
      %23 = vector.load %arg6[%c0_18, %c0_19] : memref<24x32xf32, #tpu.memory_space<vmem>>, vector<24x32xf32>
      tpu.vector_store %arg6[%c0_18, %c0_19], %22 {strides = array<i32>} : memref<24x32xf32, #tpu.memory_space<vmem>>, vector<24x32xf32>,
    } else {
    }
    return
  }
  func.func @transform_0(%arg0: i32, %arg1: i32) -> (i32, i32) {
    %c0_i32 = arith.constant 0 : i32
    return %arg0, %arg1 : i32, i32
  }
  func.func @transform_1(%arg0: i32, %arg1: i32) -> (i32, i32) {
    %c0_i32 = arith.constant 0 : i32
    %c0_i32_0 = arith.constant 0 : i32
    return %arg1, %c0_i32 : i32, i32
  }
  func.func @transform_2(%arg0: i32, %arg1: i32) -> (i32, i32) {
    %c0_i32 = arith.constant 0 : i32
    %c0_i32_0 = arith.constant 0 : i32
    %c0_i32_1 = arith.constant 0 : i32
    return %c0_i32, %c0_i32_0 : i32, i32
  }
  func.func @transform_3(%arg0: i32, %arg1: i32) -> (i32, i32) {
    %c0_i32 = arith.constant 0 : i32
    %c0_i32_0 = arith.constant 0 : i32
    %c0_i32_1 = arith.constant 0 : i32
    return %c0_i32, %c0_i32_0 : i32, i32
  }
  func.func @transform_4(%arg0: i32, %arg1: i32) -> (i32, i32) {
    %c0_i32 = arith.constant 0 : i32
    %c0_i32_0 = arith.constant 0 : i32
    return %arg0, %c0_i32 : i32, i32
  }
}

</mosaic_0001>

<bundles_post_ra>
// kernel: net_forward.2
= control target key start
LH: loop header
LB: loop body
LE: loop exit
PB: predicated region body
PF: predicated region fallthrough
CT: control target
= control target key end

     0   :  { %vm40_vm0 = vcmask 1043456   ;;  %vm33_vm1 = vcmask 64512   ;;  %vm108_vm2 = vcmask 195584   ;;  %vm22_vm3 = vcmask 261120   ;;  %s303_s2 = inlined_call_operand.vmem [shape: f32[8,32], index: 2, kind: input, shape index: {}]   ;;  %s304_s1 = inlined_call_operand.vmem [shape: f32[24,8], index: 1, kind: input, shape index: {}]   ;;  %s305_s0 = inlined_call_operand.vmem [shape: bf16[24,24], index: 0, kind: input, shape index: {}]   ;;  %s306_s3 = inlined_call_operand.vmem [shape: f32[1,32], index: 3, kind: input, shape index: {}]   ;;  %s307_s4 = inlined_call_operand.vmem [shape: f32[24,32], index: 4, kind: output, shape index: {}]  }
   0x1   :  { %v31_v0 = vld [vmem:[%s303_s2] sm:$0xff]  ;;  %v27_v2 = vld [vmem:[%s304_s1 + $0x8] sm:$0xff]  ;;  %v28_v4 = vld [vmem:[%s304_s1 + $0x10] sm:$0xff]  ;;  %v232_v9 = vmov 0.0  }
   0x2   :  { %v26_v1 = vld [vmem:[%s304_s1] sm:$0xff]  ;;  %v32_v3 = vpack.c.bf16 %v31_v0, %v31_v0  ;;  %v30_v7 = vpack.c.bf16 %v28_v4, %v28_v4  ;;  %25 = vst.msk [vmem:[#allocation2 + $0x10] sm:$0xff] %vm22_vm3, %v232_v9  ;;  %23 = vst.msk [vmem:[#allocation2] sm:$0xff] %vm22_vm3, %v232_v9  ;;  %v231_v17 = vld [vmem:[%s305_s0 + $0x8] ss:$0 sps:$4 sm:$0xff]  }
   0x3   :  { %v29_v5 = vpack.c.bf16 %v27_v2, %v26_v1  ;;  %v230_v8 = vld [vmem:[%s305_s0] sm:$0xff]   ;;  %24 = vst.msk [vmem:[#allocation2 + $0x8] sm:$0xff] %vm22_vm3, %v232_v9 }
   0x4   :  { %227 = vmatprep.subr.msk.bf16.mxu0 %vm40_vm0, %v32_v3  ;;  %v42_v6 = vsel %vm40_vm0, %v32_v3, 0  ;;  %223 = vmatprep.mubr.msk.bf16.mxu1 %vm108_vm2, %v230_v8  ;;  %v205_v28 = vld [vmem:[%s306_s3] ss:$0 sm:$0xff] }
   0x5   :  { %215 = vmatprep.mubr.msk.bf16.mxu0 %vm33_vm1, %v29_v5  ;;  %214 = vmatpush3.bf16.msra.mxu0 %v42_v6 }
   0x8   :  { %216 = vmatmul.mubr.msk.bf16.vlgmr.msra.gmra.mrb[0].mxu0 %vm33_vm1, %v30_v7 }
   0x9   :  { %v96_v18 = vld [vmem:[#allocation2 + $0x10] sm:$0xff]  ;;  %v94_v19 = vld [vmem:[#allocation2] sm:$0xff] }
   0xa   :  { %v95_v23 = vld [vmem:[#allocation2 + $0x8] sm:$0xff] }
  0xdb   :  { %v217_v10 = vpop.f32.mrb[0].mxu0 }
  0xdc   :  { %v78_v11 = vpop.f32.mrb[1].mxu0  ;;  %v93_v15 = vpack.c.bf16 %v217_v10, %v217_v10 }
  0xdd   :  { %v218_v12 = vpop.f32.mrb[2].mxu0 }
  0xde   :  { %v81_v13 = vpop.f32.mrb[3].mxu0  ;;  %v116_v16 = vsel %vm40_vm0, %v93_v15, 0 }
  0xdf   :  { %v92_v14 = vpack.c.bf16 %v81_v13, %v78_v11 }
  0xe1   :  { %219 = vmatprep.subr.bf16.mxu1 %v92_v14 }
  0xe2   :  { %220 = vmatpush3.bf16.msra.mxu1 %v92_v14 }
  0xe3   :  { %228 = vmatprep.subr.msk.bf16.mxu1 %vm40_vm0, %v93_v15 }
  0xe6   :  { %222 = vmatpush3.bf16.msra.mxu1 %v116_v16 }
  0xe9   :  { %224 = vmatmul.mubr.msk.bf16.vlgmr.msra.gmra.mrb[0].mxu1 %vm108_vm2, %v231_v17 }
 0x1bc   :  { %v225_v20 = vpop.f32.mrb[0].mxu1 }
 0x1bd   :  { %v168_v21 = vadd.f32 %v225_v20, %v96_v18  ;;  %v152_v22 = vpop.f32.mrb[1].mxu1 }
 0x1be   :  { %v166_v24 = vadd.f32 %v152_v22, %v94_v19  ;;  %v226_v25 = vpop.f32.mrb[2].mxu1 }
 0x1bf   :  { %172 = vst.msk [vmem:[#allocation2 + $0x10] sm:$0xff] %vm22_vm3, %v168_v21  ;;  %v155_v26 = vpop.f32.mrb[3].mxu1 }
 0x1c0   :  { %170 = vst.msk [vmem:[#allocation2] sm:$0xff] %vm22_vm3, %v166_v24  ;;  %v167_v27 = vadd.f32 %v155_v26, %v95_v23 }
 0x1c2   :  { %171 = vst.msk [vmem:[#allocation2 + $0x8] sm:$0xff] %vm22_vm3, %v167_v27 }
 0x1c6   :  { %v178_v29 = vld [vmem:[#allocation2 + $0x10] sm:$0xff] }
 0x1c7   :  { %v188_v30 = vadd.f32 %v205_v28, %v178_v29  ;;  %v176_v31 = vld [vmem:[#allocation2] sm:$0xff] }
 0x1c8   :  { %v186_v32 = vadd.f32 %v205_v28, %v176_v31 }
 0x1c9   :  { %v191_v33 = vmax.f32 %v188_v30, 0.0  ;;  %v177_v34 = vld [vmem:[#allocation2 + $0x8] sm:$0xff] }
 0x1ca   :  { %v189_v35 = vmax.f32 %v186_v32, 0.0  ;;  %v187_v36 = vadd.f32 %v205_v28, %v177_v34 }
 0x1cb   :  { %194 = vst.msk [vmem:[%s307_s4 + $0x10] sm:$0xff] %vm22_vm3, %v191_v33 }
 0x1cc   :  { %192 = vst.msk [vmem:[%s307_s4] sm:$0xff] %vm22_vm3, %v189_v35  ;;  %v190_v37 = vmax.f32 %v187_v36, 0.0 }
 0x1ce   :  { %193 = vst.msk [vmem:[%s307_s4 + $0x8] sm:$0xff] %vm22_vm3, %v190_v37 }

// kernel: net_forward.3
= control target key start
LH: loop header
LB: loop body
LE: loop exit
PB: predicated region body
PF: predicated region fallthrough
CT: control target
= control target key end

     0   :  { %s5038_s0 = inlined_call_operand.vmem [shape: f32[2,12,32], index: 0, kind: input, shape index: {}]   ;;  %s5039_s1 = inlined_call_operand.vmem [shape: bf16[2,12,12], index: 1, kind: input, shape index: {}]   ;;  %s5040_s2 = inlined_call_operand.vmem [shape: f32[2,12,1], index: 2, kind: input, shape index: {}]   ;;  %s5041_s3 = inlined_call_operand.vmem [shape: f32[12,12], index: 3, kind: input, shape index: {}]   ;;  %s5042_s4 = inlined_call_operand.vmem [shape: f32[6,6], index: 4, kind: input, shape index: {}]   ;;  %s5043_s5 = inlined_call_operand.vmem [shape: f32[32,32], index: 5, kind: input, shape index: {}]   ;;  %s5044_s6 = inlined_call_operand.vmem [shape: f32[1,32], index: 6, kind: input, shape index: {}]   ;;  %s5045_s7 = inlined_call_operand.vmem [shape: f32[32,12], index: 7, kind: input, shape index: {}]   ;;  %s5046_s8 = inlined_call_operand.vmem [shape: f32[1,12], index: 8, kind: input, shape index: {}]   ;;  %s5047_s9 = inlined_call_operand.vmem [shape: f32[32,32], index: 9, kind: input, shape index: {}]   ;;  %s5048_s10 = inlined_call_operand.vmem [shape: f32[1,32], index: 10, kind: input, shape index: {}]   ;;  %s5049_s11 = inlined_call_operand.vmem [shape: f32[32,32], index: 11, kind: input, shape index: {}]   ;;  %s5050_s12 = inlined_call_operand.vmem [shape: f32[32,32], index: 12, kind: input, shape index: {}]   ;;  %s5051_s13 = inlined_call_operand.vmem [shape: f32[1,32], index: 13, kind: input, shape index: {}]   ;;  %s5052_s14 = inlined_call_operand.vmem [shape: f32[32,6], index: 14, kind: input, shape index: {}]   ;;  %s5053_s15 = inlined_call_operand.vmem [shape: f32[1,6], index: 15, kind: input, shape index: {}]   ;;  %s5054_s16 = inlined_call_operand.vmem [shape: f32[32,32], index: 16, kind: input, shape index: {}]   ;;  %s5055_s17 = inlined_call_operand.vmem [shape: f32[1,32], index: 17, kind: input, shape index: {}]   ;;  %s5056_s18 = inlined_call_operand.vmem [shape: f32[32,32], index: 18, kind: input, shape index: {}]   ;;  %s5057_s19 = inlined_call_operand.vmem [shape: f32[32,32], index: 19, kind: input, shape index: {}]   ;;  %s5058_s20 = inlined_call_operand.vmem [shape: f32[1,32], index: 20, kind: input, shape index: {}]   ;;  %s5059_s21 = inlined_call_operand.vmem [shape: f32[32,6], index: 21, kind: input, shape index: {}]   ;;  %s5060_s22 = inlined_call_operand.vmem [shape: f32[1,6], index: 22, kind: input, shape index: {}]   ;;  %s5061_s23 = inlined_call_operand.vmem [shape: f32[2,12,12], index: 23, kind: output, shape index: {0}]   ;;  %s5062_s24 = inlined_call_operand.hbm [shape: f32[2,6], index: 24, kind: output, shape index: {1}]   ;;  %s5063_s25 = inlined_call_operand.hbm [shape: f32[1,1], index: 25, kind: output, shape index: {2}]  }
   0x1   :  { %5085 = sst [smem:[#allocation16_spill]] %s5038_s0 }
   0x2   :  { %5086 = sst [smem:[#allocation17_spill]] %s5039_s1 }
   0x3   :  { %5087 = sst [smem:[#allocation18_spill]] %s5040_s2 }
   0x4   :  { %5088 = sst [smem:[#allocation19_spill]] %s5041_s3 }
   0x5   :  { %5089 = sst [smem:[#allocation20_spill]] %s5042_s4 }
   0x6   :  { %5090 = sst [smem:[#allocation21_spill]] %s5043_s5 }
   0x7   :  { %5091 = sst [smem:[#allocation22_spill]] %s5044_s6 }
   0x8   :  { %5092 = sst [smem:[#allocation23_spill]] %s5045_s7 }
   0x9   :  { %5093 = sst [smem:[#allocation24_spill]] %s5046_s8 }
   0xa   :  { %5094 = sst [smem:[#allocation25_spill]] %s5047_s9 }
   0xb   :  { %31 = vsyncpa [#allocation3], 0  ;;  %s5095_s6 = sld [smem:[#allocation21_spill]]  ;;  %s5096_s28 = sld [smem:[#allocation16_spill]] }
  0x11   :  { %v96_v0 = vld [vmem:[%s5095_s6] sm:$0xff]  ;;  %v97_v1 = vld [vmem:[%s5095_s6 + $0x8] sm:$0xff]  ;;  %v98_v2 = vld [vmem:[%s5095_s6 + $0x10] sm:$0xff] }
  0x12   :  { %v100_v3 = vpack.c.bf16 %v97_v1, %v96_v0  ;;  %v99_v4 = vld [vmem:[%s5095_s6 + $0x18] sm:$0xff]  ;;  %v4043_v5 = vld [vmem:[%s5096_s28] sm:$0xff]  ;;  %v4048_v6 = vld [vmem:[%s5096_s28 + $0x8] sm:$0xf] }
  0x13   :  { %v101_v7 = vpack.c.bf16 %v99_v4, %v98_v2  ;;  %v83_v8 = vld [vmem:[%s5096_s28 + $0x10] sm:$0xff]  ;;  %v168_v9 = vcombine.high %v4043_v5, %v4043_v5  ;;  %v84_v10 = vld [vmem:[%s5096_s28 + $0x18] sm:$0xf] }
  0x14   :  { %3398 = vmatprep.subr.bf16.mxu0 %v100_v3  ;;  %v169_v11 = vcombine.high %v83_v8, %v83_v8  ;;  %v171_v12 = vcombine.low %v4048_v6, %v83_v8 }
  0x15   :  { %3399 = vmatpush3.bf16.msra.mxu0 %v100_v3  ;;  %v170_v13 = vcombine.low %v4043_v5, %v168_v9 }
  0x16   :  { %32 = vsyncpa [#allocation5], 0  ;;  %3400 = vmatprep.subr.bf16.mxu0 %v101_v7  ;;  %vm184_vm0 = vcmask 261120   ;;  %v172_v14 = vcombine.low %v169_v11, %v84_v10  ;;  %s5097_s3 = sld [smem:[#allocation23_spill]]  ;;  %s5098_s29 = sld [smem:[#allocation22_spill]]  ;;  %vm301_vm1 = vcmask 97280   ;;  %v428_v57 = vpack.c.bf16 %v4048_v6, %v4043_v5 }
  0x17   :  { %v176_v15 = vpack.c.bf16 %v171_v12, %v170_v13  ;;  %s5099_s30 = sld [smem:[#allocation24_spill]]  ;;  %s5100_s26 = sld [smem:[#allocation18_spill]]  ;;  %v3891_v44 = vmov 0   ;;  %v5075_v56 = vmov 0.0   ;;  %vm3893_vm2 = vmmov 0  }
  0x18   :  { %v177_v16 = vpack.c.bf16 %v172_v14, %v172_v14  ;;  %3693 = vset.pattern.permute.xlu0 %v3891_v44  ;;  %3694 = vset.pattern.permute.xlu1 %v3891_v44  ;;  %vm448_vm3 = vcmask 1045504   ;;  %v3894_v60 = vmov 839922192   ;;  %v363_v62 = vlaneseq  ;;  %s5101_s2 = sld [smem:[#allocation17_spill]]  ;;  %s5102_s5 = sld [smem:[#allocation19_spill]] }
  0x19   :  { %3401 = vmatpush3.bf16.msra.mxu0 %v101_v7  ;;  %3402 = vmatprep.mubr.msk.bf16.mxu0 %vm184_vm0, %v176_v15  ;;  %v450_v58 = vsel %vm448_vm3, %v428_v57, 0  ;;  %v361_v61 = vunpack.c.l.s4 %v3894_v60  ;;  %v3895_v63 = vmov 1985246804   ;;  %vm423_vm4 = vcmask 93184   ;;  %s5105_s7 = sld [smem:[#allocation25_spill]]  ;;  %s5107_s9 = sld [smem:[#allocation20_spill]] }
  0x1a   :  { %3414 = vmatprep.subr.bf16.mxu0 %v5075_v56  ;;  %v368_v0 = vunpack.c.l.s4 %v3895_v63  ;;  %v364_v3 = vshrl.u32 %v363_v62, 7  ;;  %vm650_vm9 = vcmask 7168   ;;  %vm652_vm10 = vcmask 3072  }
  0x1b   :  { %v362_v2 = vunpack.c.0.s8 %v361_v61  ;;  %vm1159_vm15 = vcmask 48128  }
  0x1c   :  { %3403 = vmatmul.mubr.msk.bf16.vlgmr.msra.gmra.mrb[0].mxu0 %vm184_vm0, %v177_v16  ;;  %v103_v17 = vld [vmem:[%s5097_s3] sm:$0xff]  ;;  %v104_v18 = vld [vmem:[%s5097_s3 + $0x8] sm:$0xff]  ;;  %v105_v20 = vld [vmem:[%s5097_s3 + $0x10] sm:$0xff]  ;;  %v369_v4 = vunpack.c.0.s8 %v368_v0 }
  0x1d   :  { %v107_v19 = vpack.c.bf16 %v104_v18, %v103_v17  ;;  %v106_v21 = vld [vmem:[%s5097_s3 + $0x18] sm:$0xff]  ;;  %v3232_v24 = vld [vmem:[%s5098_s29] ss:$0 sm:$0xff]  ;;  %v90_v55 = vld [vmem:[%s5100_s26 + $0x8] sm:$0xf]  ;;  %3416 = vmatprep.mubr.msk.bf16.mxu0 %vm3893_vm2, %v5075_v56  ;;  %3415 = vmatpush3.bf16.msra.mxu0 %v450_v58  ;;  %v4106_v7 = vsub.s32 %v362_v2, %v364_v3 }
  0x1e   :  { %v108_v22 = vpack.c.bf16 %v106_v21, %v105_v20  ;;  %v3235_v33 = vld [vmem:[%s5099_s30] ss:$0 sm:$0xff]  ;;  %3426 = vmatprep.subr.bf16.mxu0 %v5075_v56  ;;  %v4108_v5 = vsub.s32 %v369_v4, %v364_v3  ;;  %v4200_v61 = vld [vmem:[%s5102_s5 + $0x8] sm:$0xf] }
  0x1f   :  { %3406 = vmatprep.subr.bf16.mxu1 %v107_v19  ;;  %v89_v43 = vld [vmem:[%s5100_s26] sm:$0xff]  ;;  %v5073_v63 = vsub.f32 1.0, %v4200_v61 }
  0x20   :  { %3407 = vmatpush3.bf16.msra.mxu1 %v107_v19  ;;  %v4195_v60 = vld [vmem:[%s5102_s5] sm:$0xff] }
  0x21   :  { %3408 = vmatprep.subr.bf16.mxu1 %v108_v22  ;;  %v5074_v62 = vsub.f32 1.0, %v4195_v60 }
  0x24   :  { %3409 = vmatpush3.bf16.msra.mxu1 %v108_v22 }
  0x25   :  { %3420 = vmatprep.subr.bf16.mxu1 %v5075_v56 }
  0xef   :  { %v3404_v23 = vpop.f32.mrb[0].mxu0 }
  0xf0   :  { %v225_v25 = vpop.f32.mrb[1].mxu0  ;;  %v234_v27 = vadd.f32 %v3404_v23, %v3232_v24  ;;  %v3698_v23 = vld [vmem:[%s5101_s2] sm:$0x3f]  }
  0xf1   :  { %v3405_v26 = vpop.f32.mrb[2].mxu0  ;;  %v226_v29 = vadd.f32 %v3232_v24, %v225_v25  ;;  %v4151_v25 = vsel %vm448_vm3, 1065369472, %v3891_v44 }
  0xf2   :  { %v228_v28 = vpop.f32.mrb[3].mxu0  ;;  %v240_v32 = vpack.c.bf16 %v234_v27, %v234_v27 }
  0xf3   :  { %v229_v30 = vadd.f32 %v3232_v24, %v228_v28 }
  0xf5   :  { %v239_v31 = vpack.c.bf16 %v229_v30, %v226_v29 }
  0xf7   :  { %3410 = vmatprep.mubr.msk.bf16.mxu1 %vm184_vm0, %v239_v31 }
  0xf8   :  { %3411 = vmatmul.mubr.msk.bf16.vlgmr.msra.gmra.mrb[0].mxu1 %vm184_vm0, %v240_v32  ;;  %v117_v32 = vld [vmem:[%s5049_s11] sm:$0xff] }
  0xf9   :  { %3422 = vmatprep.mubr.msk.bf16.mxu1 %vm3893_vm2, %v5075_v56 }
 0x1cb   :  { %v3412_v34 = vpop.f32.mrb[0].mxu1 }
 0x1cc   :  { %v4082_v35 = vadd.f32 %v3412_v34, %v3235_v33  ;;  %v287_v36 = vpop.f32.mrb[1].mxu1 }
 0x1cd   :  { %v288_v37 = vadd.f32 %v3235_v33, %v287_v36  ;;  %v3413_v38 = vpop.f32.mrb[2].mxu1  ;;  %v119_v36 = vld [vmem:[%s5049_s11 + $0x10] sm:$0xff] }
 0x1ce   :  { %v290_v39 = vpop.f32.mrb[3].mxu1 }
 0x1cf   :  { %v291_v40 = vadd.f32 %v3235_v33, %v290_v39  ;;  %v302_v41 = vsel %vm301_vm1, %v288_v37, -inf  ;;  %v118_v33 = vld [vmem:[%s5049_s11 + $0x8] sm:$0xff] }
 0x1d0   :  { %303 = vmax.xlane.f32.xlu0 %v302_v41  ;;  %v4170_v34 = vpack.c.bf16 %v118_v33, %v117_v32 }
 0x1d1   :  { %v305_v42 = vsel %vm301_vm1, %v291_v40, -inf }
 0x1d4   :  { %306 = vmax.xlane.f32.xlu0 %v305_v42 }
 0x1ea   :  { %346 = vperm.xlu0 %3693, %v89_v43  }
 0x25d   :  { %v304_v45 = vpop.xlane.xlu0 %303 }
 0x25e   :  { %v311_v46 = vsub.f32 %v288_v37, %v304_v45  ;;  %v120_v37 = vld [vmem:[%s5049_s11 + $0x18] sm:$0xff] }
 0x25f   :  { %v4180_v38 = vpack.c.bf16 %v120_v37, %v119_v36 }
 0x260   :  { %v314_v47 = vmul.f32 1.442695, %v311_v46 }
 0x261   :  { %v307_v48 = vpop.xlane.xlu0 %306 }
 0x262   :  { %3700 = vpow2.f32 %v314_v47  ;;  %v312_v49 = vsub.f32 %v291_v40, %v307_v48 }
 0x264   :  { %v316_v50 = vmul.f32 1.442695, %v312_v49 }
 0x266   :  { %3702 = vpow2.f32 %v316_v50 }
 0x269   :  { %v347_v6 = vpop.permute.xlu0 %346 }
 0x26a   :  { %v366_v11 = vrot.slane %v347_v6, %v4106_v7  ;;  %v373_v12 = vrot.slane %v347_v6, %v4108_v5 }
 0x26c   :  { %v3701_v51 = vpop.eup %3700 }
 0x26d   :  { %v320_v52 = vsel %vm301_vm1, %v3701_v51, 0.0 }
 0x26e   :  { %321 = vadd.xlane.f32.xlu1 %v320_v52 }
 0x270   :  { %v3703_v53 = vpop.eup %3702 }
 0x271   :  { %v323_v54 = vsel %vm301_vm1, %v3703_v53, 0.0 }
 0x272   :  { %324 = vadd.xlane.f32.xlu1 %v323_v54 }
 0x283   :  { %350 = vperm.xlu1 %3694, %v90_v55  }
 0x2fb   :  { %v322_v59 = vpop.xlane.xlu1 %321 }
 0x2fc   :  { %3704 = vrcp.f32 %v322_v59 }
 0x2ff   :  { %v325_v1 = vpop.xlane.xlu1 %324 }
 0x300   :  { %3706 = vrcp.f32 %v325_v1 }
 0x303   :  { %v351_v9 = vpop.permute.xlu1 %350 }
 0x304   :  { %v380_v14 = vrot.slane %v351_v9, %v4106_v7 }
 0x306   :  { %v3705_v8 = vpop.eup %3704 }
 0x307   :  { %v330_v10 = vmul.f32 %v3705_v8, %v3701_v51 }
 0x309   :  { %v338_v13 = vcombine.high %v330_v10, %v330_v10  ;;  %v4113_v16 = vmul.f32 %v366_v11, %v330_v10 }
 0x30a   :  { %v3707_v15 = vpop.eup %3706 }
 0x30b   :  { %v4115_v17 = vmul.f32 %v373_v12, %v338_v13  ;;  %v4117_v18 = vmul.f32 %v3707_v15, %v3703_v53 }
 0x30d   :  { %v4121_v19 = vcombine.low %v4113_v16, %v4115_v17  ;;  %v4124_v20 = vmul.f32 %v380_v14, %v4117_v18 }
 0x30f   :  { %422 = vst.msk [vmem:[%s5061_s23] sm:$0xff] %vm301_vm1, %v4121_v19  ;;  %v427_v21 = vpack.c.bf16 %v4124_v20, %v4121_v19 }
 0x310   :  { %424 = vst.msk [vmem:[%s5061_s23 + $0x8] sm:$0xf] %vm423_vm4, %v4124_v20 }
 0x311   :  { %429 = vxpose.xlu1.c.b16.start.end [1/1] (short) (narrow) %v427_v21, 16  ;;  %v518_v22 = vsel %vm448_vm3, %v427_v21, 0 }
 0x312   :  { %3421 = vmatpush3.bf16.msra.mxu1 %v518_v22 }
 0x313   :  { %3432 = vmatprep.subr.bf16.mxu1 %v5075_v56 }
 0x315   :  { %3423 = vmatmul.mubr.msk.bf16.vlgmr.msra.gmra.mrb[4].mxu1 %vm301_vm1, %v3698_v23 }
 0x316   :  { %3434 = vmatprep.mubr.msk.bf16.mxu1 %vm3893_vm2, %v5075_v56  ;;  %3433 = vmatpush3.bf16.msra.mxu1 %v4151_v25 }
 0x317   :  { %3444 = vmatprep.subr.bf16.mxu1 %v5075_v56 }
 0x31d   :  { %3435 = vmatmul.mubr.msk.bf16.vlgmr.msra.gmra.mrb[8].mxu1 %vm301_vm1, %v3698_v23 }
 0x31e   :  { %3446 = vmatprep.mubr.msk.bf16.mxu1 %vm3893_vm2, %v5075_v56 }
 0x377   :  { %v437_v24 = vpop.trf.xlu1 }
 0x378   :  { %3417 = vmatmul.mubr.msk.bf16.vlgmr.msra.gmra.mrb[4].mxu0 %vm301_vm1, %v437_v24 }
 0x379   :  { %3428 = vmatprep.mubr.msk.bf16.mxu0 %vm3893_vm2, %v5075_v56 }
 0x3e8   :  { %v554_v26 = vpop.f32.mrb[4].mxu1 }
 0x3e9   :  { %v3424_v27 = vpop.f32.mrb[5].mxu1 }
 0x3ea   :  { %v557_v28 = vpop.f32.mrb[6].mxu1 }
 0x3eb   :  { %v561_v29 = vpack.c.bf16 %v557_v28, %v554_v26  ;;  %v3425_v30 = vpop.f32.mrb[7].mxu1 }
 0x3ed   :  { %v563_v31 = vsel %vm448_vm3, %v561_v29, 0 }
 0x3ee   :  { %3427 = vmatpush3.bf16.msra.mxu0 %v563_v31 }
 0x3ef   :  { %3438 = vmatprep.subr.bf16.mxu0 %v5075_v56 }
 0x3f1   :  { %3429 = vmatmul.mubr.msk.bf16.vlgmr.msra.gmra.mrb[8].mxu0 %vm301_vm1, %v437_v24 }
 0x3f2   :  { %3439 = vmatpush3.bf16.msra.mxu0 %v518_v22  ;;  %3440 = vmatprep.mubr.msk.bf16.mxu0 %vm3893_vm2, %v5075_v56 }
 0x3f3   :  { %3450 = vmatprep.subr.bf16.mxu0 %v5075_v56 }
 0x3f9   :  { %3441 = vmatmul.mubr.msk.bf16.vlgmr.msra.gmra.mrb[12].mxu0 %vm301_vm1, %v437_v24 }
 0x3fa   :  { %3451 = vmatpush3.bf16.msra.mxu0 %v4170_v34  ;;  %3454 = vmatprep.mubr.msk.bf16.mxu0 %vm3893_vm2, %v5075_v56 }
 0x3fb   :  { %3452 = vmatprep.subr.bf16.mxu0 %v5075_v56 }
 0x3fe   :  { %3453 = vmatpush3.bf16.msra.mxu0 %v4180_v38 }
 0x3ff   :  { %3466 = vmatprep.subr.bf16.mxu0 %v5075_v56 }
 0x44b   :  { %v486_v39 = vpop.f32.mrb[4].mxu0 }
 0x44c   :  { %v495_v40 = vmin.f32 %v486_v39, 0.0  ;;  %v3418_v41 = vpop.f32.mrb[5].mxu0  ;;  %vm493_vm5 = vcmp.gt.f32.partialorder %v486_v39, 0.0 }
 0x44d   :  { %v489_v42 = vpop.f32.mrb[6].mxu0 }
 0x44e   :  { %v497_v43 = vmul.f32 1.442695, %v495_v40  ;;  %v496_v44 = vmin.f32 %v489_v42, 0.0  ;;  %v3419_v45 = vpop.f32.mrb[7].mxu0  ;;  %vm494_vm6 = vcmp.gt.f32.partialorder %v489_v42, 0.0 }
 0x450   :  { %3708 = vpow2.f32 %v497_v43  ;;  %v499_v46 = vmul.f32 1.442695, %v496_v44 }
 0x452   :  { %3710 = vpow2.f32 %v499_v46 }
 0x45a   :  { %v3709_v47 = vpop.eup %3708 }
 0x45b   :  { %v3239_v48 = vadd.f32 -1.0, %v3709_v47 }
 0x45c   :  { %v3711_v49 = vpop.eup %3710 }
 0x45d   :  { %v503_v50 = vmul.f32 1.6732632, %v3239_v48  ;;  %v3240_v51 = vadd.f32 -1.0, %v3711_v49 }
 0x45f   :  { %v505_v52 = vsel %vm493_vm5, %v486_v39, %v503_v50  ;;  %v504_v53 = vmul.f32 1.6732632, %v3240_v51  ;;  %v4220_v39 = vpop.f32.mrb[8].mxu1  ;;  %vm1163_vm5 = vcmask 44032  }
 0x460   :  { %v507_v54 = vmul.f32 1.050701, %v505_v52  ;;  %v651_v40 = vsel %vm650_vm9, %v4220_v39, 0.0  ;;  %v3436_v41 = vpop.f32.mrb[9].mxu1 }
 0x461   :  { %v506_v55 = vsel %vm494_vm6, %v489_v42, %v504_v53  ;;  %v4224_v42 = vpop.f32.mrb[10].mxu1  ;;  %v126_v41 = vld [vmem:[%s5050_s12 + $0x18] sm:$0xff] }
 0x462   :  { %v508_v57 = vmul.f32 1.050701, %v506_v55  ;;  %v653_v43 = vsel %vm652_vm10, %v4224_v42, 0.0  ;;  %v3437_v44 = vpop.f32.mrb[11].mxu1 }
 0x463   :  { %v4228_v45 = vadd.f32 %v653_v43, %v651_v40  ;;  %v125_v40 = vld [vmem:[%s5050_s12 + $0x10] sm:$0xff]  ;;  %v4284_v44 = vld [vmem:[%s5048_s10] ss:$0 sm:$0xff] }
 0x464   :  { %v911_v58 = vpack.c.bf16 %v508_v57, %v507_v54  ;;  %v4277_v43 = vpack.c.bf16 %v126_v41, %v125_v40 }
 0x465   :  { %5104 = vst [vmem:[#allocation9_spill] sm:$0xff] %v4228_v45  ;;  %v5110_v45 = vmov 0.0  }
 0x466   :  { %3455 = vmatmul.mubr.msk.bf16.vlgmr.msra.gmra.mrb[16].mxu0 %vm184_vm0, %v911_v58  ;;  %v916_v59 = vsel %vm448_vm3, %v911_v58, 0 }
 0x467   :  { %3445 = vmatpush3.bf16.msra.mxu1 %v916_v59  ;;  %3470 = vmatprep.mubr.msk.bf16.mxu0 %vm3893_vm2, %v5075_v56 }
 0x468   :  { %3458 = vmatprep.subr.bf16.mxu1 %v5075_v56 }
 0x4c4   :  { %v4204_v0 = vpop.f32.mrb[8].mxu0 }
 0x4c5   :  { %v862_v1 = vmul.f32 %v5074_v62, %v4204_v0  ;;  %v3430_v2 = vpop.f32.mrb[9].mxu0 }
 0x4c6   :  { %v4209_v3 = vpop.f32.mrb[10].mxu0 }
 0x4c7   :  { %5103 = vst [vmem:[#allocation8_spill] sm:$0xff] %v4209_v3  ;;  %v863_v4 = vmul.f32 %v5073_v63, %v4209_v3  ;;  %v3431_v6 = vpop.f32.mrb[11].mxu0  ;;  %v864_v8 = vsel %vm301_vm1, %v862_v1, 0.0 }
 0x4c8   :  { %865 = vadd.xlane.f32.xlu0 %v864_v8 }
 0x4c9   :  { %v867_v9 = vsel %vm423_vm4, %v863_v4, 0.0 }
 0x4ca   :  { %868 = vadd.xlane.f32.xlu1 %v867_v9  ;;  %v886_v10 = vadd.f32 %v867_v9, %v864_v8 }
 0x4cc   :  { %v887_v11 = vrot.slane %v886_v10, 4  ;;  %v4216_v12 = vpop.f32.mrb[12].mxu0 }
 0x4cd   :  { %v3442_v13 = vpop.f32.mrb[13].mxu0 }
 0x4ce   :  { %v888_v14 = vadd.f32 %v887_v11, %v886_v10  ;;  %v4218_v15 = vpop.f32.mrb[14].mxu0  ;;  %v110_v10 = vld [vmem:[%s5105_s7] sm:$0xff]  ;;  %v111_v11 = vld [vmem:[%s5105_s7 + $0x8] sm:$0xff] }
 0x4cf   :  { %v3443_v21 = vpop.f32.mrb[15].mxu0 }
 0x4d0   :  { %v889_v22 = vrot.slane %v888_v14, 2 }
 0x4d2   :  { %v890_v23 = vadd.f32 %v889_v22, %v888_v14  ;;  %v4238_v22 = vpack.c.bf16 %v111_v11, %v110_v10 }
 0x4d4   :  { %v891_v24 = vrot.slane %v890_v23, 1 }
 0x4d6   :  { %v892_v26 = vadd.f32 %v891_v24, %v890_v23  ;;  %v112_v24 = vld [vmem:[%s5105_s7 + $0x10] sm:$0xff] }
 0x4d8   :  { %3712 = vrsqrt.f32 %v892_v26  ;;  %vm895_vm7 = vcmp.eq.f32.partialorder %v892_v26, inf  ;;  %v898_v29 = vand.u32 2147483648, %v892_v26  ;;  %vm897_vm8 = vcmp.eq.f32.partialorder %v892_v26, 0.0 }
 0x4e2   :  { %v3713_v27 = vpop.eup %3712 }
 0x4e3   :  { %v894_v28 = vmul.f32 %v3713_v27, %v892_v26 }
 0x4e5   :  { %v896_v30 = vsel %vm895_vm7, %v892_v26, %v894_v28  ;;  %v113_v26 = vld [vmem:[%s5105_s7 + $0x18] sm:$0xff]  ;;  %vm1582_vm7 = vcmask 1042432  }
 0x4e6   :  { %v899_v31 = vsel %vm897_vm8, %v898_v29, %v896_v30  ;;  %v4254_v27 = vpack.c.bf16 %v113_v26, %v112_v24  ;;  %vm1420_vm8 = vcmask 46080  }
 0x4e7   :  { %v900_v32 = vadd.f32 1e-15, %v899_v31 }
 0x4e9   :  { %3714 = vrcp.f32 %v900_v32 }
 0x4f3   :  { %v3715_v33 = vpop.eup %3714 }
 0x4f4   :  { %v902_v36 = vmul.f32 %v3715_v33, %v862_v1  ;;  %v903_v37 = vmul.f32 %v3715_v33, %v863_v4  ;;  %v123_v33 = vld [vmem:[%s5050_s12] sm:$0xff] }
 0x539   :  { %v996_v46 = vpop.f32.mrb[16].mxu0 }
 0x53a   :  { %v3456_v47 = vpop.f32.mrb[17].mxu0 }
 0x53b   :  { %v4230_v48 = vpop.f32.mrb[18].mxu0 }
 0x53c   :  { %v3457_v49 = vpop.f32.mrb[19].mxu0 }
 0x555   :  { %v866_v50 = vpop.xlane.xlu0 %865 }
 0x556   :  { %3716 = vrsqrt.f32 %v866_v50  ;;  %vm872_vm11 = vcmp.eq.f32.partialorder %v866_v50, inf  ;;  %v875_v55 = vand.u32 2147483648, %v866_v50  ;;  %vm874_vm12 = vcmp.eq.f32.partialorder %v866_v50, 0.0 }
 0x557   :  { %v869_v51 = vpop.xlane.xlu1 %868 }
 0x558   :  { %3718 = vrsqrt.f32 %v869_v51  ;;  %vm879_vm13 = vcmp.eq.f32.partialorder %v869_v51, inf  ;;  %v882_v1 = vand.u32 2147483648, %v869_v51  ;;  %vm881_vm14 = vcmp.eq.f32.partialorder %v869_v51, 0.0 }
 0x560   :  { %v3717_v52 = vpop.eup %3716 }
 0x561   :  { %v871_v53 = vmul.f32 %v3717_v52, %v866_v50 }
 0x562   :  { %v3719_v54 = vpop.eup %3718 }
 0x563   :  { %v873_v57 = vsel %vm872_vm11, %v866_v50, %v871_v53  ;;  %v878_v58 = vmul.f32 %v3719_v54, %v869_v51 }
 0x564   :  { %v876_v59 = vsel %vm874_vm12, %v875_v55, %v873_v57 }
 0x565   :  { %v884_v2 = vadd.f32 1e-15, %v876_v59  ;;  %v880_v4 = vsel %vm879_vm13, %v869_v51, %v878_v58 }
 0x566   :  { %v883_v6 = vsel %vm881_vm14, %v882_v1, %v880_v4  ;;  %v132_v4 = vld [vmem:[%s5052_s14 + $0x10] sm:$0xff] }
 0x567   :  { %3720 = vrcp.f32 %v884_v2  ;;  %v885_v8 = vadd.f32 1e-15, %v883_v6  ;;  %v133_v6 = vld [vmem:[%s5052_s14 + $0x18] sm:$0xff] }
 0x569   :  { %3722 = vrcp.f32 %v885_v8  ;;  %v4310_v8 = vpack.c.bf16 %v133_v6, %v132_v4 }
 0x571   :  { %v3721_v9 = vpop.eup %3720 }
 0x572   :  { %v906_v14 = vmul.f32 %v3721_v9, %v902_v36  ;;  %v124_v36 = vld [vmem:[%s5050_s12 + $0x8] sm:$0xff]  ;;  %v4317_v9 = vld [vmem:[%s5051_s13] ss:$0 sm:$0xff]  ;;  %s3897_s13 = smov [#allocation2]  }
 0x573   :  { %v3723_v13 = vpop.eup %3722 }
 0x574   :  { %v907_v21 = vmul.f32 %v3723_v13, %v903_v37  ;;  %v4267_v37 = vpack.c.bf16 %v124_v36, %v123_v33 }
 0x576   :  { %v4240_v23 = vpack.c.bf16 %v907_v21, %v906_v14  ;;  %3467 = vmatpush3.bf16.msra.mxu0 %v4267_v37 }
 0x577   :  { %3468 = vmatprep.subr.bf16.mxu0 %v5075_v56 }
 0x578   :  { %3447 = vmatmul.mubr.msk.bf16.vlgmr.msra.gmra.mrb[12].mxu1 %vm301_vm1, %v4240_v23 }
 0x579   :  { %3459 = vmatpush3.bf16.msra.mxu1 %v4238_v22  ;;  %3462 = vmatprep.mubr.msk.bf16.mxu1 %vm3893_vm2, %v5075_v56 }
 0x57a   :  { %3460 = vmatprep.subr.bf16.mxu1 %v5075_v56  ;;  %3469 = vmatpush3.bf16.msra.mxu0 %v4277_v43 }
 0x57b   :  { %3482 = vmatprep.subr.bf16.mxu0 %v5075_v56 }
 0x57d   :  { %3461 = vmatpush3.bf16.msra.mxu1 %v4254_v27 }
 0x57e   :  { %3474 = vmatprep.subr.bf16.mxu1 %v5075_v56 }
 0x64b   :  { %v952_v28 = vpop.f32.mrb[12].mxu1 }
 0x64c   :  { %v3448_v29 = vpop.f32.mrb[13].mxu1 }
 0x64d   :  { %v955_v30 = vpop.f32.mrb[14].mxu1 }
 0x64e   :  { %v959_v31 = vpack.c.bf16 %v955_v30, %v952_v28  ;;  %v3449_v32 = vpop.f32.mrb[15].mxu1  ;;  %v4327_v28 = vld [vmem:[%s5053_s15] ss:$0 sm:$0xff] }
 0x650   :  { %3463 = vmatmul.mubr.msk.bf16.vlgmr.msra.gmra.mrb[16].mxu1 %vm184_vm0, %v959_v31 }
 0x651   :  { %3478 = vmatprep.mubr.msk.bf16.mxu1 %vm3893_vm2, %v5075_v56 }
 0x723   :  { %v1040_v47 = vpop.f32.mrb[16].mxu1 }
 0x724   :  { %v1041_v49 = vadd.f32 %v1040_v47, %v996_v46  ;;  %v3464_v50 = vpop.f32.mrb[17].mxu1  ;;  %v130_v46 = vld [vmem:[%s5052_s14] sm:$0xff] }
 0x725   :  { %v1043_v51 = vpop.f32.mrb[18].mxu1 }
 0x726   :  { %v1053_v52 = vadd.f32 %v4284_v44, %v1041_v49  ;;  %v1044_v53 = vadd.f32 %v1043_v51, %v4230_v48  ;;  %v3465_v54 = vpop.f32.mrb[19].mxu1  ;;  %v131_v48 = vld [vmem:[%s5052_s14 + $0x8] sm:$0xff] }
 0x727   :  { %v4300_v2 = vpack.c.bf16 %v131_v48, %v130_v46 }
 0x728   :  { %v1054_v55 = vadd.f32 %v4284_v44, %v1044_v53  ;;  %v1055_v57 = vmax.f32 %v1053_v52, 0.0 }
 0x729   :  { %3475 = vmatpush3.bf16.msra.mxu1 %v4300_v2 }
 0x72a   :  { %v1056_v58 = vmax.f32 %v1054_v55, 0.0  ;;  %3476 = vmatprep.subr.bf16.mxu1 %v5075_v56 }
 0x72c   :  { %v1057_v59 = vpack.c.bf16 %v1056_v58, %v1055_v57 }
 0x72d   :  { %3477 = vmatpush3.bf16.msra.mxu1 %v4310_v8 }
 0x72e   :  { %3471 = vmatmul.mubr.msk.bf16.vlgmr.msra.gmra.mrb[20].mxu0 %vm184_vm0, %v1057_v59  ;;  %v1203_v1 = vsel %vm448_vm3, %v1057_v59, 0  ;;  %3488 = vmatprep.subr.bf16.mxu1 %v5075_v56 }
 0x72f   :  { %3483 = vmatpush3.bf16.msra.mxu0 %v1203_v1  ;;  %3484 = vmatprep.mubr.msk.bf16.mxu0 %vm3893_vm2, %v5075_v56 }
 0x730   :  { %3494 = vmatprep.subr.bf16.mxu0 %v5075_v56 }
 0x801   :  { %v1101_v10 = vpop.f32.mrb[20].mxu0 }
 0x802   :  { %v3472_v11 = vpop.f32.mrb[21].mxu0  ;;  %v1102_v14 = vadd.f32 %v4317_v9, %v1101_v10 }
 0x803   :  { %v1104_v13 = vpop.f32.mrb[22].mxu0 }
 0x804   :  { %v1105_v21 = vadd.f32 %v4317_v9, %v1104_v13  ;;  %v3473_v24 = vpop.f32.mrb[23].mxu0 }
 0x806   :  { %v1108_v26 = vpack.c.bf16 %v1105_v21, %v1102_v14 }
 0x808   :  { %3479 = vmatmul.mubr.msk.bf16.vlgmr.msra.gmra.mrb[20].mxu1 %vm184_vm0, %v1108_v26 }
 0x809   :  { %3490 = vmatprep.mubr.msk.bf16.mxu1 %vm3893_vm2, %v5075_v56 }
 0x8db   :  { %v1152_v29 = vpop.f32.mrb[20].mxu1 }
 0x8dc   :  { %v1153_v30 = vadd.f32 %v4327_v28, %v1152_v29  ;;  %v3480_v31 = vpop.f32.mrb[21].mxu1 }
 0x8dd   :  { %v1155_v32 = vpop.f32.mrb[22].mxu1 }
 0x8de   :  { %v1156_v33 = vadd.f32 %v4327_v28, %v1155_v32  ;;  %v3481_v36 = vpop.f32.mrb[23].mxu1  ;;  %v1160_v40 = vsel %vm1159_vm15, %v1153_v30, -inf }
 0x8df   :  { %1161 = vmax.xlane.f32.xlu1 %v1160_v40 }
 0x8e0   :  { %v1164_v41 = vsel %vm1163_vm5, %v1156_v33, -inf }
 0x8e3   :  { %1165 = vmax.xlane.f32.xlu1 %v1164_v41  ;;  %v144_v41 = vld [vmem:[%s5056_s18] sm:$0xff] }
 0x96c   :  { %v1162_v47 = vpop.xlane.xlu1 %1161 }
 0x96d   :  { %v1167_v49 = vsub.f32 %v1153_v30, %v1162_v47  ;;  %v145_v47 = vld [vmem:[%s5056_s18 + $0x8] sm:$0xff] }
 0x96f   :  { %v1169_v50 = vmul.f32 1.442695, %v1167_v49 }
 0x970   :  { %v1166_v51 = vpop.xlane.xlu1 %1165 }
 0x971   :  { %3724 = vpow2.f32 %v1169_v50  ;;  %v1168_v52 = vsub.f32 %v1156_v33, %v1166_v51  ;;  %v4378_v50 = vpack.c.bf16 %v145_v47, %v144_v41  ;;  %v146_v51 = vld [vmem:[%s5056_s18 + $0x10] sm:$0xff] }
 0x973   :  { %v1171_v53 = vmul.f32 1.442695, %v1168_v52  ;;  %v147_v52 = vld [vmem:[%s5056_s18 + $0x18] sm:$0xff] }
 0x975   :  { %3726 = vpow2.f32 %v1171_v53  ;;  %v4388_v53 = vpack.c.bf16 %v147_v52, %v146_v51  ;;  %v308_v51 = vsel %vm301_vm1, %v4082_v35, -inf }
 0x97b   :  { %v3725_v54 = vpop.eup %3724 }
 0x97c   :  { %v1173_v55 = vsel %vm1159_vm15, %v3725_v54, 0.0 }
 0x97d   :  { %1174 = vadd.xlane.f32.xlu1 %v1173_v55 }
 0x97f   :  { %v3727_v57 = vpop.eup %3726 }
 0x980   :  { %v1176_v58 = vsel %vm1163_vm5, %v3727_v57, 0.0 }
 0x981   :  { %1177 = vadd.xlane.f32.xlu0 %v1176_v58 }
 0xa0a   :  { %v1175_v59 = vpop.xlane.xlu1 %1174 }
 0xa0b   :  { %3728 = vrcp.f32 %v1175_v59 }
 0xa0e   :  { %v1178_v1 = vpop.xlane.xlu0 %1177 }
 0xa0f   :  { %3730 = vrcp.f32 %v1178_v1 }
 0xa15   :  { %v3729_v46 = vpop.eup %3728 }
 0xa16   :  { %v4335_v4 = vmul.f32 %v3729_v46, %v3725_v54 }
 0xa19   :  { %v3731_v48 = vpop.eup %3730 }
 0xa1a   :  { %v4337_v6 = vmul.f32 %v3731_v48, %v3727_v57 }
 0xa1c   :  { %v1183_v10 = vpack.c.bf16 %v4337_v6, %v4335_v4 }
 0xa1e   :  { %1184 = vxpose.xlu1.c.b16.start.end [1/1] (short) (narrow) %v1183_v10, 16  ;;  %v1254_v11 = vsel %vm448_vm3, %v1183_v10, 0 }
 0xa1f   :  { %3489 = vmatpush3.bf16.msra.mxu1 %v1254_v11 }
 0xa20   :  { %3500 = vmatprep.subr.bf16.mxu1 %v5075_v56 }
 0xa22   :  { %3491 = vmatmul.mubr.msk.bf16.vlgmr.msra.gmra.mrb[24].mxu1 %vm301_vm1, %v4240_v23 }
 0xa23   :  { %3501 = vmatpush3.bf16.msra.mxu1 %v4151_v25  ;;  %3502 = vmatprep.mubr.msk.bf16.mxu1 %vm3893_vm2, %v5075_v56 }
 0xa24   :  { %3512 = vmatprep.subr.bf16.mxu1 %v5075_v56 }
 0xa2a   :  { %3503 = vmatmul.mubr.msk.bf16.vlgmr.msra.gmra.mrb[28].mxu1 %vm301_vm1, %v4240_v23 }
 0xa2b   :  { %3514 = vmatprep.mubr.msk.bf16.mxu1 %vm3893_vm2, %v5075_v56 }
 0xa84   :  { %v1192_v13 = vpop.trf.xlu1 }
 0xa85   :  { %3485 = vmatmul.mubr.msk.bf16.vlgmr.msra.gmra.mrb[24].mxu0 %vm301_vm1, %v1192_v13 }
 0xa86   :  { %3496 = vmatprep.mubr.msk.bf16.mxu0 %vm3893_vm2, %v5075_v56 }
 0xaf5   :  { %v1290_v14 = vpop.f32.mrb[24].mxu1 }
 0xaf6   :  { %v3492_v21 = vpop.f32.mrb[25].mxu1 }
 0xaf7   :  { %v1293_v24 = vpop.f32.mrb[26].mxu1 }
 0xaf8   :  { %v1297_v26 = vpack.c.bf16 %v1293_v24, %v1290_v14  ;;  %v3493_v29 = vpop.f32.mrb[27].mxu1  ;;  %v4403_v24 = vld [vmem:[%s5107_s9] sm:$0x3f] }
 0xafa   :  { %v1299_v30 = vsel %vm448_vm3, %v1297_v26, 0  ;;  %v5072_v26 = vsub.f32 1.0, %v4403_v24 }
 0xafb   :  { %3495 = vmatpush3.bf16.msra.mxu0 %v1299_v30 }
 0xafc   :  { %3506 = vmatprep.subr.bf16.mxu0 %v5075_v56 }
 0xafd   :  { %v4358_v23 = vpop.f32.mrb[28].mxu1 }
 0xafe   :  { %3497 = vmatmul.mubr.msk.bf16.vlgmr.msra.gmra.mrb[28].mxu0 %vm301_vm1, %v1192_v13  ;;  %v3504_v31 = vpop.f32.mrb[29].mxu1  ;;  %v1382_v33 = vsel %vm650_vm9, %v4358_v23, 0.0 }
 0xaff   :  { %v4361_v32 = vpop.f32.mrb[30].mxu1  ;;  %3507 = vmatpush3.bf16.msra.mxu0 %v1254_v11  ;;  %3508 = vmatprep.mubr.msk.bf16.mxu0 %vm3893_vm2, %v5075_v56 }
 0xb00   :  { %v1383_v36 = vsel %vm652_vm10, %v4361_v32, 0.0  ;;  %v3505_v40 = vpop.f32.mrb[31].mxu1  ;;  %3518 = vmatprep.subr.bf16.mxu0 %v5075_v56 }
 0xb01   :  { %v4376_v49 = vadd.f32 %v1383_v36, %v1382_v33 }
 0xb03   :  { %5106 = vst [vmem:[#allocation10_spill] sm:$0xff] %v4376_v49 }
 0xb06   :  { %3509 = vmatmul.mubr.msk.bf16.vlgmr.msra.gmra.mrb[32].mxu0 %vm301_vm1, %v1192_v13 }
 0xb07   :  { %3519 = vmatpush3.bf16.msra.mxu0 %v4378_v50  ;;  %3522 = vmatprep.mubr.msk.bf16.mxu0 %vm3893_vm2, %v5075_v56 }
 0xb08   :  { %3520 = vmatprep.subr.bf16.mxu0 %v5075_v56 }
 0xb0b   :  { %3521 = vmatpush3.bf16.msra.mxu0 %v4388_v53 }
 0xb0c   :  { %3534 = vmatprep.subr.bf16.mxu0 %v5075_v56 }
 0xb58   :  { %v1239_v54 = vpop.f32.mrb[24].mxu0 }
 0xb59   :  { %v1246_v55 = vmin.f32 %v1239_v54, 0.0  ;;  %v3486_v57 = vpop.f32.mrb[25].mxu0  ;;  %vm1245_vm6 = vcmp.gt.f32.partialorder %v1239_v54, 0.0 }
 0xb5a   :  { %v1242_v58 = vpop.f32.mrb[26].mxu0 }
 0xb5b   :  { %v1247_v59 = vmul.f32 1.442695, %v1246_v55  ;;  %v3487_v1 = vpop.f32.mrb[27].mxu0 }
 0xb5d   :  { %3732 = vpow2.f32 %v1247_v59 }
 0xb67   :  { %v3733_v46 = vpop.eup %3732 }
 0xb68   :  { %v3256_v48 = vadd.f32 -1.0, %v3733_v46 }
 0xb6a   :  { %v1250_v10 = vmul.f32 1.6732632, %v3256_v48 }
 0xb6c   :  { %v1251_v11 = vsel %vm1245_vm6, %v1239_v54, %v1250_v10  ;;  %vm1719_vm6 = vcmask 259072  }
 0xb6d   :  { %v1252_v13 = vmul.f32 1.050701, %v1251_v11 }
 0xb6f   :  { %v1578_v14 = vpack.c.bf16 %v1252_v13, %v1252_v13 }
 0xb71   :  { %3523 = vmatmul.mubr.msk.bf16.vlgmr.msra.gmra.mrb[36].mxu0 %vm184_vm0, %v1578_v14  ;;  %v1584_v21 = vsel %vm1582_vm7, %v1578_v14, 0 }
 0xb72   :  { %3513 = vmatpush3.bf16.msra.mxu1 %v1584_v21  ;;  %3538 = vmatprep.mubr.msk.bf16.mxu0 %vm3893_vm2, %v5075_v56 }
 0xb73   :  { %3526 = vmatprep.subr.bf16.mxu1 %v5075_v56 }
 0xbd1   :  { %v4406_v29 = vpop.f32.mrb[28].mxu0 }
 0xbd2   :  { %v1545_v30 = vmul.f32 %v5072_v26, %v4406_v29  ;;  %v3498_v31 = vpop.f32.mrb[29].mxu0 }
 0xbd3   :  { %v1338_v33 = vpop.f32.mrb[30].mxu0 }
 0xbd4   :  { %v3499_v36 = vpop.f32.mrb[31].mxu0  ;;  %v1546_v40 = vsel %vm1420_vm8, %v1545_v30, 0.0 }
 0xbd5   :  { %1547 = vadd.xlane.f32.xlu0 %v1546_v40  ;;  %v1557_v41 = vrot.slane %v1546_v40, 4 }
 0xbd7   :  { %v1558_v47 = vadd.f32 %v1557_v41, %v1546_v40 }
 0xbd9   :  { %v1559_v52 = vrot.slane %v1558_v47, 2  ;;  %309 = vmax.xlane.f32.xlu0 %v308_v51  ;;  %v4414_v54 = vpop.f32.mrb[32].mxu0 }
 0xbda   :  { %v3510_v55 = vpop.f32.mrb[33].mxu0 }
 0xbdb   :  { %v1560_v57 = vadd.f32 %v1559_v52, %v1558_v47  ;;  %v1472_v58 = vpop.f32.mrb[34].mxu0 }
 0xbdc   :  { %v3511_v59 = vpop.f32.mrb[35].mxu0 }
 0xbdd   :  { %v1561_v1 = vrot.slane %v1560_v57, 1 }
 0xbdf   :  { %v1562_v46 = vadd.f32 %v1561_v1, %v1560_v57 }
 0xbe1   :  { %3734 = vrsqrt.f32 %v1562_v46  ;;  %vm1565_vm11 = vcmp.eq.f32.partialorder %v1562_v46, inf  ;;  %v1568_v11 = vand.u32 2147483648, %v1562_v46  ;;  %vm1567_vm12 = vcmp.eq.f32.partialorder %v1562_v46, 0.0 }
 0xbeb   :  { %v3735_v48 = vpop.eup %3734 }
 0xbec   :  { %v1564_v10 = vmul.f32 %v3735_v48, %v1562_v46 }
 0xbee   :  { %v1566_v13 = vsel %vm1565_vm11, %v1562_v46, %v1564_v10 }
 0xbef   :  { %v1569_v14 = vsel %vm1567_vm12, %v1568_v11, %v1566_v13 }
 0xbf0   :  { %v1570_v21 = vadd.f32 1e-15, %v1569_v14 }
 0xbf2   :  { %3736 = vrcp.f32 %v1570_v21 }
 0xbfc   :  { %v3737_v31 = vpop.eup %3736 }
 0xbfd   :  { %v1572_v33 = vmul.f32 %v3737_v31, %v1545_v30  ;;  %v92_v31 = vld [vmem:[%s5100_s26 + $0x18] sm:$0xf] }
 0xc44   :  { %v4416_v36 = vpop.f32.mrb[36].mxu0 }
 0xc45   :  { %v3524_v40 = vpop.f32.mrb[37].mxu0 }
 0xc46   :  { %v1666_v41 = vpop.f32.mrb[38].mxu0  ;;  %v138_v40 = vld [vmem:[%s5054_s16 + $0x8] sm:$0xff] }
 0xc47   :  { %v3525_v47 = vpop.f32.mrb[39].mxu0 }
 0xc48   :  { %v139_v47 = vld [vmem:[%s5054_s16 + $0x10] sm:$0xff] }
 0xc62   :  { %v1548_v51 = vpop.xlane.xlu0 %1547 }
 0xc63   :  { %3738 = vrsqrt.f32 %v1548_v51  ;;  %vm1551_vm13 = vcmp.eq.f32.partialorder %v1548_v51, inf  ;;  %v1554_v1 = vand.u32 2147483648, %v1548_v51  ;;  %vm1553_vm14 = vcmp.eq.f32.partialorder %v1548_v51, 0.0 }
 0xc66   :  { %v310_v52 = vpop.xlane.xlu0 %309 }
 0xc67   :  { %v313_v55 = vsub.f32 %v4082_v35, %v310_v52  ;;  %v91_v35 = vld [vmem:[%s5100_s26 + $0x10] sm:$0xff] }
 0xc69   :  { %v318_v57 = vmul.f32 1.442695, %v313_v55 }
 0xc6b   :  { %3740 = vpow2.f32 %v318_v57 }
 0xc6d   :  { %v3739_v58 = vpop.eup %3738 }
 0xc6e   :  { %v1550_v59 = vmul.f32 %v3739_v58, %v1548_v51 }
 0xc70   :  { %v1552_v46 = vsel %vm1551_vm13, %v1548_v51, %v1550_v59  ;;  %v140_v51 = vld [vmem:[%s5054_s16 + $0x18] sm:$0xff] }
 0xc71   :  { %v1555_v48 = vsel %vm1553_vm14, %v1554_v1, %v1552_v46  ;;  %v4445_v52 = vpack.c.bf16 %v140_v51, %v139_v47  ;;  %v339_v46 = vcombine.high %v4117_v18, %v4117_v18 }
 0xc72   :  { %v1556_v30 = vadd.f32 1e-15, %v1555_v48 }
 0xc74   :  { %3742 = vrcp.f32 %v1556_v30 }
 0xc75   :  { %v3741_v10 = vpop.eup %3740 }
 0xc76   :  { %v326_v11 = vsel %vm301_vm1, %v3741_v10, 0.0 }
 0xc77   :  { %327 = vadd.xlane.f32.xlu0 %v326_v11 }
 0xc7e   :  { %v3743_v13 = vpop.eup %3742 }
 0xc7f   :  { %v1574_v14 = vmul.f32 %v3743_v13, %v1572_v33  ;;  %v137_v33 = vld [vmem:[%s5054_s16] sm:$0xff] }
 0xc80   :  { %v4435_v41 = vpack.c.bf16 %v138_v40, %v137_v33 }
 0xc81   :  { %v1577_v21 = vpack.c.bf16 %v1574_v14, %v1574_v14 }
 0xc83   :  { %3515 = vmatmul.mubr.msk.bf16.vlgmr.msra.gmra.mrb[32].mxu1 %vm1159_vm15, %v1577_v21 }
 0xc84   :  { %3530 = vmatprep.mubr.msk.bf16.mxu1 %vm3893_vm2, %v5075_v56  ;;  %3527 = vmatpush3.bf16.msra.mxu1 %v4435_v41 }
 0xc85   :  { %3528 = vmatprep.subr.bf16.mxu1 %v5075_v56 }
 0xc88   :  { %3529 = vmatpush3.bf16.msra.mxu1 %v4445_v52 }
 0xc89   :  { %3542 = vmatprep.subr.bf16.mxu1 %v5075_v56 }
 0xc8d   :  { %354 = vperm.xlu0 %3693, %v91_v35  }
 0xc91   :  { %358 = vperm.xlu0 %3693, %v92_v31  }
 0xd04   :  { %v328_v55 = vpop.xlane.xlu0 %327 }
 0xd05   :  { %3744 = vrcp.f32 %v328_v55  ;;  %v150_v55 = vld [vmem:[%s5057_s19] sm:$0xff] }
 0xd0c   :  { %v355_v57 = vpop.permute.xlu0 %354 }
 0xd0d   :  { %v387_v58 = vrot.slane %v355_v57, %v4106_v7  ;;  %v394_v48 = vrot.slane %v355_v57, %v4108_v5  ;;  %v151_v57 = vld [vmem:[%s5057_s19 + $0x8] sm:$0xff] }
 0xd0f   :  { %v3745_v59 = vpop.eup %3744  ;;  %v4454_v13 = vmul.f32 %v387_v58, %v339_v46  ;;  %v4488_v58 = vpack.c.bf16 %v151_v57, %v150_v55 }
 0xd10   :  { %v334_v1 = vmul.f32 %v3745_v59, %v3741_v10  ;;  %v359_v30 = vpop.permute.xlu0 %358  ;;  %v152_v59 = vld [vmem:[%s5057_s19 + $0x10] sm:$0xff] }
 0xd11   :  { %v401_v11 = vrot.slane %v359_v30, %v4106_v7  ;;  %5108 = vst [vmem:[#allocation11_spill] sm:$0xff] %v4454_v13  ;;  %3535 = vmatpush3.bf16.msra.mxu0 %v4488_v58  ;;  %v158_v30 = vld [vmem:[%s5059_s21 + $0x8] sm:$0xff] }
 0xd12   :  { %v4456_v14 = vmul.f32 %v394_v48, %v334_v1  ;;  %v340_v21 = vcombine.high %v334_v1, %v334_v1  ;;  %3536 = vmatprep.subr.bf16.mxu0 %v5075_v56  ;;  %v153_v1 = vld [vmem:[%s5057_s19 + $0x18] sm:$0xff]  ;;  %v157_v48 = vld [vmem:[%s5059_s21] sm:$0xff]  ;;  %s3208_s19 = sshll.u32 %s3897_s13, 4  ;;  %s5005_s19 = int_to_ptr.vmem [resolvable:$true] %s3208_s19 }
 0xd13   :  { %v4498_v46 = vpack.c.bf16 %v153_v1, %v152_v59 }
 0xd14   :  { %5109 = vst [vmem:[#allocation12_spill] sm:$0xff] %v4456_v14  ;;  %v4460_v35 = vcombine.low %v4454_v13, %v4456_v14  ;;  %v4462_v31 = vmul.f32 %v401_v11, %v340_v21  ;;  %v4508_v11 = vpack.c.bf16 %v158_v30, %v157_v48  ;;  %v3265_v21 = vld [vmem:[%s5055_s17] ss:$0 sm:$0xff] }
 0xd15   :  { %3537 = vmatpush3.bf16.msra.mxu0 %v4498_v46 }
 0xd16   :  { %425 = vst.msk [vmem:[%s5061_s23 + $0x10] sm:$0xff] %vm301_vm1, %v4460_v35  ;;  %v4476_v18 = vpack.c.bf16 %v4462_v31, %v4460_v35  ;;  %3550 = vmatprep.subr.bf16.mxu0 %v5075_v56 }
 0xd17   :  { %426 = vst.msk [vmem:[%s5061_s23 + $0x18] sm:$0xf] %vm423_vm4, %v4462_v31 }
 0xd18   :  { %1836 = vxpose.xlu0.c.b16.start.end [1/1] (short) (narrow) %v4476_v18, 16 }
 0xd56   :  { %v1620_v10 = vpop.f32.mrb[32].mxu1 }
 0xd57   :  { %v1626_v33 = vpack.c.bf16 %v1620_v10, %v1620_v10  ;;  %v3516_v40 = vpop.f32.mrb[33].mxu1 }
 0xd58   :  { %v1623_v47 = vpop.f32.mrb[34].mxu1 }
 0xd59   :  { %v3517_v51 = vpop.f32.mrb[35].mxu1  ;;  %3531 = vmatmul.mubr.msk.bf16.vlgmr.msra.gmra.mrb[36].mxu1 %vm184_vm0, %v1626_v33 }
 0xd5a   :  { %3546 = vmatprep.mubr.msk.bf16.mxu1 %vm3893_vm2, %v5075_v56  ;;  %3543 = vmatpush3.bf16.msra.mxu1 %v4508_v11 }
 0xd5b   :  { %3544 = vmatprep.subr.bf16.mxu1 %v5075_v56 }
 0xe2c   :  { %v1706_v10 = vpop.f32.mrb[36].mxu1 }
 0xe2d   :  { %v1707_v33 = vadd.f32 %v1706_v10, %v4416_v36  ;;  %v3532_v40 = vpop.f32.mrb[37].mxu1  ;;  %v159_v36 = vld [vmem:[%s5059_s21 + $0x10] sm:$0xff] }
 0xe2e   :  { %v1709_v47 = vpop.f32.mrb[38].mxu1  ;;  %v156_v40 = vld [vmem:[%s5058_s20] sm:$0x1] }
 0xe2f   :  { %v1718_v51 = vadd.f32 %v3265_v21, %v1707_v33  ;;  %v3533_v55 = vpop.f32.mrb[39].mxu1  ;;  %v160_v21 = vld [vmem:[%s5059_s21 + $0x18] sm:$0xff]  ;;  %v4537_v33 = vpop.trf.xlu0 }
 0xe30   :  { %v4526_v10 = vpack.c.bf16 %v160_v21, %v159_v36  ;;  %v3699_v36 = vld [vmem:[%s5101_s2 + $0x8] sm:$0x3f]  }
 0xe31   :  { %v1720_v57 = vsel %vm1719_vm6, %v1718_v51, 0.0 }
 0xe32   :  { %v1721_v59 = vrot.slane %v1720_v57, 4  ;;  %5111 = vst [vmem:[#allocation13_spill] sm:$0xff] %v4526_v10  ;;  %3545 = vmatpush3.bf16.msra.mxu1 %v4526_v10 }
 0xe33   :  { %3556 = vmatprep.subr.bf16.mxu1 %v5110_v45 }
 0xe34   :  { %v1722_v1 = vadd.f32 %v1721_v59, %v1720_v57 }
 0xe36   :  { %v1723_v48 = vrot.slane %v1722_v1, 2 }
 0xe38   :  { %v1724_v30 = vadd.f32 %v1723_v48, %v1722_v1 }
 0xe3a   :  { %v1725_v26 = vrot.slane %v1724_v30, 1 }
 0xe3c   :  { %v1726_v63 = vadd.f32 %v1725_v26, %v1724_v30  ;;  %v1924_v30 = vsel %vm448_vm3, %v4476_v18, 0 }
 0xe3e   :  { %v1728_v62 = vmul.f32 0.16666667, %v1726_v63 }
 0xe40   :  { %v1729_v56 = vpack.c.bf16 %v1728_v62, %v1728_v62  ;;  %v3837_v62 = vld [vmem:[%s5096_s28 + $0x18] sm:$0xf] }
 0xe42   :  { %3539 = vmatmul.mubr.msk.bf16.vlgmr.msra.gmra.mrb[40].mxu0 %vm184_vm0, %v1729_v56  ;;  %v3836_v56 = vld [vmem:[%s5096_s28 + $0x10] sm:$0xff] }
 0xe43   :  { %3552 = vmatprep.mubr.msk.bf16.mxu0 %vm3893_vm2, %v5110_v45  ;;  %v1835_v63 = vpack.c.bf16 %v3837_v62, %v3836_v56 }
 0xe45   :  { %v1856_v26 = vsel %vm448_vm3, %v1835_v63, 0 }
 0xe46   :  { %3551 = vmatpush3.bf16.msra.mxu0 %v1856_v26 }
 0xe47   :  { %3562 = vmatprep.subr.bf16.mxu0 %v5110_v45 }
 0xe4a   :  { %3553 = vmatmul.mubr.msk.bf16.vlgmr.msra.gmra.mrb[44].mxu0 %vm301_vm1, %v4537_v33 }
 0xe4b   :  { %3564 = vmatprep.mubr.msk.bf16.mxu0 %vm3893_vm2, %v5110_v45 }
 0xf15   :  { %v1767_v47 = vpop.f32.mrb[40].mxu0 }
 0xf16   :  { %v1768_v51 = vadd.f32 %v1767_v47, %v156_v40  ;;  %v3540_v55 = vpop.f32.mrb[41].mxu0 }
 0xf17   :  { %v1770_v57 = vpop.f32.mrb[42].mxu0 }
 0xf18   :  { %v1773_v59 = vmax.f32 %v1768_v51, 0.0  ;;  %v3541_v1 = vpop.f32.mrb[43].mxu0 }
 0xf1a   :  { %v1774_v48 = vpack.c.bf16 %v1773_v59, %v1773_v59 }
 0xf1c   :  { %3547 = vmatmul.mubr.msk.bf16.vlgmr.msra.gmra.mrb[40].mxu1 %vm184_vm0, %v1774_v48 }
 0xf1d   :  { %3557 = vmatpush3.bf16.msra.mxu1 %v1924_v30  ;;  %3558 = vmatprep.mubr.msk.bf16.mxu1 %vm3893_vm2, %v5110_v45  ;;  %v1892_v18 = vpop.f32.mrb[44].mxu0 }
 0xf1e   :  { %3568 = vmatprep.subr.bf16.mxu1 %v5110_v45  ;;  %v1901_v21 = vmin.f32 %v1892_v18, 0.0  ;;  %v3554_v56 = vpop.f32.mrb[45].mxu0  ;;  %vm1899_vm11 = vcmp.gt.f32.partialorder %v1892_v18, 0.0 }
 0xf1f   :  { %v1895_v62 = vpop.f32.mrb[46].mxu0 }
 0xf20   :  { %v1903_v63 = vmul.f32 1.442695, %v1901_v21  ;;  %v1902_v26 = vmin.f32 %v1895_v62, 0.0  ;;  %v3555_v40 = vpop.f32.mrb[47].mxu0  ;;  %vm1900_vm12 = vcmp.gt.f32.partialorder %v1895_v62, 0.0 }
 0xf22   :  { %3746 = vpow2.f32 %v1903_v63  ;;  %v1905_v47 = vmul.f32 1.442695, %v1902_v26 }
 0xf24   :  { %3559 = vmatmul.mubr.msk.bf16.vlgmr.msra.gmra.mrb[44].mxu1 %vm301_vm1, %v3699_v36  ;;  %3748 = vpow2.f32 %v1905_v47 }
 0xf25   :  { %3569 = vmatpush3.bf16.msra.mxu1 %v4151_v25  ;;  %3570 = vmatprep.mubr.msk.bf16.mxu1 %vm3893_vm2, %v5110_v45 }
 0xf26   :  { %3580 = vmatprep.subr.bf16.mxu1 %v5110_v45 }
 0xf2c   :  { %3571 = vmatmul.mubr.msk.bf16.vlgmr.msra.gmra.mrb[48].mxu1 %vm301_vm1, %v3699_v36  ;;  %v3747_v51 = vpop.eup %3746 }
 0xf2d   :  { %3582 = vmatprep.mubr.msk.bf16.mxu1 %vm3893_vm2, %v5110_v45  ;;  %v3269_v55 = vadd.f32 -1.0, %v3747_v51 }
 0xf2e   :  { %v3749_v57 = vpop.eup %3748 }
 0xf2f   :  { %v1909_v59 = vmul.f32 1.6732632, %v3269_v55  ;;  %v3270_v1 = vadd.f32 -1.0, %v3749_v57 }
 0xf31   :  { %v1911_v48 = vsel %vm1899_vm11, %v1892_v18, %v1909_v59  ;;  %v1910_v36 = vmul.f32 1.6732632, %v3270_v1 }
 0xf32   :  { %v1913_v49 = vmul.f32 1.050701, %v1911_v48 }
 0xf33   :  { %v1912_v3 = vsel %vm1900_vm12, %v1895_v62, %v1910_v36 }
 0xf34   :  { %v1914_v14 = vmul.f32 1.050701, %v1912_v3  ;;  %v5113_v3 = vsub.f32 1.0, %v4195_v60 }
 0xf36   :  { %v2307_v56 = vpack.c.bf16 %v1914_v14, %v1913_v49 }
 0xf38   :  { %v2312_v21 = vsel %vm448_vm3, %v2307_v56, 0 }
 0xf39   :  { %3581 = vmatpush3.bf16.msra.mxu1 %v2312_v21 }
 0xf3a   :  { %3594 = vmatprep.subr.bf16.mxu1 %v5110_v45 }
 0xfef   :  { %v4566_v63 = vpop.f32.mrb[40].mxu1 }
 0xff0   :  { %v3548_v26 = vpop.f32.mrb[41].mxu1 }
 0xff1   :  { %v1815_v40 = vpop.f32.mrb[42].mxu1 }
 0xff2   :  { %v3549_v47 = vpop.f32.mrb[43].mxu1 }
 0xff7   :  { %v1960_v51 = vpop.f32.mrb[44].mxu1 }
 0xff8   :  { %v3560_v55 = vpop.f32.mrb[45].mxu1 }
 0xff9   :  { %v1963_v57 = vpop.f32.mrb[46].mxu1 }
 0xffa   :  { %v1967_v13 = vpack.c.bf16 %v1963_v57, %v1960_v51  ;;  %v3561_v18 = vpop.f32.mrb[47].mxu1 }
 0xffc   :  { %v1969_v59 = vsel %vm448_vm3, %v1967_v13, 0 }
 0xffd   :  { %3563 = vmatpush3.bf16.msra.mxu0 %v1969_v59 }
 0xffe   :  { %3574 = vmatprep.subr.bf16.mxu0 %v5110_v45 }
0x1000   :  { %3565 = vmatmul.mubr.msk.bf16.vlgmr.msra.gmra.mrb[48].mxu0 %vm301_vm1, %v4537_v33 }
0x1001   :  { %3575 = vmatpush3.bf16.msra.mxu0 %v1924_v30  ;;  %3576 = vmatprep.mubr.msk.bf16.mxu0 %vm3893_vm2, %v5110_v45 }
0x1002   :  { %3586 = vmatprep.subr.bf16.mxu0 %v5110_v45 }
0x1008   :  { %3577 = vmatmul.mubr.msk.bf16.vlgmr.msra.gmra.mrb[52].mxu0 %vm301_vm1, %v4537_v33 }
0x1009   :  { %3587 = vmatpush3.bf16.msra.mxu0 %v4170_v34  ;;  %3590 = vmatprep.mubr.msk.bf16.mxu0 %vm3893_vm2, %v5110_v45 }
0x100a   :  { %3588 = vmatprep.subr.bf16.mxu0 %v5110_v45 }
0x100d   :  { %3589 = vmatpush3.bf16.msra.mxu0 %v4180_v38 }
0x100e   :  { %3602 = vmatprep.subr.bf16.mxu0 %v5110_v45 }
0x1010   :  { %3591 = vmatmul.mubr.msk.bf16.vlgmr.msra.gmra.mrb[56].mxu0 %vm184_vm0, %v2307_v56 }
0x1011   :  { %3603 = vmatpush3.bf16.msra.mxu0 %v4267_v37  ;;  %3606 = vmatprep.mubr.msk.bf16.mxu0 %vm3893_vm2, %v5110_v45  ;;  %v5114_v37 = vsub.f32 1.0, %v4200_v61 }
0x1012   :  { %3604 = vmatprep.subr.bf16.mxu0 %v5110_v45 }
0x1015   :  { %3605 = vmatpush3.bf16.msra.mxu0 %v4277_v43 }
0x1016   :  { %3618 = vmatprep.subr.bf16.mxu0 %v5110_v45 }
0x10d3   :  { %v4590_v34 = vpop.f32.mrb[48].mxu0 }
0x10d4   :  { %5112 = vst [vmem:[#allocation14_spill] sm:$0xff] %v4590_v34  ;;  %v2258_v38 = vmul.f32 %v4590_v34, %v5113_v3  ;;  %v3566_v49 = vpop.f32.mrb[49].mxu0 }
0x10d5   :  { %v4595_v13 = vpop.f32.mrb[50].mxu0 }
0x10d6   :  { %v2259_v14 = vmul.f32 %v4595_v13, %v5114_v37  ;;  %v3567_v33 = vpop.f32.mrb[51].mxu0  ;;  %v2260_v30 = vsel %vm301_vm1, %v2258_v38, 0.0 }
0x10d7   :  { %2261 = vadd.xlane.f32.xlu1 %v2260_v30 }
0x10d8   :  { %v2263_v43 = vsel %vm423_vm4, %v2259_v14, 0.0 }
0x10d9   :  { %v2282_v62 = vadd.f32 %v2263_v43, %v2260_v30 }
0x10db   :  { %2264 = vadd.xlane.f32.xlu1 %v2263_v43  ;;  %v2283_v1 = vrot.slane %v2282_v62, 4  ;;  %v4602_v48 = vpop.f32.mrb[52].mxu0  ;;  %v4606_v43 = vpop.f32.mrb[48].mxu1 }
0x10dc   :  { %v3578_v60 = vpop.f32.mrb[53].mxu0 }
0x10dd   :  { %v2284_v36 = vadd.f32 %v2283_v1, %v2282_v62  ;;  %v4604_v56 = vpop.f32.mrb[54].mxu0  ;;  %v2053_v1 = vsel %vm650_vm9, %v4606_v43, 0.0  ;;  %v3572_v60 = vpop.f32.mrb[49].mxu1 }
0x10de   :  { %v3579_v21 = vpop.f32.mrb[55].mxu0 }
0x10df   :  { %v2285_v26 = vrot.slane %v2284_v36, 2  ;;  %v4610_v21 = vpop.f32.mrb[50].mxu1 }
0x10e1   :  { %v2286_v61 = vadd.f32 %v2285_v26, %v2284_v36 }
0x10e3   :  { %v2287_v40 = vrot.slane %v2286_v61, 1  ;;  %v2392_v30 = vpop.f32.mrb[56].mxu0 }
0x10e4   :  { %v3592_v62 = vpop.f32.mrb[57].mxu0 }
0x10e5   :  { %v2288_v47 = vadd.f32 %v2287_v40, %v2286_v61  ;;  %v2395_v36 = vpop.f32.mrb[58].mxu0  ;;  %v2054_v61 = vsel %vm652_vm10, %v4610_v21, 0.0  ;;  %v3573_v40 = vpop.f32.mrb[51].mxu1 }
0x10e6   :  { %v3593_v26 = vpop.f32.mrb[59].mxu0 }
0x10e7   :  { %3750 = vrsqrt.f32 %v2288_v47  ;;  %vm2291_vm13 = vcmp.eq.f32.partialorder %v2288_v47, inf  ;;  %v2294_v57 = vand.u32 2147483648, %v2288_v47  ;;  %vm2293_vm14 = vcmp.eq.f32.partialorder %v2288_v47, 0.0 }
0x10f1   :  { %v3751_v51 = vpop.eup %3750 }
0x10f2   :  { %v2290_v55 = vmul.f32 %v3751_v51, %v2288_v47 }
0x10f4   :  { %v2292_v18 = vsel %vm2291_vm13, %v2288_v47, %v2290_v55  ;;  %v4614_v47 = vadd.f32 %v2054_v61, %v2053_v1 }
0x10f5   :  { %v2295_v59 = vsel %vm2293_vm14, %v2294_v57, %v2292_v18 }
0x10f6   :  { %v2296_v3 = vadd.f32 1e-15, %v2295_v59  ;;  %5115 = vst [vmem:[#allocation15_spill] sm:$0xff] %v4614_v47 }
0x10f8   :  { %3752 = vrcp.f32 %v2296_v3 }
0x1102   :  { %v3753_v49 = vpop.eup %3752 }
0x1103   :  { %v2298_v37 = vmul.f32 %v3753_v49, %v2258_v38  ;;  %v2299_v33 = vmul.f32 %v3753_v49, %v2259_v14 }
0x1164   :  { %v2262_v38 = vpop.xlane.xlu1 %2261 }
0x1165   :  { %3754 = vrsqrt.f32 %v2262_v38  ;;  %vm2268_vm11 = vcmp.eq.f32.partialorder %v2262_v38, inf  ;;  %v2271_v57 = vand.u32 2147483648, %v2262_v38  ;;  %vm2270_vm12 = vcmp.eq.f32.partialorder %v2262_v38, 0.0 }
0x1168   :  { %v2265_v14 = vpop.xlane.xlu1 %2264 }
0x1169   :  { %3756 = vrsqrt.f32 %v2265_v14  ;;  %vm2275_vm13 = vcmp.eq.f32.partialorder %v2265_v14, inf  ;;  %v2278_v60 = vand.u32 2147483648, %v2265_v14  ;;  %vm2277_vm14 = vcmp.eq.f32.partialorder %v2265_v14, 0.0 }
0x116f   :  { %v3755_v51 = vpop.eup %3754 }
0x1170   :  { %v2267_v55 = vmul.f32 %v3755_v51, %v2262_v38 }
0x1172   :  { %v2269_v18 = vsel %vm2268_vm11, %v2262_v38, %v2267_v55  ;;  %vm1818_vm11 = vcmask 40960  }
0x1173   :  { %v3757_v59 = vpop.eup %3756  ;;  %v2272_v3 = vsel %vm2270_vm12, %v2271_v57, %v2269_v18  ;;  %vm724_vm12 = vcmask 1043456  }
0x1174   :  { %v2280_v49 = vadd.f32 1e-15, %v2272_v3  ;;  %v2274_v62 = vmul.f32 %v3757_v59, %v2265_v14 }
0x1176   :  { %v2276_v26 = vsel %vm2275_vm13, %v2265_v14, %v2274_v62  ;;  %3758 = vrcp.f32 %v2280_v49 }
0x1177   :  { %v2279_v1 = vsel %vm2277_vm14, %v2278_v60, %v2276_v26 }
0x1178   :  { %v2281_v61 = vadd.f32 1e-15, %v2279_v1 }
0x117a   :  { %3760 = vrcp.f32 %v2281_v61 }
0x1180   :  { %v3759_v40 = vpop.eup %3758 }
0x1181   :  { %v2302_v34 = vmul.f32 %v3759_v40, %v2298_v37 }
0x1184   :  { %v3761_v47 = vpop.eup %3760 }
0x1185   :  { %v2303_v51 = vmul.f32 %v3761_v47, %v2299_v33 }
0x1187   :  { %v4616_v10 = vpack.c.bf16 %v2303_v51, %v2302_v34 }
0x1189   :  { %3583 = vmatmul.mubr.msk.bf16.vlgmr.msra.gmra.mrb[52].mxu1 %vm301_vm1, %v4616_v10 }
0x118a   :  { %3595 = vmatpush3.bf16.msra.mxu1 %v4238_v22  ;;  %3598 = vmatprep.mubr.msk.bf16.mxu1 %vm3893_vm2, %v5110_v45 }
0x118b   :  { %3596 = vmatprep.subr.bf16.mxu1 %v5110_v45 }
0x118e   :  { %3597 = vmatpush3.bf16.msra.mxu1 %v4254_v27 }
0x118f   :  { %3610 = vmatprep.subr.bf16.mxu1 %v5110_v45 }
0x125c   :  { %v2348_v38 = vpop.f32.mrb[52].mxu1 }
0x125d   :  { %v3584_v14 = vpop.f32.mrb[53].mxu1 }
0x125e   :  { %v2351_v37 = vpop.f32.mrb[54].mxu1 }
0x125f   :  { %v2355_v33 = vpack.c.bf16 %v2351_v37, %v2348_v38  ;;  %v3585_v34 = vpop.f32.mrb[55].mxu1 }
0x1261   :  { %3599 = vmatmul.mubr.msk.bf16.vlgmr.msra.gmra.mrb[56].mxu1 %vm184_vm0, %v2355_v33 }
0x1262   :  { %3611 = vmatpush3.bf16.msra.mxu1 %v4300_v2  ;;  %3614 = vmatprep.mubr.msk.bf16.mxu1 %vm3893_vm2, %v5110_v45 }
0x1263   :  { %3612 = vmatprep.subr.bf16.mxu1 %v5110_v45 }
0x1266   :  { %3613 = vmatpush3.bf16.msra.mxu1 %v4310_v8 }
0x1267   :  { %3624 = vmatprep.subr.bf16.mxu1 %v5110_v45 }
0x1334   :  { %v2436_v22 = vpop.f32.mrb[56].mxu1 }
0x1335   :  { %v2437_v27 = vadd.f32 %v2436_v22, %v2392_v30  ;;  %v3600_v47 = vpop.f32.mrb[57].mxu1 }
0x1336   :  { %v2439_v55 = vpop.f32.mrb[58].mxu1 }
0x1337   :  { %v2443_v57 = vadd.f32 %v4284_v44, %v2437_v27  ;;  %v2440_v18 = vadd.f32 %v2439_v55, %v2395_v36  ;;  %v3601_v59 = vpop.f32.mrb[59].mxu1 }
0x1339   :  { %v2444_v3 = vadd.f32 %v4284_v44, %v2440_v18  ;;  %v2445_v2 = vmax.f32 %v2443_v57, 0.0 }
0x133b   :  { %v2446_v49 = vmax.f32 %v2444_v3, 0.0 }
0x133d   :  { %v2447_v62 = vpack.c.bf16 %v2446_v49, %v2445_v2 }
0x133f   :  { %3607 = vmatmul.mubr.msk.bf16.vlgmr.msra.gmra.mrb[60].mxu0 %vm184_vm0, %v2447_v62  ;;  %v2579_v60 = vsel %vm448_vm3, %v2447_v62, 0 }
0x1340   :  { %3619 = vmatpush3.bf16.msra.mxu0 %v2579_v60  ;;  %3620 = vmatprep.mubr.msk.bf16.mxu0 %vm3893_vm2, %v5110_v45 }
0x1341   :  { %3630 = vmatprep.subr.bf16.mxu0 %v5110_v45 }
0x1412   :  { %v2485_v8 = vpop.f32.mrb[60].mxu0 }
0x1413   :  { %v3608_v30 = vpop.f32.mrb[61].mxu0  ;;  %v2486_v36 = vadd.f32 %v4317_v9, %v2485_v8 }
0x1414   :  { %v2488_v26 = vpop.f32.mrb[62].mxu0 }
0x1415   :  { %v2489_v44 = vadd.f32 %v4317_v9, %v2488_v26  ;;  %v3609_v1 = vpop.f32.mrb[63].mxu0 }
0x1416   :  { %v4664_v1 = vld [vmem:[%s5060_s22] sm:$0x1] }
0x1417   :  { %v2492_v61 = vpack.c.bf16 %v2489_v44, %v2486_v36 }
0x1419   :  { %3615 = vmatmul.mubr.msk.bf16.vlgmr.msra.gmra.mrb[60].mxu1 %vm184_vm0, %v2492_v61  ;;  %v4672_v61 = vadd.f32 %v4566_v63, %v4664_v1 }
0x141a   :  { %3626 = vmatprep.mubr.msk.bf16.mxu1 %vm3893_vm2, %v5110_v45 }
0x14ec   :  { %v2530_v40 = vpop.f32.mrb[60].mxu1 }
0x14ed   :  { %v2531_v51 = vadd.f32 %v4327_v28, %v2530_v40  ;;  %v3616_v38 = vpop.f32.mrb[61].mxu1  ;;  %v1819_v40 = vsel %vm1818_vm11, %v4672_v61, -inf }
0x14ee   :  { %v2533_v14 = vpop.f32.mrb[62].mxu1 }
0x14ef   :  { %v2534_v37 = vadd.f32 %v4327_v28, %v2533_v14  ;;  %v3617_v33 = vpop.f32.mrb[63].mxu1  ;;  %v2537_v34 = vsel %vm1159_vm15, %v2531_v51, -inf }
0x14f0   :  { %2538 = vmax.xlane.f32.xlu1 %v2537_v34 }
0x14f1   :  { %v2540_v9 = vsel %vm1163_vm5, %v2534_v37, -inf }
0x14f4   :  { %2541 = vmax.xlane.f32.xlu1 %v2540_v9 }
0x157d   :  { %v2539_v22 = vpop.xlane.xlu1 %2538 }
0x157e   :  { %v2543_v27 = vsub.f32 %v2531_v51, %v2539_v22 }
0x1580   :  { %v2545_v47 = vmul.f32 1.442695, %v2543_v27 }
0x1581   :  { %v2542_v55 = vpop.xlane.xlu1 %2541 }
0x1582   :  { %3762 = vpow2.f32 %v2545_v47  ;;  %v2544_v57 = vsub.f32 %v2534_v37, %v2542_v55 }
0x1584   :  { %v2547_v18 = vmul.f32 1.442695, %v2544_v57 }
0x1586   :  { %3764 = vpow2.f32 %v2547_v18 }
0x158c   :  { %v3763_v59 = vpop.eup %3762 }
0x158d   :  { %v2549_v3 = vsel %vm1159_vm15, %v3763_v59, 0.0 }
0x158e   :  { %2550 = vadd.xlane.f32.xlu0 %v2549_v3 }
0x1590   :  { %v3765_v28 = vpop.eup %3764 }
0x1591   :  { %v2552_v2 = vsel %vm1163_vm5, %v3765_v28, 0.0 }
0x1592   :  { %2553 = vadd.xlane.f32.xlu1 %v2552_v2 }
0x161b   :  { %v2551_v49 = vpop.xlane.xlu0 %2550 }
0x161c   :  { %3766 = vrcp.f32 %v2551_v49 }
0x161f   :  { %v2554_v62 = vpop.xlane.xlu1 %2553 }
0x1620   :  { %3768 = vrcp.f32 %v2554_v62 }
0x1626   :  { %v3767_v60 = vpop.eup %3766 }
0x1627   :  { %v4651_v30 = vmul.f32 %v3767_v60, %v3763_v59  ;;  %v5116_v60 = vsub.f32 1.0, %v4403_v24 }
0x162a   :  { %v3769_v8 = vpop.eup %3768 }
0x162b   :  { %v4653_v26 = vmul.f32 %v3769_v8, %v3765_v28 }
0x162d   :  { %v2559_v36 = vpack.c.bf16 %v4653_v26, %v4651_v30 }
0x162f   :  { %2560 = vxpose.xlu1.c.b16.start.end [1/1] (short) (narrow) %v2559_v36, 16  ;;  %v2630_v44 = vsel %vm448_vm3, %v2559_v36, 0 }
0x1630   :  { %3625 = vmatpush3.bf16.msra.mxu1 %v2630_v44 }
0x1631   :  { %3636 = vmatprep.subr.bf16.mxu1 %v5110_v45 }
0x1633   :  { %3627 = vmatmul.mubr.msk.bf16.vlgmr.msra.gmra.mrb[64].mxu1 %vm301_vm1, %v4616_v10 }
0x1634   :  { %3637 = vmatpush3.bf16.msra.mxu1 %v4151_v25  ;;  %3638 = vmatprep.mubr.msk.bf16.mxu1 %vm3893_vm2, %v5110_v45 }
0x1635   :  { %3648 = vmatprep.subr.bf16.mxu1 %v5110_v45 }
0x163b   :  { %3639 = vmatmul.mubr.msk.bf16.vlgmr.msra.gmra.mrb[68].mxu1 %vm301_vm1, %v4616_v10 }
0x163c   :  { %1820 = vmax.xlane.f32.xlu1 %v1819_v40  ;;  %3650 = vmatprep.mubr.msk.bf16.mxu1 %vm3893_vm2, %v5110_v45 }
0x164d   :  { %670 = vperm.xlu1 %3694, %v4224_v42  }
0x1651   :  { %2067 = vperm.xlu1 %3694, %v4606_v43  }
0x1655   :  { %1396 = vperm.xlu1 %3694, %v4358_v23  }
0x1659   :  { %1401 = vperm.xlu1 %3694, %v4361_v32  }
0x1695   :  { %v2568_v25 = vpop.trf.xlu1 }
0x1696   :  { %3621 = vmatmul.mubr.msk.bf16.vlgmr.msra.gmra.mrb[64].mxu0 %vm301_vm1, %v2568_v25 }
0x1697   :  { %3632 = vmatprep.mubr.msk.bf16.mxu0 %vm3893_vm2, %v5110_v45 }
0x1706   :  { %v2666_v10 = vpop.f32.mrb[64].mxu1 }
0x1707   :  { %v3628_v63 = vpop.f32.mrb[65].mxu1 }
0x1708   :  { %v2669_v51 = vpop.f32.mrb[66].mxu1 }
0x1709   :  { %v2673_v38 = vpack.c.bf16 %v2669_v51, %v2666_v10  ;;  %v3629_v14 = vpop.f32.mrb[67].mxu1 }
0x170b   :  { %v2675_v37 = vsel %vm448_vm3, %v2673_v38, 0 }
0x170c   :  { %3631 = vmatpush3.bf16.msra.mxu0 %v2675_v37 }
0x170d   :  { %3642 = vmatprep.subr.bf16.mxu0 %v5110_v45 }
0x170e   :  { %v4689_v42 = vpop.f32.mrb[68].mxu1 }
0x170f   :  { %3633 = vmatmul.mubr.msk.bf16.vlgmr.msra.gmra.mrb[68].mxu0 %vm301_vm1, %v2568_v25  ;;  %v3640_v23 = vpop.f32.mrb[69].mxu1  ;;  %v2758_v43 = vsel %vm650_vm9, %v4689_v42, 0.0 }
0x1710   :  { %v2754_v32 = vpop.f32.mrb[70].mxu1  ;;  %3643 = vmatpush3.bf16.msra.mxu0 %v2630_v44  ;;  %3644 = vmatprep.mubr.msk.bf16.mxu0 %vm3893_vm2, %v5110_v45 }
0x1711   :  { %v2759_v33 = vsel %vm652_vm10, %v2754_v32, 0.0  ;;  %2777 = vperm.xlu1 %3694, %v2754_v32   ;;  %v3641_v34 = vpop.f32.mrb[71].mxu1  ;;  %3654 = vmatprep.subr.bf16.mxu0 %v5110_v45  ;;  %v2179_v32 = vmul.f32 %v4604_v56, %v4604_v56 }
0x1712   :  { %v4698_v9 = vadd.f32 %v2759_v33, %v2758_v43 }
0x1717   :  { %3645 = vmatmul.mubr.msk.bf16.vlgmr.msra.gmra.mrb[72].mxu0 %vm301_vm1, %v2568_v25 }
0x1718   :  { %3655 = vmatpush3.bf16.msra.mxu0 %v4378_v50  ;;  %3658 = vmatprep.mubr.msk.bf16.mxu0 %vm3893_vm2, %v5110_v45 }
0x1719   :  { %3656 = vmatprep.subr.bf16.mxu0 %v5110_v45 }
0x171c   :  { %3657 = vmatpush3.bf16.msra.mxu0 %v4388_v53 }
0x171d   :  { %3670 = vmatprep.subr.bf16.mxu0 %v5110_v45 }
0x1769   :  { %v2615_v22 = vpop.f32.mrb[64].mxu0 }
0x176a   :  { %v2622_v27 = vmin.f32 %v2615_v22, 0.0  ;;  %v3622_v47 = vpop.f32.mrb[65].mxu0  ;;  %vm2621_vm9 = vcmp.gt.f32.partialorder %v2615_v22, 0.0 }
0x176b   :  { %v2618_v55 = vpop.f32.mrb[66].mxu0  ;;  %v2183_v47 = vsel %vm423_vm4, %v2179_v32, 0.0 }
0x176c   :  { %v2623_v57 = vmul.f32 1.442695, %v2622_v27  ;;  %v3623_v18 = vpop.f32.mrb[67].mxu0  ;;  %v2178_v27 = vmul.f32 %v4602_v48, %v4602_v48  ;;  %v1475_v55 = vmul.f32 %v4414_v54, %v4414_v54 }
0x176e   :  { %3770 = vpow2.f32 %v2623_v57  ;;  %v2180_v57 = vsel %vm301_vm1, %v2178_v27, 0.0  ;;  %v1476_v18 = vsel %vm1420_vm8, %v1475_v55, 0.0  ;;  %v4747_v55 = vpop.xlane.xlu1 %1820 }
0x1778   :  { %v3771_v59 = vpop.eup %3770 }
0x1779   :  { %v3283_v3 = vadd.f32 -1.0, %v3771_v59 }
0x177b   :  { %v2626_v50 = vmul.f32 1.6732632, %v3283_v3 }
0x177d   :  { %v2627_v28 = vsel %vm2621_vm9, %v2615_v22, %v2626_v50 }
0x177e   :  { %v2628_v2 = vmul.f32 1.050701, %v2627_v28 }
0x1780   :  { %v2951_v49 = vpack.c.bf16 %v2628_v2, %v2628_v2 }
0x1782   :  { %3659 = vmatmul.mubr.msk.bf16.vlgmr.msra.gmra.mrb[76].mxu0 %vm184_vm0, %v2951_v49  ;;  %v2956_v53 = vsel %vm1582_vm7, %v2951_v49, 0 }
0x1783   :  { %3649 = vmatpush3.bf16.msra.mxu1 %v2956_v53  ;;  %3671 = vmatpush3.bf16.msra.mxu0 %v4488_v58  ;;  %v779_v58 = vmul.f32 %v4218_v15, %v4218_v15 }
0x1784   :  { %3662 = vmatprep.subr.bf16.mxu1 %v5110_v45  ;;  %3672 = vmatprep.subr.bf16.mxu0 %v5110_v45 }
0x1785   :  { %3674 = vmatprep.mubr.msk.bf16.mxu0 %vm3893_vm2, %v5110_v45  ;;  %v783_v51 = vsel %vm423_vm4, %v779_v58, 0.0 }
0x1787   :  { %3673 = vmatpush3.bf16.msra.mxu0 %v4498_v46  ;;  %v778_v46 = vmul.f32 %v4216_v12, %v4216_v12 }
0x1789   :  { %v780_v33 = vsel %vm301_vm1, %v778_v46, 0.0 }
0x17e2   :  { %v4715_v62 = vpop.f32.mrb[68].mxu0 }
0x17e3   :  { %v2918_v8 = vmul.f32 %v4715_v62, %v5116_v60  ;;  %v3634_v36 = vpop.f32.mrb[69].mxu0 }
0x17e4   :  { %v2714_v44 = vpop.f32.mrb[70].mxu0 }
0x17e5   :  { %v3635_v40 = vpop.f32.mrb[71].mxu0  ;;  %v2919_v25 = vsel %vm1420_vm8, %v2918_v8, 0.0 }
0x17e6   :  { %2920 = vadd.xlane.f32.xlu0 %v2919_v25  ;;  %v2930_v10 = vrot.slane %v2919_v25, 4 }
0x17e8   :  { %v2931_v63 = vadd.f32 %v2930_v10, %v2919_v25 }
0x17ea   :  { %v2932_v38 = vrot.slane %v2931_v63, 2  ;;  %784 = vadd.xlane.f32.xlu0 %v783_v51  ;;  %v4726_v24 = vpop.f32.mrb[72].mxu0 }
0x17eb   :  { %v3646_v14 = vpop.f32.mrb[73].mxu0  ;;  %v2850_v36 = vmul.f32 %v4726_v24, %v4726_v24 }
0x17ec   :  { %v2933_v37 = vadd.f32 %v2932_v38, %v2931_v63  ;;  %v2847_v23 = vpop.f32.mrb[74].mxu0 }
0x17ed   :  { %v3647_v43 = vpop.f32.mrb[75].mxu0  ;;  %v2851_v44 = vsel %vm1420_vm8, %v2850_v36, 0.0  ;;  %v671_v36 = vpop.permute.xlu1 %670 }
0x17ee   :  { %v2934_v34 = vrot.slane %v2933_v37, 1  ;;  %781 = vadd.xlane.f32.xlu0 %v780_v33 }
0x17f0   :  { %v2935_v22 = vadd.f32 %v2934_v34, %v2933_v37 }
0x17f2   :  { %3772 = vrsqrt.f32 %v2935_v22  ;;  %2184 = vadd.xlane.f32.xlu0 %v2183_v47  ;;  %vm2938_vm10 = vcmp.eq.f32.partialorder %v2935_v22, inf  ;;  %v2941_v50 = vand.u32 2147483648, %v2935_v22  ;;  %vm2940_vm7 = vcmp.eq.f32.partialorder %v2935_v22, 0.0 }
0x17f6   :  { %2181 = vadd.xlane.f32.xlu0 %v2180_v57 }
0x17fa   :  { %1477 = vadd.xlane.f32.xlu0 %v1476_v18 }
0x17fc   :  { %v3773_v59 = vpop.eup %3772 }
0x17fd   :  { %v2937_v3 = vmul.f32 %v3773_v59, %v2935_v22 }
0x17ff   :  { %v2939_v28 = vsel %vm2938_vm10, %v2935_v22, %v2937_v3 }
0x1800   :  { %v2942_v2 = vsel %vm2940_vm7, %v2941_v50, %v2939_v28 }
0x1801   :  { %v2943_v49 = vadd.f32 1e-15, %v2942_v2 }
0x1803   :  { %3774 = vrcp.f32 %v2943_v49 }
0x180d   :  { %v3775_v53 = vpop.eup %3774 }
0x180e   :  { %v2945_v60 = vmul.f32 %v3775_v53, %v2918_v8 }
0x1810   :  { %666 = vperm.xlu0 %3693, %v4220_v39  }
0x182f   :  { %2852 = vadd.xlane.f32.xlu0 %v2851_v44 }
0x1845   :  { %2071 = vperm.xlu0 %3693, %v4610_v21  }
0x1855   :  { %v4743_v58 = vpop.f32.mrb[76].mxu0 }
0x1856   :  { %v3660_v40 = vpop.f32.mrb[77].mxu0 }
0x1857   :  { %v3038_v25 = vpop.f32.mrb[78].mxu0 }
0x1858   :  { %v3661_v10 = vpop.f32.mrb[79].mxu0 }
0x1859   :  { %v692_v10 = vrot.slane %v671_v36, %v4106_v7 }
0x1873   :  { %v2921_v63 = vpop.xlane.xlu0 %2920 }
0x1874   :  { %3776 = vrsqrt.f32 %v2921_v63  ;;  %vm2924_vm13 = vcmp.eq.f32.partialorder %v2921_v63, inf  ;;  %v2927_v32 = vand.u32 2147483648, %v2921_v63  ;;  %vm2926_vm14 = vcmp.eq.f32.partialorder %v2921_v63, 0.0 }
0x1877   :  { %v785_v46 = vpop.xlane.xlu0 %784 }
0x1878   :  { %v786_v8 = vsel %vm724_vm12, %v785_v46, 0.0 }
0x187b   :  { %v782_v39 = vpop.xlane.xlu0 %781 }
0x187c   :  { %v787_v51 = vadd.f32 %v786_v8, %v782_v39 }
0x187e   :  { %v3777_v38 = vpop.eup %3776  ;;  %v788_v14 = vrot.slane %v787_v51, 4 }
0x187f   :  { %v2923_v37 = vmul.f32 %v3777_v38, %v2921_v63  ;;  %v2185_v23 = vpop.xlane.xlu0 %2184 }
0x1880   :  { %v789_v21 = vadd.f32 %v788_v14, %v787_v51  ;;  %v2186_v27 = vsel %vm724_vm12, %v2185_v23, 0.0 }
0x1881   :  { %v2925_v43 = vsel %vm2924_vm13, %v2921_v63, %v2923_v37 }
0x1882   :  { %v2928_v33 = vsel %vm2926_vm14, %v2927_v32, %v2925_v43  ;;  %v790_v34 = vrot.slane %v789_v21, 2  ;;  %v698_v32 = vmul.f32 %v692_v10, %v4124_v20 }
0x1883   :  { %v2929_v22 = vadd.f32 1e-15, %v2928_v33  ;;  %v2182_v47 = vpop.xlane.xlu0 %2181 }
0x1884   :  { %v791_v57 = vadd.f32 %v790_v34, %v789_v21  ;;  %v2187_v18 = vadd.f32 %v2186_v27, %v2182_v47 }
0x1885   :  { %3778 = vrcp.f32 %v2929_v22 }
0x1886   :  { %v792_v59 = vrot.slane %v791_v57, 1  ;;  %v2188_v3 = vrot.slane %v2187_v18, 4 }
0x1887   :  { %v1478_v50 = vpop.xlane.xlu0 %1477 }
0x1888   :  { %v793_v28 = vadd.f32 %v792_v59, %v791_v57  ;;  %v2189_v2 = vadd.f32 %v2188_v3, %v2187_v18  ;;  %v1479_v49 = vsel %vm448_vm3, %v1478_v50, 0.0 }
0x1889   :  { %v1480_v53 = vrot.slane %v1479_v49, 4 }
0x188a   :  { %3780 = vrsqrt.f32 %v793_v28  ;;  %v2190_v44 = vrot.slane %v2189_v2, 2  ;;  %vm796_vm9 = vcmp.eq.f32.partialorder %v793_v28, inf  ;;  %vm798_vm10 = vcmp.eq.f32.partialorder %v793_v28, 0.0 }
0x188b   :  { %v1481_v40 = vadd.f32 %v1480_v53, %v1479_v49 }
0x188c   :  { %v2191_v25 = vadd.f32 %v2190_v44, %v2189_v2 }
0x188d   :  { %v1482_v63 = vrot.slane %v1481_v40, 2 }
0x188e   :  { %v2192_v46 = vrot.slane %v2191_v25, 1 }
0x188f   :  { %v3779_v8 = vpop.eup %3778  ;;  %v1483_v39 = vadd.f32 %v1482_v63, %v1481_v40  ;;  %v667_v51 = vpop.permute.xlu0 %666 }
0x1890   :  { %v2193_v38 = vadd.f32 %v2192_v46, %v2191_v25  ;;  %v678_v14 = vrot.slane %v667_v51, %v4106_v7  ;;  %v685_v37 = vrot.slane %v667_v51, %v4108_v5  ;;  %v2947_v23 = vmul.f32 %v3779_v8, %v2945_v60 }
0x1891   :  { %v1484_v21 = vrot.slane %v1483_v39, 1  ;;  %v704_v60 = vsel %vm423_vm4, %v698_v32, 0.0 }
0x1892   :  { %3782 = vrsqrt.f32 %v2193_v38  ;;  %v696_v43 = vmul.f32 %v678_v14, %v4113_v16  ;;  %v697_v33 = vmul.f32 %v685_v37, %v4115_v17  ;;  %v2950_v34 = vpack.c.bf16 %v2947_v23, %v2947_v23 }
0x1893   :  { %v1485_v22 = vadd.f32 %v1484_v21, %v1483_v39  ;;  %v799_v16 = vand.u32 2147483648, %v793_v28  ;;  %vm2196_vm7 = vcmp.eq.f32.partialorder %v2193_v38, inf  ;;  %v2199_v49 = vand.u32 2147483648, %v2193_v38 }
0x1894   :  { %v3781_v27 = vpop.eup %3780  ;;  %v701_v47 = vcombine.low %v696_v43, %v697_v33  ;;  %3651 = vmatmul.mubr.msk.bf16.vlgmr.msra.gmra.mrb[72].mxu1 %vm1159_vm15, %v2950_v34  ;;  %vm2198_vm13 = vcmp.eq.f32.partialorder %v2193_v38, 0.0  ;;  %v4785_v33 = vld [vmem:[%s5107_s9] sm:$0x3f] }
0x1895   :  { %3784 = vrsqrt.f32 %v1485_v22  ;;  %v795_v57 = vmul.f32 %v3781_v27, %v793_v28  ;;  %3663 = vmatpush3.bf16.msra.mxu1 %v4435_v41  ;;  %3666 = vmatprep.mubr.msk.bf16.mxu1 %vm3893_vm2, %v5110_v45  ;;  %vm1488_vm14 = vcmp.eq.f32.partialorder %v1485_v22, inf  ;;  %v1491_v10 = vand.u32 2147483648, %v1485_v22 }
0x1896   :  { %v703_v18 = vsel %vm301_vm1, %v701_v47, 0.0  ;;  %3664 = vmatprep.subr.bf16.mxu1 %v5110_v45 }
0x1897   :  { %v4763_v17 = vadd.f32 %v704_v60, %v703_v18  ;;  %v797_v59 = vsel %vm796_vm9, %v793_v28, %v795_v57  ;;  %vm1490_vm9 = vcmp.eq.f32.partialorder %v1485_v22, 0.0 }
0x1898   :  { %v800_v3 = vsel %vm798_vm10, %v799_v16, %v797_v59 }
0x1899   :  { %v801_v50 = vmax.f32 %v800_v3, 1e-15  ;;  %3665 = vmatpush3.bf16.msra.mxu1 %v4445_v52  ;;  %v4770_v52 = vld [vmem:[%s5102_s5 + $0x8] sm:$0xf] }
0x189a   :  { %3678 = vmatprep.subr.bf16.mxu1 %v5110_v45  ;;  %v806_v46 = vmul.f32 0.28867513, %v4770_v52 }
0x189b   :  { %3786 = vrcp.f32 %v801_v50 }
0x189c   :  { %v3783_v41 = vpop.eup %3782 }
0x189d   :  { %v2195_v2 = vmul.f32 %v3783_v41, %v2193_v38 }
0x189f   :  { %v3785_v53 = vpop.eup %3784  ;;  %v2197_v36 = vsel %vm2196_vm7, %v2193_v38, %v2195_v2 }
0x18a0   :  { %v2200_v44 = vsel %vm2198_vm13, %v2199_v49, %v2197_v36  ;;  %v1487_v40 = vmul.f32 %v3785_v53, %v1485_v22  ;;  %v4793_v49 = vpop.permute.xlu1 %2067 }
0x18a1   :  { %v2201_v25 = vmax.f32 %v2200_v44, 1e-15 }
0x18a2   :  { %v1489_v28 = vsel %vm1488_vm14, %v1485_v22, %v1487_v40 }
0x18a3   :  { %3788 = vrcp.f32 %v2201_v25  ;;  %v1492_v63 = vsel %vm1490_vm9, %v1491_v10, %v1489_v28  ;;  %v832_v25 = vsel %vm301_vm1, %v4121_v19, 0.0  ;;  %v833_v10 = vsel %vm423_vm4, %v4124_v20, 0.0 }
0x18a4   :  { %v1493_v8 = vmax.f32 %v1492_v63, 1e-15  ;;  %v1397_v40 = vpop.permute.xlu1 %1396  ;;  %v2230_v28 = vsel %vm301_vm1, %v4460_v35, 0.0  ;;  %v2231_v63 = vsel %vm423_vm4, %v4462_v31, 0.0 }
0x18a5   :  { %v3787_v39 = vpop.eup %3786  ;;  %v1404_v19 = vmul.f32 %v1397_v40, %v4335_v4 }
0x18a6   :  { %v804_v51 = vmul.f32 %v3787_v39, %v4218_v15  ;;  %v4775_v38 = vmul.f32 %v3787_v39, %v4216_v12  ;;  %3790 = vrcp.f32 %v1493_v8  ;;  %v1496_v12 = vmul.f32 0.4082483, %v4785_v33 }
0x18a7   :  { %v2232_v8 = vadd.f32 %v2231_v63, %v2230_v28 }
0x18a8   :  { %v808_v14 = vsub.f32 %v804_v51, %v806_v46  ;;  %v1402_v39 = vpop.permute.xlu1 %1401 }
0x18aa   :  { %v810_v37 = vmul.f32 %v808_v14, %v808_v14  ;;  %v2233_v14 = vrot.slane %v2232_v8, 4 }
0x18ac   :  { %v814_v23 = vsel %vm423_vm4, %v810_v37, 0.0 }
0x18ad   :  { %v3789_v32 = vpop.eup %3788  ;;  %815 = vadd.xlane.f32.xlu1 %v814_v23  ;;  %v1405_v23 = vmul.f32 %v1402_v39, %v4337_v6 }
0x18ae   :  { %v2204_v21 = vmul.f32 %v3789_v32, %v4604_v56  ;;  %v4780_v43 = vmul.f32 %v3789_v32, %v4602_v48 }
0x18af   :  { %v1407_v35 = vsel %vm1163_vm5, %v1405_v23, 0.0 }
0x18b0   :  { %v3791_v15 = vpop.eup %3790  ;;  %v2206_v34 = vsub.f32 %v2204_v21, %v806_v46  ;;  %v834_v46 = vadd.f32 %v833_v10, %v832_v25 }
0x18b1   :  { %v1495_v22 = vmul.f32 %v3791_v15, %v4414_v54  ;;  %v2234_v15 = vadd.f32 %v2233_v14, %v2232_v8  ;;  %v2795_v14 = vmul.f32 %v4785_v33, %v4715_v62 }
0x18b2   :  { %v2208_v27 = vmul.f32 %v2206_v34, %v2206_v34  ;;  %v835_v51 = vrot.slane %v834_v46, 4  ;;  %v2891_v34 = vsel %vm1163_vm5, %v4653_v26, 0.0 }
0x18b3   :  { %v4789_v47 = vsub.f32 %v1495_v22, %v1496_v12 }
0x18b4   :  { %v2212_v57 = vsel %vm423_vm4, %v2208_v27, 0.0  ;;  %v836_v21 = vadd.f32 %v835_v51, %v834_v46  ;;  %v4812_v27 = vld [vmem:[%s5102_s5] sm:$0xff] }
0x18b5   :  { %2213 = vadd.xlane.f32.xlu1 %v2212_v57  ;;  %v716_v57 = vmul.f32 %v4812_v27, %v4204_v0 }
0x18bc   :  { %v2853_v56 = vpop.xlane.xlu0 %2852 }
0x18bd   :  { %v2854_v48 = vsel %vm448_vm3, %v2853_v56, 0.0  ;;  %v837_v56 = vrot.slane %v836_v21, 2 }
0x18be   :  { %v2855_v60 = vrot.slane %v2854_v48, 4 }
0x18c0   :  { %v2856_v18 = vadd.f32 %v2855_v60, %v2854_v48 }
0x18c2   :  { %v2857_v16 = vrot.slane %v2856_v18, 2 }
0x18c4   :  { %v2858_v59 = vadd.f32 %v2857_v16, %v2856_v18  ;;  %v2235_v18 = vrot.slane %v2234_v15, 2 }
0x18c6   :  { %v2859_v3 = vrot.slane %v2858_v59, 1  ;;  %v2236_v0 = vadd.f32 %v2235_v18, %v2234_v15 }
0x18c8   :  { %v2860_v50 = vadd.f32 %v2859_v3, %v2858_v59  ;;  %v1419_v59 = vmul.f32 %v4785_v33, %v4406_v29  ;;  %v838_v3 = vadd.f32 %v837_v56, %v836_v21  ;;  %v2237_v40 = vrot.slane %v2236_v0, 1  ;;  %v5117_v56 = vld [vmem:[#allocation13_spill] sm:$0xff] }
0x18ca   :  { %3792 = vrsqrt.f32 %v2860_v50  ;;  %vm2863_vm10 = vcmp.eq.f32.partialorder %v2860_v50, inf  ;;  %v2866_v54 = vand.u32 2147483648, %v2860_v50  ;;  %vm2865_vm7 = vcmp.eq.f32.partialorder %v2860_v50, 0.0 }
0x18cb   :  { %v4829_v28 = vadd.f32 %v2237_v40, %v2236_v0 }
0x18cd   :  { %v2239_v39 = vmul.f32 %v4829_v28, %v4829_v28 }
0x18d4   :  { %v3793_v41 = vpop.eup %3792 }
0x18d5   :  { %v2862_v2 = vmul.f32 %v3793_v41, %v2860_v50  ;;  %v718_v41 = vsel %vm301_vm1, %v716_v57, 0.0 }
0x18d7   :  { %v2864_v53 = vsel %vm2863_vm10, %v2860_v50, %v2862_v2 }
0x18d8   :  { %v2867_v36 = vsel %vm2865_vm7, %v2866_v54, %v2864_v53  ;;  %v1421_v54 = vsel %vm1420_vm8, %v1419_v59, 0.0  ;;  %v839_v53 = vrot.slane %v838_v3, 1 }
0x18d9   :  { %v2868_v44 = vmax.f32 %v2867_v36, 1e-15  ;;  %v2118_v36 = vmul.f32 %v4770_v52, %v4595_v13 }
0x18da   :  { %v4826_v10 = vadd.f32 %v839_v53, %v838_v3 }
0x18db   :  { %3794 = vrcp.f32 %v2868_v44  ;;  %v2122_v29 = vsel %vm423_vm4, %v2118_v36, 0.0 }
0x18dc   :  { %v852_v8 = vsel %vm301_vm1, %v4826_v10, 0.0 }
0x18e5   :  { %v3795_v37 = vpop.eup %3794 }
0x18e6   :  { %v2870_v32 = vmul.f32 %v3795_v37, %v4726_v24  ;;  %v1406_v24 = vsel %vm1159_vm15, %v1404_v19, 0.0  ;;  %v2240_v37 = vsel %vm301_vm1, %v2239_v39, 0.0  ;;  %v2796_v19 = vsel %vm1420_vm8, %v2795_v14, 0.0 }
0x18e7   :  { %v1408_v48 = vadd.f32 %v1407_v35, %v1406_v24 }
0x18e8   :  { %v2871_v20 = vsub.f32 %v2870_v32, %v1496_v12  ;;  %v2890_v12 = vsel %vm1159_vm15, %v4651_v30, 0.0 }
0x18e9   :  { %v2892_v16 = vadd.f32 %v2891_v34, %v2890_v12  ;;  %v1409_v50 = vrot.slane %v1408_v48, 4 }
0x18ea   :  { %v2872_v22 = vmul.f32 %v2871_v20, %v2871_v20 }
0x18eb   :  { %v2893_v2 = vrot.slane %v2892_v16, 4  ;;  %v1410_v44 = vadd.f32 %v1409_v50, %v1408_v48 }
0x18ec   :  { %v2873_v60 = vsel %vm1420_vm8, %v2872_v22, 0.0 }
0x18ed   :  { %2874 = vadd.xlane.f32.xlu1 %v2873_v60  ;;  %v2894_v25 = vadd.f32 %v2893_v2, %v2892_v16  ;;  %v1411_v46 = vrot.slane %v1410_v44, 2  ;;  %v3841_v16 = vld [vmem:[%s5055_s17] ss:$0 sm:$0xff]  ;;  %s3896_s17 = smov [#allocation4]  }
0x18ef   :  { %v2895_v63 = vrot.slane %v2894_v25, 2  ;;  %v1412_v51 = vadd.f32 %v1411_v46, %v1410_v44  ;;  %v3842_v44 = vld [vmem:[%s5058_s20] sm:$0x1]  ;;  %s3218_s20 = sshll.u32 %s3896_s17, 4  ;;  %s3219_s20 = int_to_ptr.vmem [resolvable:$true] %s3218_s20 }
0x18f0   :  { %s3843_s15 = scalar_lea.vmem %s3219_s20, 16  ;;  %s3847_s1 = scalar_lea.vmem %s3219_s20, 32 }
0x18f1   :  { %719 = vadd.xlane.f32.xlu1 %v718_v41  ;;  %v2896_v13 = vadd.f32 %v2895_v63, %v2894_v25  ;;  %v1413_v32 = vrot.slane %v1412_v51, 1  ;;  %p3844_p0 = scmp.ne.s32.totalorder %s3219_s20, %s3843_s15  ;;  %p3848_p1 = scmp.lt.s32.totalorder %s3219_s20, %s3219_s20 }
0x18f2   :  { %p3849_p2 = scmp.lt.s32.totalorder %s3847_s1, %s3843_s15 }
0x18f3   :  { %v2897_v23 = vrot.slane %v2896_v13, 1  ;;  %v1414_v20 = vadd.f32 %v1413_v32, %v1412_v51  ;;  %v1517_v32 = vsel %vm1163_vm5, %v4337_v6, 0.0 }
0x18f4   :  { %p3850_p3 = por %p3849_p2, %p3848_p1 }
0x18f5   :  { %1422 = vadd.xlane.f32.xlu1 %v1421_v54  ;;  %v4839_v21 = vadd.f32 %v2897_v23, %v2896_v13  ;;  %v1415_v35 = vmul.f32 %v1414_v20, %v1414_v20  ;;  %v805_v20 = vmul.f32 0.28867513, %v4812_v27 }
0x18f6   :  { %p3851_p4 = pnand %p3850_p3, %p3844_p0 }
0x18f7   :  { %v2910_v15 = vsel %vm1159_vm15, %v4839_v21, 0.0  ;;  %v1416_v34 = vsel %vm1159_vm15, %v1415_v35, 0.0 }
0x18f9   :  { %2123 = vadd.xlane.f32.xlu1 %v2122_v29 }
0x18fd   :  { %853 = vadd.xlane.f32.xlu1 %v852_v8 }
0x1901   :  { %2241 = vadd.xlane.f32.xlu1 %v2240_v37 }
0x1905   :  { %2797 = vadd.xlane.f32.xlu1 %v2796_v19  ;;  %v1516_v19 = vsel %vm1159_vm15, %v4335_v4, 0.0  ;;  %v1498_v4 = vmul.f32 %v4789_v47, %v4789_v47 }
0x1909   :  { %2911 = vadd.xlane.f32.xlu1 %v2910_v15  ;;  %v1518_v15 = vadd.f32 %v1517_v32, %v1516_v19 }
0x190b   :  { %v1519_v35 = vrot.slane %v1518_v15, 4 }
0x190d   :  { %1417 = vadd.xlane.f32.xlu1 %v1416_v34 }
0x1967   :  { %v2992_v62 = vpop.f32.mrb[72].mxu1 }
0x1968   :  { %v2998_v33 = vpack.c.bf16 %v2992_v62, %v2992_v62  ;;  %v3652_v22 = vpop.f32.mrb[73].mxu1  ;;  %v1520_v62 = vadd.f32 %v1519_v35, %v1518_v15 }
0x1969   :  { %v2995_v57 = vpop.f32.mrb[74].mxu1  ;;  %v2079_v22 = vrot.slane %v4793_v49, %v4106_v7 }
0x196a   :  { %v3653_v24 = vpop.f32.mrb[75].mxu1  ;;  %3667 = vmatmul.mubr.msk.bf16.vlgmr.msra.gmra.mrb[76].mxu1 %vm184_vm0, %v2998_v33  ;;  %v2072_v33 = vpop.permute.xlu0 %2071  ;;  %v2205_v57 = vsub.f32 %v4780_v43, %v805_v20 }
0x196b   :  { %3679 = vmatpush3.bf16.msra.mxu1 %v4508_v11  ;;  %3682 = vmatprep.mubr.msk.bf16.mxu1 %vm3893_vm2, %v5110_v45  ;;  %v1521_v24 = vrot.slane %v1520_v62, 2 }
0x196c   :  { %3680 = vmatprep.subr.bf16.mxu1 %v5110_v45 }
0x196f   :  { %3681 = vmatpush3.bf16.msra.mxu1 %v5117_v56  ;;  %v5118_v56 = vld [vmem:[#allocation11_spill] sm:$0xff] }
0x1a3d   :  { %v3078_v12 = vpop.f32.mrb[76].mxu1 }
0x1a3e   :  { %v3079_v48 = vadd.f32 %v3078_v12, %v4743_v58  ;;  %v3668_v60 = vpop.f32.mrb[77].mxu1  ;;  %v2097_v12 = vmul.f32 %v2079_v22, %v5118_v56 }
0x1a3f   :  { %v3081_v18 = vpop.f32.mrb[78].mxu1 }
0x1a40   :  { %v3084_v59 = vadd.f32 %v3841_v16, %v3079_v48  ;;  %v3669_v3 = vpop.f32.mrb[79].mxu1  ;;  %v5119_v48 = vld [vmem:[#allocation12_spill] sm:$0xff]  ;;  %v1499_v18 = vsel %vm1420_vm8, %v1498_v4, 0.0  ;;  %v2207_v16 = vmul.f32 %v2205_v57, %v2205_v57 }
0x1a41   :  { %v5120_v3 = vld [vmem:[#allocation8_spill] sm:$0xff] }
0x1a42   :  { %v3085_v11 = vsel %vm1719_vm6, %v3084_v59, 0.0  ;;  %v1522_v59 = vadd.f32 %v1521_v24, %v1520_v62  ;;  %v717_v47 = vmul.f32 %v4770_v52, %v5120_v3  ;;  %v2209_v43 = vsel %vm301_vm1, %v2207_v16, 0.0  ;;  %v5122_v3 = vld [vmem:[#allocation10_spill] sm:$0xff] }
0x1a43   :  { %v3086_v50 = vrot.slane %v3085_v11, 4 }
0x1a45   :  { %v3087_v41 = vadd.f32 %v3086_v50, %v3085_v11  ;;  %v1523_v11 = vrot.slane %v1522_v59, 1 }
0x1a47   :  { %v3088_v0 = vrot.slane %v3087_v41, 2 }
0x1a49   :  { %v3089_v2 = vadd.f32 %v3088_v0, %v3087_v41  ;;  %v841_v41 = vmul.f32 %v4826_v10, %v4826_v10 }
0x1a4b   :  { %v3090_v45 = vrot.slane %v3089_v2, 1  ;;  %v842_v52 = vsel %vm301_vm1, %v841_v41, 0.0 }
0x1a4d   :  { %v3091_v54 = vadd.f32 %v3090_v45, %v3089_v2  ;;  %v721_v2 = vsel %vm423_vm4, %v717_v47, 0.0  ;;  %v706_v45 = vrot.slane %v4763_v17, 4  ;;  %v1385_v47 = vrot.slane %v5122_v3, 4 }
0x1a4f   :  { %v3092_v53 = vmul.f32 0.16666667, %v3091_v54 }
0x1a51   :  { %v3093_v36 = vpack.c.bf16 %v3092_v53, %v3092_v53 }
0x1a53   :  { %3675 = vmatmul.mubr.msk.bf16.vlgmr.msra.gmra.mrb[80].mxu0 %vm184_vm0, %v3093_v36  ;;  %v707_v36 = vadd.f32 %v706_v45, %v4763_v17 }
0x1a55   :  { %v708_v10 = vrot.slane %v707_v36, 2 }
0x1b26   :  { %v3131_v58 = vpop.f32.mrb[80].mxu0 }
0x1b27   :  { %v3132_v40 = vadd.f32 %v3842_v44, %v3131_v58  ;;  %v3676_v25 = vpop.f32.mrb[81].mxu0  ;;  %v5121_v58 = vld [vmem:[#allocation14_spill] sm:$0xff] }
0x1b28   :  { %v3134_v29 = vpop.f32.mrb[82].mxu0  ;;  %v2117_v44 = vmul.f32 %v4812_v27, %v5121_v58 }
0x1b29   :  { %v3137_v63 = vmax.f32 %v3132_v40, 0.0  ;;  %v3677_v46 = vpop.f32.mrb[83].mxu0 }
0x1b2a   :  { %v2119_v29 = vsel %vm301_vm1, %v2117_v44, 0.0 }
0x1b2b   :  { %v3138_v8 = vpack.c.bf16 %v3137_v63, %v3137_v63  ;;  %v709_v63 = vadd.f32 %v708_v10, %v707_v36 }
0x1b2d   :  { %3683 = vmatmul.mubr.msk.bf16.vlgmr.msra.gmra.mrb[80].mxu1 %vm184_vm0, %v3138_v8  ;;  %v4902_v8 = vsub.f32 %v4672_v61, %v4747_v55 }
0x1b2f   :  { %v1823_v27 = vmul.f32 1.442695, %v4902_v8 }
0x1b31   :  { %3796 = vpow2.f32 %v1823_v27 }
0x1b3b   :  { %v3797_v35 = vpop.eup %3796 }
0x1c00   :  { %v3176_v39 = vpop.f32.mrb[80].mxu1 }
0x1c01   :  { %v4861_v13 = vadd.f32 %v3176_v39, %v4664_v1  ;;  %v3684_v51 = vpop.f32.mrb[81].mxu1  ;;  %v807_v1 = vsub.f32 %v4775_v38, %v805_v20  ;;  %v2093_v38 = vrot.slane %v2072_v33, %v4106_v7  ;;  %v710_v39 = vrot.slane %v709_v63, 1 }
0x1c02   :  { %v3179_v14 = vpop.f32.mrb[82].mxu1 }
0x1c03   :  { %v3685_v37 = vpop.f32.mrb[83].mxu1  ;;  %v3182_v23 = vsel %vm1818_vm11, %v4861_v13, -inf  ;;  %v809_v34 = vmul.f32 %v807_v1, %v807_v1  ;;  %v2250_v14 = vsel %vm301_vm1, %v4829_v28, 0.0  ;;  %v1825_v28 = vsel %vm1818_vm11, %v3797_v35, 0.0 }
0x1c04   :  { %3183 = vmax.xlane.f32.xlu0 %v3182_v23  ;;  %v2899_v37 = vmul.f32 %v4839_v21, %v4839_v21  ;;  %v711_v23 = vadd.f32 %v710_v39, %v709_v63  ;;  %v2778_v21 = vpop.permute.xlu1 %2777  ;;  %v5124_v63 = vld [vmem:[#allocation15_spill] sm:$0xff] }
0x1c05   :  { %v811_v6 = vsel %vm301_vm1, %v809_v34, 0.0  ;;  %v2781_v62 = vmul.f32 %v2778_v21, %v4653_v26 }
0x1c06   :  { %v2900_v61 = vsel %vm1159_vm15, %v2899_v37, 0.0  ;;  %v712_v55 = vmul.f32 %v711_v23, %v711_v23 }
0x1c08   :  { %v713_v20 = vsel %vm301_vm1, %v712_v55, 0.0  ;;  %v816_v24 = vpop.xlane.xlu1 %815 }
0x1c09   :  { %v817_v58 = vsel %vm724_vm12, %v816_v24, 0.0 }
0x1c1a   :  { %2772 = vperm.xlu0 %3693, %v4689_v42   ;;  %v2086_v42 = vrot.slane %v4793_v49, %v4108_v5  ;;  %v2099_v5 = vmul.f32 %v2093_v38, %v4462_v31  ;;  %v1524_v31 = vadd.f32 %v1523_v11, %v1522_v59 }
0x1c1c   :  { %v2098_v60 = vmul.f32 %v2086_v42, %v5119_v48  ;;  %v2105_v7 = vsel %vm423_vm4, %v2099_v5, 0.0  ;;  %v1525_v53 = vmul.f32 %v1524_v31, %v1524_v31  ;;  %v1536_v17 = vsel %vm1159_vm15, %v1524_v31, 0.0  ;;  %v2214_v48 = vpop.xlane.xlu1 %2213 }
0x1c1d   :  { %v2783_v42 = vsel %vm1163_vm5, %v2781_v62, 0.0 }
0x1c1e   :  { %v2102_v49 = vcombine.low %v2097_v12, %v2098_v60  ;;  %v1526_v40 = vsel %vm1159_vm15, %v1525_v53, 0.0 }
0x1c20   :  { %v2104_v50 = vsel %vm301_vm1, %v2102_v49, 0.0 }
0x1c21   :  { %v2106_v0 = vadd.f32 %v2105_v7, %v2104_v50  ;;  %v1386_v7 = vadd.f32 %v1385_v47, %v5122_v3 }
0x1c23   :  { %v2107_v54 = vrot.slane %v2106_v0, 4  ;;  %v1387_v41 = vrot.slane %v1386_v7, 2 }
0x1c25   :  { %v2108_v25 = vadd.f32 %v2107_v54, %v2106_v0  ;;  %v1388_v0 = vadd.f32 %v1387_v41, %v1386_v7 }
0x1c27   :  { %v2109_v46 = vrot.slane %v2108_v25, 2  ;;  %v1389_v31 = vrot.slane %v1388_v0, 1 }
0x1c29   :  { %v2110_v51 = vadd.f32 %v2109_v46, %v2108_v25  ;;  %v1390_v36 = vadd.f32 %v1389_v31, %v1388_v0  ;;  %v2056_v46 = vrot.slane %v5124_v63, 4 }
0x1c2b   :  { %v2111_v32 = vrot.slane %v2110_v51, 1 }
0x1c2d   :  { %v2112_v19 = vadd.f32 %v2111_v32, %v2110_v51  ;;  %v2057_v32 = vadd.f32 %v2056_v46, %v5124_v63 }
0x1c2f   :  { %v2113_v15 = vmul.f32 %v2112_v19, %v2112_v19  ;;  %v2058_v62 = vrot.slane %v2057_v32, 2 }
0x1c31   :  { %v2114_v1 = vsel %vm301_vm1, %v2113_v15, 0.0 }
0x1c39   :  { %812 = vadd.xlane.f32.xlu0 %v811_v6 }
0x1c3d   :  { %1500 = vadd.xlane.f32.xlu0 %v1499_v18  ;;  %v4922_v18 = vpop.xlane.xlu1 %2874 }
0x1c41   :  { %2210 = vadd.xlane.f32.xlu0 %v2209_v43  ;;  %v720_v5 = vpop.xlane.xlu1 %719 }
0x1c45   :  { %722 = vadd.xlane.f32.xlu0 %v721_v2  ;;  %v1423_v11 = vpop.xlane.xlu1 %1422 }
0x1c46   :  { %v1424_v45 = vsel %vm448_vm3, %v1423_v11, 0.0 }
0x1c49   :  { %843 = vadd.xlane.f32.xlu0 %v842_v52  ;;  %v4928_v50 = vpop.xlane.xlu1 %2123  ;;  %v5123_v52 = vld [vmem:[#allocation9_spill] sm:$0xff] }
0x1c4a   :  { %v655_v53 = vrot.slane %v5123_v52, 4 }
0x1c4c   :  { %v656_v25 = vadd.f32 %v655_v53, %v5123_v52 }
0x1c4d   :  { %1527 = vadd.xlane.f32.xlu0 %v1526_v40  ;;  %v4930_v2 = vpop.xlane.xlu1 %853  ;;  %v1425_v40 = vrot.slane %v1424_v45, 4 }
0x1c4e   :  { %v657_v23 = vrot.slane %v656_v25, 2 }
0x1c4f   :  { %v1426_v27 = vadd.f32 %v1425_v40, %v1424_v45 }
0x1c50   :  { %v658_v21 = vadd.f32 %v657_v23, %v656_v25 }
0x1c51   :  { %2120 = vadd.xlane.f32.xlu0 %v2119_v29  ;;  %v4933_v54 = vpop.xlane.xlu1 %2241  ;;  %v1391_v29 = vmax.f32 %v1390_v36, 1e-15  ;;  %v1427_v15 = vrot.slane %v1426_v27, 2  ;;  %v2125_v36 = vsel %vm724_vm12, %v4928_v50, 0.0 }
0x1c52   :  { %vm2245_vm5 = vcmp.eq.f32.partialorder %v4933_v54, inf  ;;  %vm2247_vm6 = vcmp.eq.f32.partialorder %v4933_v54, 0.0 }
0x1c55   :  { %1537 = vadd.xlane.f32.xlu0 %v1536_v17  ;;  %v4939_v17 = vpop.xlane.xlu1 %2797 }
0x1c59   :  { %2251 = vadd.xlane.f32.xlu0 %v2250_v14  ;;  %v4944_v35 = vpop.xlane.xlu1 %2911 }
0x1c5d   :  { %2901 = vadd.xlane.f32.xlu0 %v2900_v61  ;;  %v2215_v61 = vsel %vm724_vm12, %v2214_v48, 0.0  ;;  %v2059_v48 = vadd.f32 %v2058_v62, %v2057_v32 }
0x1c5f   :  { %v2060_v11 = vrot.slane %v2059_v48, 1 }
0x1c61   :  { %714 = vadd.xlane.f32.xlu0 %v713_v20  ;;  %v2061_v53 = vadd.f32 %v2060_v11, %v2059_v48 }
0x1c65   :  { %2115 = vadd.xlane.f32.xlu0 %v2114_v1 }
0x1c69   :  { %1826 = vadd.xlane.f32.xlu0 %v1825_v28 }
0x1c91   :  { %v3184_v34 = vpop.xlane.xlu0 %3183 }
0x1c92   :  { %v4918_v6 = vsub.f32 %v4861_v13, %v3184_v34 }
0x1c94   :  { %v3186_v56 = vmul.f32 1.442695, %v4918_v6 }
0x1c96   :  { %3798 = vpow2.f32 %v3186_v56  ;;  %v659_v56 = vrot.slane %v658_v21, 1 }
0x1c97   :  { %3800 = vrcp.f32 %v1391_v29 }
0x1c98   :  { %v660_v47 = vadd.f32 %v659_v56, %v658_v21 }
0x1c99   :  { %v2773_v33 = vpop.permute.xlu0 %2772 }
0x1c9a   :  { %v2780_v22 = vmul.f32 %v2773_v33, %v4651_v30 }
0x1c9c   :  { %v2782_v4 = vsel %vm1159_vm15, %v2780_v22, 0.0 }
0x1c9d   :  { %v2784_v57 = vadd.f32 %v2783_v42, %v2782_v4  ;;  %v1428_v4 = vadd.f32 %v1427_v15, %v1426_v27  ;;  %v2062_v27 = vmax.f32 %v2061_v53, 1e-15 }
0x1c9f   :  { %v2785_v38 = vrot.slane %v2784_v57, 4 }
0x1ca0   :  { %v3799_v49 = vpop.eup %3798 }
0x1ca1   :  { %v2786_v12 = vadd.f32 %v2785_v38, %v2784_v57  ;;  %v3188_v43 = vsel %vm1818_vm11, %v3799_v49, 0.0  ;;  %v1429_v49 = vrot.slane %v1428_v4, 1 }
0x1ca3   :  { %v2787_v60 = vrot.slane %v2786_v12, 2  ;;  %v1430_v31 = vadd.f32 %v1429_v49, %v1428_v4 }
0x1ca5   :  { %v2788_v26 = vadd.f32 %v2787_v60, %v2786_v12  ;;  %v1418_v60 = vpop.xlane.xlu1 %1417 }
0x1ca7   :  { %v2789_v30 = vrot.slane %v2788_v26, 1 }
0x1ca9   :  { %v2790_v16 = vadd.f32 %v2789_v30, %v2788_v26 }
0x1cab   :  { %v2791_v59 = vmul.f32 %v2790_v16, %v2790_v16 }
0x1cad   :  { %v2792_v13 = vsel %vm1159_vm15, %v2791_v59, 0.0 }
0x1cae   :  { %2793 = vadd.xlane.f32.xlu1 %v2792_v13  ;;  %v3801_v13 = vpop.eup %3800 }
0x1cb2   :  { %3189 = vadd.xlane.f32.xlu1 %v3188_v43  ;;  %v1431_v43 = vmul.f32 %v3801_v13, %v1418_v60 }
0x1cb4   :  { %v1432_v52 = vsub.f32 %v1430_v31, %v1431_v43 }
0x1cb6   :  { %v1433_v46 = vsub.f32 0.0, %v1432_v52 }
0x1cc6   :  { %v813_v44 = vpop.xlane.xlu0 %812 }
0x1cc7   :  { %v818_v10 = vadd.f32 %v817_v58, %v813_v44 }
0x1cc9   :  { %v819_v39 = vrot.slane %v818_v10, 4 }
0x1cca   :  { %v1501_v51 = vpop.xlane.xlu0 %1500 }
0x1ccb   :  { %v1502_v14 = vsel %vm448_vm3, %v1501_v51, 0.0  ;;  %v820_v55 = vadd.f32 %v819_v39, %v818_v10  ;;  %v855_v10 = vmax.f32 %v4930_v2, 1e-15 }
0x1ccc   :  { %v1503_v37 = vrot.slane %v1502_v14, 4 }
0x1ccd   :  { %v821_v33 = vrot.slane %v820_v55, 2 }
0x1cce   :  { %v1504_v19 = vadd.f32 %v1503_v37, %v1502_v14  ;;  %v2211_v20 = vpop.xlane.xlu0 %2210 }
0x1ccf   :  { %v2216_v1 = vadd.f32 %v2215_v61, %v2211_v20  ;;  %v822_v26 = vadd.f32 %v821_v33, %v820_v55 }
0x1cd0   :  { %v1505_v28 = vrot.slane %v1504_v19, 2 }
0x1cd1   :  { %v2217_v34 = vrot.slane %v2216_v1, 4  ;;  %v823_v7 = vrot.slane %v822_v26, 1 }
0x1cd2   :  { %v1506_v22 = vadd.f32 %v1505_v28, %v1504_v19  ;;  %v723_v42 = vpop.xlane.xlu0 %722  ;;  %v1434_v19 = vmul.f32 %v3801_v13, %v1433_v46 }
0x1cd3   :  { %v2218_v57 = vadd.f32 %v2217_v34, %v2216_v1  ;;  %v725_v24 = vsel %vm724_vm12, %v723_v42, 0.0  ;;  %v4956_v58 = vadd.f32 %v823_v7, %v822_v26 }
0x1cd4   :  { %v1507_v38 = vrot.slane %v1506_v22, 1  ;;  %v726_v16 = vadd.f32 %v725_v24, %v720_v5  ;;  %v661_v5 = vmax.f32 %v660_v47, 1e-15 }
0x1cd5   :  { %v2219_v12 = vrot.slane %v2218_v57, 2  ;;  %vm827_vm12 = vcmp.eq.f32.partialorder %v4956_v58, inf  ;;  %vm829_vm13 = vcmp.eq.f32.partialorder %v4956_v58, 0.0 }
0x1cd6   :  { %v1508_v30 = vadd.f32 %v1507_v38, %v1506_v22  ;;  %v4947_v59 = vpop.xlane.xlu0 %843  ;;  %v727_v41 = vrot.slane %v726_v16, 4 }
0x1cd7   :  { %3802 = vrsqrt.f32 %v4947_v59  ;;  %v2220_v3 = vadd.f32 %v2219_v12, %v2218_v57  ;;  %vm847_vm2 = vcmp.eq.f32.partialorder %v4947_v59, inf  ;;  %v850_v4 = vand.u32 2147483648, %v4947_v59 }
0x1cd8   :  { %3804 = vrsqrt.f32 %v1508_v30  ;;  %v728_v44 = vadd.f32 %v727_v41, %v726_v16  ;;  %vm1511_vm0 = vcmp.eq.f32.partialorder %v1508_v30, inf  ;;  %v1514_v61 = vand.u32 2147483648, %v1508_v30 }
0x1cd9   :  { %v2221_v45 = vrot.slane %v2220_v3, 1  ;;  %vm1513_vm1 = vcmp.eq.f32.partialorder %v1508_v30, 0.0  ;;  %vm849_vm4 = vcmp.eq.f32.partialorder %v4947_v59, 0.0  ;;  %v2248_v16 = vand.u32 2147483648, %v4933_v54 }
0x1cda   :  { %v4950_v0 = vpop.xlane.xlu0 %1527  ;;  %v729_v14 = vrot.slane %v728_v44, 2 }
0x1cdb   :  { %3806 = vrsqrt.f32 %v4950_v0  ;;  %v4959_v29 = vadd.f32 %v2221_v45, %v2220_v3  ;;  %vm1531_vm15 = vcmp.eq.f32.partialorder %v4950_v0, inf  ;;  %v1534_v13 = vand.u32 2147483648, %v4950_v0 }
0x1cdc   :  { %3808 = vrsqrt.f32 %v4933_v54  ;;  %v730_v15 = vadd.f32 %v729_v14, %v728_v44  ;;  %vm1533_vm8 = vcmp.eq.f32.partialorder %v4950_v0, 0.0 }
0x1cdd   :  { %3810 = vrcp.f32 %v661_v5  ;;  %vm2225_vm14 = vcmp.eq.f32.partialorder %v4959_v29, inf  ;;  %vm2227_vm9 = vcmp.eq.f32.partialorder %v4959_v29, 0.0 }
0x1cde   :  { %v2121_v40 = vpop.xlane.xlu0 %2120  ;;  %3812 = vrsqrt.f32 %v4956_v58  ;;  %v731_v38 = vrot.slane %v730_v15, 1 }
0x1cdf   :  { %v2126_v25 = vadd.f32 %v2125_v36, %v2121_v40  ;;  %3814 = vrcp.f32 %v855_v10 }
0x1ce0   :  { %3816 = vrsqrt.f32 %v4959_v29  ;;  %v732_v3 = vadd.f32 %v731_v38, %v730_v15 }
0x1ce1   :  { %v3803_v63 = vpop.eup %3802  ;;  %v2127_v39 = vrot.slane %v2126_v25, 4 }
0x1ce2   :  { %v3805_v51 = vpop.eup %3804  ;;  %v1538_v37 = vpop.xlane.xlu0 %1537  ;;  %v846_v2 = vmul.f32 %v3803_v63, %v4947_v59 }
0x1ce3   :  { %v2128_v50 = vadd.f32 %v2127_v39, %v2126_v25  ;;  %v1539_v23 = vmax.f32 %v1538_v37, 1e-15  ;;  %v1510_v32 = vmul.f32 %v3805_v51, %v1508_v30 }
0x1ce4   :  { %v848_v22 = vsel %vm847_vm2, %v4947_v59, %v846_v2 }
0x1ce5   :  { %v3807_v55 = vpop.eup %3806  ;;  %3818 = vrcp.f32 %v1539_v23  ;;  %v1512_v20 = vsel %vm1511_vm0, %v1508_v30, %v1510_v32  ;;  %v2129_v34 = vrot.slane %v2128_v50, 2  ;;  %v851_v48 = vsel %vm849_vm4, %v850_v4, %v848_v22 }
0x1ce6   :  { %v2252_v1 = vpop.xlane.xlu0 %2251  ;;  %v1515_v28 = vsel %vm1513_vm1, %v1514_v61, %v1512_v20  ;;  %v3809_v21 = vpop.eup %3808  ;;  %3820 = vrcp.f32 %v2062_v27  ;;  %v1530_v42 = vmul.f32 %v3807_v55, %v4950_v0  ;;  %v830_v27 = vand.u32 2147483648, %v4956_v58 }
0x1ce7   :  { %v2253_v62 = vmax.f32 %v2252_v1, 1e-15  ;;  %v1575_v33 = vadd.f32 %v1515_v28, %v1434_v19  ;;  %v2244_v57 = vmul.f32 %v3809_v21, %v4933_v54  ;;  %v3811_v56 = vpop.eup %3810  ;;  %v2130_v12 = vadd.f32 %v2129_v34, %v2128_v50 }
0x1ce8   :  { %v3813_v60 = vpop.eup %3812  ;;  %v1532_v26 = vsel %vm1531_vm15, %v4950_v0, %v1530_v42  ;;  %v2228_v1 = vand.u32 2147483648, %v4959_v29  ;;  %vm3198_vm1 = vcmask 0  }
0x1ce9   :  { %3822 = vrcp.f32 %v2253_v62  ;;  %v3815_v30 = vpop.eup %3814  ;;  %v2246_v59 = vsel %vm2245_vm5, %v4933_v54, %v2244_v57  ;;  %v1535_v7 = vsel %vm1533_vm8, %v1534_v13, %v1532_v26  ;;  %v826_v41 = vmul.f32 %v3813_v60, %v4956_v58 }
0x1cea   :  { %v4970_v24 = vpop.xlane.xlu0 %2901  ;;  %v3817_v49 = vpop.eup %3816  ;;  %v857_v47 = vmul.f32 %v3815_v30, %v851_v48  ;;  %v2131_v45 = vrot.slane %v2130_v12, 1  ;;  %v2249_v53 = vsel %vm2247_vm6, %v2248_v16, %v2246_v59  ;;  %v2799_v59 = vsel %vm448_vm3, %v4939_v17, 0.0 }
0x1ceb   :  { %v2224_v0 = vmul.f32 %v3817_v49, %v4959_v29  ;;  %v828_v63 = vsel %vm827_vm12, %v4956_v58, %v826_v41  ;;  %vm2907_vm10 = vcmp.eq.f32.partialorder %v4970_v24, 0.0 }
0x1cec   :  { %v858_v40 = vmul.f32 3.4641016, %v857_v47  ;;  %v2132_v39 = vadd.f32 %v2131_v45, %v2130_v12  ;;  %v831_v23 = vsel %vm829_vm13, %v830_v27, %v828_v63  ;;  %v2876_v12 = vsel %vm448_vm3, %v4922_v18, 0.0 }
0x1ced   :  { %v2226_v2 = vsel %vm2225_vm14, %v4959_v29, %v2224_v0  ;;  %v2877_v48 = vrot.slane %v2876_v12, 4  ;;  %v2800_v47 = vrot.slane %v2799_v59, 4  ;;  %vm2905_vm3 = vcmp.eq.f32.partialorder %v4970_v24, inf }
0x1cee   :  { %v715_v43 = vpop.xlane.xlu0 %714  ;;  %v3246_v32 = vadd.f32 -1.0, %v858_v40  ;;  %v2229_v21 = vsel %vm2227_vm9, %v2228_v1, %v2226_v2 }
0x1cef   :  { %v3819_v11 = vpop.eup %3818  ;;  %v733_v31 = vmul.f32 %v3811_v56, %v715_v43  ;;  %v2878_v60 = vadd.f32 %v2877_v48, %v2876_v12  ;;  %v2801_v18 = vadd.f32 %v2800_v47, %v2799_v59 }
0x1cf0   :  { %v1541_v5 = vmul.f32 %v3819_v11, %v1535_v7  ;;  %v3821_v36 = vpop.eup %3820  ;;  %v2913_v7 = vmax.f32 %v4944_v35, 1e-15 }
0x1cf1   :  { %v734_v52 = vsub.f32 %v732_v3, %v733_v31  ;;  %v2879_v30 = vrot.slane %v2878_v60, 2  ;;  %v2802_v41 = vrot.slane %v2801_v18, 2 }
0x1cf2   :  { %v1542_v44 = vmul.f32 2.4494898, %v1541_v5  ;;  %v2116_v10 = vpop.xlane.xlu0 %2115  ;;  %v2908_v5 = vand.u32 2147483648, %v4970_v24 }
0x1cf3   :  { %v3823_v25 = vpop.eup %3822  ;;  %v735_v46 = vsub.f32 0.0, %v734_v52  ;;  %v2133_v51 = vmul.f32 %v3821_v36, %v2116_v10  ;;  %v2880_v13 = vadd.f32 %v2879_v30, %v2878_v60  ;;  %v2803_v45 = vadd.f32 %v2802_v41, %v2801_v18 }
0x1cf4   :  { %v3261_v54 = vadd.f32 -1.0, %v1542_v44  ;;  %v2255_v14 = vmul.f32 %v3823_v25, %v2249_v53 }
0x1cf5   :  { %v736_v37 = vmul.f32 %v3811_v56, %v735_v46  ;;  %v2134_v50 = vsub.f32 %v2132_v39, %v2133_v51  ;;  %v2761_v56 = vrot.slane %v4698_v9, 4  ;;  %v2804_v52 = vrot.slane %v2803_v45, 1 }
0x1cf6   :  { %v1827_v61 = vpop.xlane.xlu0 %1826  ;;  %v1576_v55 = vadd.f32 %v3261_v54, %v1575_v33  ;;  %v2256_v15 = vmul.f32 3.4641016, %v2255_v14 }
0x1cf7   :  { %v908_v19 = vadd.f32 %v831_v23, %v736_v37  ;;  %v2135_v20 = vsub.f32 0.0, %v2134_v50  ;;  %3824 = vlog2.f32 %v1827_v61  ;;  %v2762_v29 = vadd.f32 %v2761_v56, %v4698_v9 }
0x1cf8   :  { %v3276_v22 = vadd.f32 -1.0, %v2256_v15  ;;  %3826 = vrsqrt.f32 %v4970_v24  ;;  %v2805_v0 = vadd.f32 %v2804_v52, %v2803_v45 }
0x1cf9   :  { %v909_v28 = vadd.f32 %v3246_v32, %v908_v19  ;;  %v2136_v58 = vmul.f32 %v3821_v36, %v2135_v20  ;;  %v2763_v26 = vrot.slane %v2762_v29, 2 }
0x1cfb   :  { %v2304_v34 = vadd.f32 %v2229_v21, %v2136_v58  ;;  %v1833_v62 = vadd.f32 %v1576_v55, %v909_v28  ;;  %v2764_v16 = vadd.f32 %v2763_v26, %v2762_v29 }
0x1cfd   :  { %v2305_v42 = vadd.f32 %v3276_v22, %v2304_v34  ;;  %v2765_v49 = vrot.slane %v2764_v16, 1 }
0x1cff   :  { %v3195_v4 = vadd.f32 %v2305_v42, %v1833_v62  ;;  %v2766_v3 = vadd.f32 %v2765_v49, %v2764_v16 }
0x1d01   :  { %v3825_v57 = vpop.eup %3824  ;;  %v2767_v11 = vmax.f32 %v2766_v3, 1e-15 }
0x1d02   :  { %v1829_v38 = vmul.f32 0.6931472, %v3825_v57  ;;  %v3827_v9 = vpop.eup %3826 }
0x1d03   :  { %v2904_v31 = vmul.f32 %v3827_v9, %v4970_v24 }
0x1d04   :  { %v1830_v33 = vsub.f32 %v4902_v8, %v1829_v38  ;;  %v2881_v8 = vrot.slane %v2880_v13, 1 }
0x1d05   :  { %v2906_v17 = vsel %vm2905_vm3, %v4970_v24, %v2904_v31 }
0x1d06   :  { %1831 = vst.msk [vmem:[#allocation2] sm:$0x1] %vm1818_vm11, %v1830_v33  ;;  %v2882_v43 = vadd.f32 %v2881_v8, %v2880_v13  ;;  %v2909_v36 = vsel %vm2907_vm10, %v2908_v5, %v2906_v17 }
0x1d08   :  { %3828 = vrsqrt.f32 %v2882_v43  ;;  %vm2885_vm7 = vcmp.eq.f32.partialorder %v2882_v43, inf  ;;  %v2888_v14 = vand.u32 2147483648, %v2882_v43  ;;  %vm2887_vm0 = vcmp.eq.f32.partialorder %v2882_v43, 0.0 }
0x1d09   :  { %3830 = vrcp.f32 %v2767_v11 }
0x1d0a   :  { %3832 = vrcp.f32 %v2913_v7 }
0x1d12   :  { %v3829_v53 = vpop.eup %3828 }
0x1d13   :  { %v3831_v35 = vpop.eup %3830  ;;  %v2884_v10 = vmul.f32 %v3829_v53, %v2882_v43 }
0x1d14   :  { %v3833_v44 = vpop.eup %3832 }
0x1d15   :  { %v2915_v63 = vmul.f32 %v3833_v44, %v2909_v36  ;;  %v2886_v51 = vsel %vm2885_vm7, %v2882_v43, %v2884_v10 }
0x1d16   :  { %v2889_v24 = vsel %vm2887_vm0, %v2888_v14, %v2886_v51 }
0x1d17   :  { %v2916_v54 = vmul.f32 2.4494898, %v2915_v63 }
0x1d19   :  { %v3288_v23 = vadd.f32 -1.0, %v2916_v54 }
0x1d3b   :  { %v2794_v40 = vpop.xlane.xlu1 %2793 }
0x1d3c   :  { %v2806_v25 = vmul.f32 %v3831_v35, %v2794_v40 }
0x1d3e   :  { %v2807_v46 = vsub.f32 %v2805_v0, %v2806_v25 }
0x1d3f   :  { %v3190_v39 = vpop.xlane.xlu1 %3189 }
0x1d40   :  { %v2808_v27 = vsub.f32 0.0, %v2807_v46  ;;  %3834 = vlog2.f32 %v3190_v39 }
0x1d42   :  { %v2809_v37 = vmul.f32 %v3831_v35, %v2808_v27 }
0x1d44   :  { %v2948_v50 = vadd.f32 %v2889_v24, %v2809_v37 }
0x1d46   :  { %v2949_v32 = vadd.f32 %v3288_v23, %v2948_v50 }
0x1d48   :  { %v3196_v2 = vadd.f32 %v3195_v4, %v2949_v32 }
0x1d4a   :  { %v3835_v61 = vpop.eup %3834  ;;  %v3197_v55 = vmul.f32 0.5, %v3196_v2 }
0x1d4b   :  { %v3192_v19 = vmul.f32 0.6931472, %v3835_v61 }
0x1d4c   :  { %3199 = vst.msk [vmem:[#allocation4] sm:$0x1] %vm3198_vm1, %v3197_v55 }
0x1d4d   :  { %v3193_v20 = vsub.f32 %v4918_v6, %v3192_v19 }
0x1d4e   :  { %3854 = shalt.err (!%p3851_p4)
}
0x1d4f   :  { %s3855_s16 = scalar_lea.hbm %s5063_s25, 16 }
0x1d50   :  { %p3856_p5 = scmp.ne.s32.totalorder %s5063_s25, %s3855_s16  ;;  %p3859_p6 = scmp.lt.u32.totalorder %s3855_s16, %s5063_s25 }
0x1d52   :  { %p3861_p7 = pnand %p3859_p6, %p3856_p5 }
0x1d54   :  { %3864 = shalt.err (!%p3861_p7)
}
0x1d55   :  { %3221 = dma.vmem_to_hbm [thread:$0]  %s3219_s20, 16, %s5063_s25, [#allocation5]   ;;  %3194 = vst.msk [vmem:[#allocation2 + $0x1] sm:$0x1] %vm1818_vm11, %v3193_v20 }
0x1d56   :  { %s3865_s28 = scalar_lea.vmem %s5005_s19, 32  ;;  %p3870_p9 = scmp.lt.s32.totalorder %s5005_s19, %s5005_s19 }
0x1d57   :  { %p3866_p8 = scmp.ne.s32.totalorder %s5005_s19, %s3865_s28  ;;  %p3871_p10 = scmp.lt.s32.totalorder %s3865_s28, %s3865_s28 }
0x1d59   :  { %p3872_p11 = por %p3871_p10, %p3870_p9 }
0x1d5b   :  { %p3873_p12 = pnand %p3872_p11, %p3866_p8 }
0x1d5d   :  { %3876 = shalt.err (!%p3873_p12)
}
0x1d5e   :  { %s3877_s11 = scalar_lea.hbm %s5062_s24, 32 }
0x1d5f   :  { %p3878_p13 = scmp.ne.s32.totalorder %s5062_s24, %s3877_s11  ;;  %p3881_p0 = scmp.lt.u32.totalorder %s3877_s11, %s5062_s24 }
0x1d61   :  { %p3883_p1 = pnand %p3881_p0, %p3878_p13 }
0x1d63   :  { %3886 = shalt.err (!%p3883_p1)
}
0x1d64   :  { %3211 = dma.vmem_to_hbm [thread:$0]  %s5005_s19, 32, %s5062_s24, [#allocation3]  }
0x1d65   :  { %3887 = dma.done.wait [#allocation3], 32  }
0x1d66   :  { %3888 = vsyncadd [#allocation3], 4294967264 }
0x1d67   :  { %3889 = dma.done.wait [#allocation5], 16  }
0x1d68   :  { %3890 = vsyncadd [#allocation5], 4294967280 }
0x1d69   :  { %3230 = vsyncpa [#allocation3], 1 }
0x1d6a   :  { %3231 = vsyncpa [#allocation5], 1 }

</bundles_post_ra>
